<compile_context>
chip_gen: v7x
topology: tpu7x:2x2x1
jax: 0.10.0
libtpu: 0.0.40
codegen_flags: <defaults>
</compile_context>

<pallas_src>
import math

import jax
import jax.numpy as jnp
from jax.experimental import pallas as pl
from jax.experimental.pallas import tpu as pltpu


def _round_up(v, m=128):
    return ((v + m - 1) // m) * m


# ---------------------------------------------------------------------------
# Fused Pallas kernel: conv0 + BN0 + ReLU + conv1 + BN1 + ReLU on lane-dense
# [C, N*H*W] slabs.  All loops are over static (tiny) kernel/channel extents,
# unrolled at trace time into slab FMAs on the VPU.
# ---------------------------------------------------------------------------
def _make_fused_kernel(C0, C1, C2, KH0, KW0, KH1, KW1, W, w_a0, w_out):
    def kernel(x_ref, w0_ref, b0_ref, w1_ref, b1_ref, o_ref, a0_ref):
        # ---- layer 0: conv(C0 -> C1, KH0 x KW0, stride 1, VALID) + bias + ReLU
        # acc0[:, p] accumulates output for flat pixel p (full-width rows; the
        # right-edge / bottom garbage columns are never read by layer 1).
        acc0 = jnp.zeros((C1, w_a0), jnp.float32)
        for i in range(KH0):
            for j in range(KW0):
                off = i * W + j
                for c in range(C0):
                    r = (i * KW0 + j) * C0 + c
                    tap = x_ref[c:c + 1, off:off + w_a0]        # [1, w_a0]
                    acc0 = acc0 + tap * w0_ref[:, r:r + 1]      # [C1, w_a0] FMA
        a0_ref[...] = jnp.maximum(acc0 + b0_ref[...], 0.0)      # stage to VMEM

        # ---- layer 1: conv(C1 -> C2, KH1 x KW1, stride 1, VALID) + bias + ReLU
        acc1 = jnp.zeros((C2, w_out), jnp.float32)
        for i in range(KH1):
            for j in range(KW1):
                off = i * W + j
                for c in range(C1):
                    r = (i * KW1 + j) * C1 + c
                    tap = a0_ref[c:c + 1, off:off + w_out]      # [1, w_out]
                    acc1 = acc1 + tap * w1_ref[:, r:r + 1]      # [C2, w_out] FMA
        # single unmasked lane-dense store of all channels
        o_ref[...] = jnp.maximum(acc1 + b1_ref[...], 0.0)

    return kernel


def _fold_bn_into_conv(lp, eps):
    """Fold inference-mode BatchNorm into the conv weights / bias.

    Returns (w_mat, b_col):
      w_mat [Cout, KH*KW*Cin], column index ((kh*KW + kw)*Cin + cin)
      b_col [Cout, 1]
    """
    scale = lp["gamma"] / jnp.sqrt(lp["rvar"] + eps)              # [Cout]
    w_eff = lp["w"] * scale[:, None, None, None]                  # [Cout,Cin,KH,KW]
    b_eff = lp["beta"] - lp["rmean"] * scale                      # [Cout]
    cout, cin, kh, kw = lp["w"].shape
    w_mat = jnp.transpose(w_eff, (0, 2, 3, 1)).reshape(cout, kh * kw * cin)
    return w_mat.astype(jnp.float32), b_eff.astype(jnp.float32)[:, None]


@jax.jit
def conv2d_block_forward(x_nchw, layers, eps=1e-5):
    """Full Conv2DBlock forward (this config: 2 x [Conv2d + BN(eval) + ReLU])."""
    N, C0, H, W = x_nchw.shape
    l0, l1 = layers
    C1, _, KH0, KW0 = l0["w"].shape
    C2, _, KH1, KW1 = l1["w"].shape
    Ho0, Wo0 = H - KH0 + 1, W - KW0 + 1          # stride 1, pad 0, dil 1
    Ho1, Wo1 = Ho0 - KH1 + 1, Wo0 - KW1 + 1

    n_hw = N * H * W                                      # 512 = 4 * 128 lanes
    w_out = n_hw                                          # output slab width
    w_a0 = _round_up(w_out + (KH1 - 1) * W + (KW1 - 1))   # layer-0 slab width
    w_x = _round_up(w_a0 + (KH0 - 1) * W + (KW0 - 1))     # padded input width

    # Lane-dense input slab [C0, N*H*W] (+ zero lane-pad so every static tap
    # slice stays in bounds).  Tiny wrapper-side transpose/pad = layout plumbing.
    x_slab = jnp.transpose(x_nchw.astype(jnp.float32), (1, 0, 2, 3)).reshape(C0, n_hw)
    x_slab = jnp.pad(x_slab, ((0, 0), (0, w_x - n_hw)))

    w0m, b0 = _fold_bn_into_conv(l0, eps)
    w1m, b1 = _fold_bn_into_conv(l1, eps)

    kernel = _make_fused_kernel(C0, C1, C2, KH0, KW0, KH1, KW1, W, w_a0, w_out)

    out_slab = pl.pallas_call(
        kernel,
        out_shape=jax.ShapeDtypeStruct((C2, w_out), jnp.float32),
        in_specs=[
            pl.BlockSpec(memory_space=pltpu.MemorySpace.VMEM),   # x slab
            pl.BlockSpec(memory_space=pltpu.MemorySpace.VMEM),   # w0 [C1, 36]
            pl.BlockSpec(memory_space=pltpu.MemorySpace.VMEM),   # b0 [C1, 1]
            pl.BlockSpec(memory_space=pltpu.MemorySpace.VMEM),   # w1 [C2, 24]
            pl.BlockSpec(memory_space=pltpu.MemorySpace.VMEM),   # b1 [C2, 1]
        ],
        out_specs=pl.BlockSpec(memory_space=pltpu.MemorySpace.VMEM),
        scratch_shapes=[pltpu.VMEM((C1, w_a0), jnp.float32)],    # layer-0 act
    )(x_slab, w0m, b0, w1m, b1)

    # Extract the valid region and restore NCHW (contiguous slice + tiny transpose).
    out = out_slab.reshape(C2, N, H, W)[:, :, :Ho1, :Wo1]
    return jnp.transpose(out, (1, 0, 2, 3))


# ---------------------------------------------------------------------------
# Conv2DBlock construction logic (mirrors the PyTorch __init__ hyperparameter
# math for this configuration) + deterministic parameter init.
# ---------------------------------------------------------------------------
def _get_frame_contraction(nin, nout, n):
    # linear interpolation of channel counts from nin to nout over n steps
    return [nin - int(round((nin - nout) * (i + 1) / n)) for i in range(n)]


def build_conv2d_block_params(key, nin, nout, n, size_factor=3,
                              stride_factor=1.0, dil_factor=1.0,
                              pad_factor=0.0):
    nframes = [nin] + _get_frame_contraction(nin, nout, n)
    layers = []
    for i in range(n):
        decay = 1.0 - i / (n - 1) if n > 1 else 1.0
        fs = max(int(math.ceil(size_factor * decay)), 2)
        st = max(int(round(stride_factor * i / (n - 1))) if n > 1 else 1, 1)
        dil = int(round(dil_factor ** i))
        pd = int(round(pad_factor * ((fs - 1) / 2.0) * dil_factor * decay))
        # This script's configuration yields stride=1, dilation=1, pad=0.
        assert st == 1 and dil == 1 and pd == 0
        cin, cout = nframes[i], nframes[i + 1]
        key, kw_, kg, kb, km, kv = jax.random.split(key, 6)
        w = 0.1 * jax.random.normal(kw_, (cout, cin, fs, fs), jnp.float32)
        gamma = 1.0 + 0.1 * jax.random.normal(kg, (cout,), jnp.float32)
        beta = 0.1 * jax.random.normal(kb, (cout,), jnp.float32)
        rmean = 0.1 * jax.random.normal(km, (cout,), jnp.float32)
        rvar = jnp.abs(jax.random.normal(kv, (cout,), jnp.float32)) + 0.5
        layers.append(dict(w=w, gamma=gamma, beta=beta, rmean=rmean, rvar=rvar))
    return layers


# Pure-JAX reference (lax conv, full f32 precision) for correctness check.
def reference_forward(x_nchw, layers, eps=1e-5):
    x = x_nchw
    for lp in layers:
        y = jax.lax.conv_general_dilated(
            x, lp["w"], window_strides=(1, 1), padding="VALID",
            dimension_numbers=("NCHW", "OIHW", "NCHW"),
            precision=jax.lax.Precision.HIGHEST)
        scale = lp["gamma"] / jnp.sqrt(lp["rvar"] + eps)
        bias = lp["beta"] - lp["rmean"] * scale
        x = jnp.maximum(y * scale[None, :, None, None]
                        + bias[None, :, None, None], 0.0)
    return x


if __name__ == "__main__":
    key = jax.random.PRNGKey(0)
    kx, kp = jax.random.split(key)

    x = jax.random.normal(kx, (2, 4, 16, 16), jnp.float32)   # NCHW, like PyTorch
    layers = build_conv2d_block_params(kp, nin=4, nout=8, n=2)

    out = jax.block_until_ready(conv2d_block_forward(x, layers))

    assert out.shape == (2, 8, 13, 13)                       # 16 -(k3)-> 14 -(k2)-> 13
    ref = reference_forward(x, layers)
    assert jnp.allclose(out, ref, atol=1e-4, rtol=1e-4)

    # TODO(synk): nn.Dropout branch not implemented (dropout=None in this config);
    # BatchNorm2d uses inference-mode (running-stat) semantics, folded into the conv.
    print("KERNEL_OK")
</pallas_src>

<mosaic_0001>
module attributes {stable_mosaic.version = 11 : i64} {
  func.func @kernel(%arg0: memref<4x768xf32, #tpu.memory_space<vmem>>, %arg1: memref<6x36xf32, #tpu.memory_space<vmem>>, %arg2: memref<6x1xf32, #tpu.memory_space<vmem>>, %arg3: memref<8x24xf32, #tpu.memory_space<vmem>>, %arg4: memref<8x1xf32, #tpu.memory_space<vmem>>, %arg5: memref<8x512xf32, #tpu.memory_space<vmem>>, %arg6: memref<6x640xf32, #tpu.memory_space<vmem>>) attributes {dimension_semantics = [], scalar_prefetch = 0 : i64, scratch_operands = 1 : i64, tpu.core_type = #tpu.core_type<tc>} {
    %cst = arith.constant 0.000000e+00 : f32
    %0 = vector.broadcast %cst : f32 to vector<6x640xf32>
    %c0 = arith.constant 0 : index
    %c0_0 = arith.constant 0 : index
    %1 = vector.load %arg0[%c0, %c0_0] : memref<4x768xf32, #tpu.memory_space<vmem>>, vector<1x640xf32>
    %c0_1 = arith.constant 0 : index
    %c0_2 = arith.constant 0 : index
    %2 = vector.load %arg1[%c0_1, %c0_2] : memref<6x36xf32, #tpu.memory_space<vmem>>, vector<6x1xf32>
    %3 = vector.broadcast %1 : vector<1x640xf32> to vector<6x640xf32>
    %4 = vector.broadcast %2 : vector<6x1xf32> to vector<6x640xf32>
    %5 = arith.mulf %3, %4 : vector<6x640xf32>
    %6 = arith.addf %0, %5 : vector<6x640xf32>
    %c1 = arith.constant 1 : index
    %c0_3 = arith.constant 0 : index
    %7 = vector.load %arg0[%c1, %c0_3] : memref<4x768xf32, #tpu.memory_space<vmem>>, vector<1x640xf32>
    %c0_4 = arith.constant 0 : index
    %c1_5 = arith.constant 1 : index
    %8 = vector.load %arg1[%c0_4, %c1_5] : memref<6x36xf32, #tpu.memory_space<vmem>>, vector<6x1xf32>
    %9 = vector.broadcast %7 : vector<1x640xf32> to vector<6x640xf32>
    %10 = vector.broadcast %8 : vector<6x1xf32> to vector<6x640xf32>
    %11 = arith.mulf %9, %10 : vector<6x640xf32>
    %12 = arith.addf %6, %11 : vector<6x640xf32>
    %c2 = arith.constant 2 : index
    %c0_6 = arith.constant 0 : index
    %13 = vector.load %arg0[%c2, %c0_6] : memref<4x768xf32, #tpu.memory_space<vmem>>, vector<1x640xf32>
    %c0_7 = arith.constant 0 : index
    %c2_8 = arith.constant 2 : index
    %14 = vector.load %arg1[%c0_7, %c2_8] : memref<6x36xf32, #tpu.memory_space<vmem>>, vector<6x1xf32>
    %15 = vector.broadcast %13 : vector<1x640xf32> to vector<6x640xf32>
    %16 = vector.broadcast %14 : vector<6x1xf32> to vector<6x640xf32>
    %17 = arith.mulf %15, %16 : vector<6x640xf32>
    %18 = arith.addf %12, %17 : vector<6x640xf32>
    %c3 = arith.constant 3 : index
    %c0_9 = arith.constant 0 : index
    %19 = vector.load %arg0[%c3, %c0_9] : memref<4x768xf32, #tpu.memory_space<vmem>>, vector<1x640xf32>
    %c0_10 = arith.constant 0 : index
    %c3_11 = arith.constant 3 : index
    %20 = vector.load %arg1[%c0_10, %c3_11] : memref<6x36xf32, #tpu.memory_space<vmem>>, vector<6x1xf32>
    %21 = vector.broadcast %19 : vector<1x640xf32> to vector<6x640xf32>
    %22 = vector.broadcast %20 : vector<6x1xf32> to vector<6x640xf32>
    %23 = arith.mulf %21, %22 : vector<6x640xf32>
    %24 = arith.addf %18, %23 : vector<6x640xf32>
    %c0_12 = arith.constant 0 : index
    %c1_13 = arith.constant 1 : index
    %25 = vector.load %arg0[%c0_12, %c1_13] : memref<4x768xf32, #tpu.memory_space<vmem>>, vector<1x640xf32>
    %c0_14 = arith.constant 0 : index
    %c4 = arith.constant 4 : index
    %26 = vector.load %arg1[%c0_14, %c4] : memref<6x36xf32, #tpu.memory_space<vmem>>, vector<6x1xf32>
    %27 = vector.broadcast %25 : vector<1x640xf32> to vector<6x640xf32>
    %28 = vector.broadcast %26 : vector<6x1xf32> to vector<6x640xf32>
    %29 = arith.mulf %27, %28 : vector<6x640xf32>
    %30 = arith.addf %24, %29 : vector<6x640xf32>
    %c1_15 = arith.constant 1 : index
    %c1_16 = arith.constant 1 : index
    %31 = vector.load %arg0[%c1_15, %c1_16] : memref<4x768xf32, #tpu.memory_space<vmem>>, vector<1x640xf32>
    %c0_17 = arith.constant 0 : index
    %c5 = arith.constant 5 : index
    %32 = vector.load %arg1[%c0_17, %c5] : memref<6x36xf32, #tpu.memory_space<vmem>>, vector<6x1xf32>
    %33 = vector.broadcast %31 : vector<1x640xf32> to vector<6x640xf32>
    %34 = vector.broadcast %32 : vector<6x1xf32> to vector<6x640xf32>
    %35 = arith.mulf %33, %34 : vector<6x640xf32>
    %36 = arith.addf %30, %35 : vector<6x640xf32>
    %c2_18 = arith.constant 2 : index
    %c1_19 = arith.constant 1 : index
    %37 = vector.load %arg0[%c2_18, %c1_19] : memref<4x768xf32, #tpu.memory_space<vmem>>, vector<1x640xf32>
    %c0_20 = arith.constant 0 : index
    %c6 = arith.constant 6 : index
    %38 = vector.load %arg1[%c0_20, %c6] : memref<6x36xf32, #tpu.memory_space<vmem>>, vector<6x1xf32>
    %39 = vector.broadcast %37 : vector<1x640xf32> to vector<6x640xf32>
    %40 = vector.broadcast %38 : vector<6x1xf32> to vector<6x640xf32>
    %41 = arith.mulf %39, %40 : vector<6x640xf32>
    %42 = arith.addf %36, %41 : vector<6x640xf32>
    %c3_21 = arith.constant 3 : index
    %c1_22 = arith.constant 1 : index
    %43 = vector.load %arg0[%c3_21, %c1_22] : memref<4x768xf32, #tpu.memory_space<vmem>>, vector<1x640xf32>
    %c0_23 = arith.constant 0 : index
    %c7 = arith.constant 7 : index
    %44 = vector.load %arg1[%c0_23, %c7] : memref<6x36xf32, #tpu.memory_space<vmem>>, vector<6x1xf32>
    %45 = vector.broadcast %43 : vector<1x640xf32> to vector<6x640xf32>
    %46 = vector.broadcast %44 : vector<6x1xf32> to vector<6x640xf32>
    %47 = arith.mulf %45, %46 : vector<6x640xf32>
    %48 = arith.addf %42, %47 : vector<6x640xf32>
    %c0_24 = arith.constant 0 : index
    %c2_25 = arith.constant 2 : index
    %49 = vector.load %arg0[%c0_24, %c2_25] : memref<4x768xf32, #tpu.memory_space<vmem>>, vector<1x640xf32>
    %c0_26 = arith.constant 0 : index
    %c8 = arith.constant 8 : index
    %50 = vector.load %arg1[%c0_26, %c8] : memref<6x36xf32, #tpu.memory_space<vmem>>, vector<6x1xf32>
    %51 = vector.broadcast %49 : vector<1x640xf32> to vector<6x640xf32>
    %52 = vector.broadcast %50 : vector<6x1xf32> to vector<6x640xf32>
    %53 = arith.mulf %51, %52 : vector<6x640xf32>
    %54 = arith.addf %48, %53 : vector<6x640xf32>
    %c1_27 = arith.constant 1 : index
    %c2_28 = arith.constant 2 : index
    %55 = vector.load %arg0[%c1_27, %c2_28] : memref<4x768xf32, #tpu.memory_space<vmem>>, vector<1x640xf32>
    %c0_29 = arith.constant 0 : index
    %c9 = arith.constant 9 : index
    %56 = vector.load %arg1[%c0_29, %c9] : memref<6x36xf32, #tpu.memory_space<vmem>>, vector<6x1xf32>
    %57 = vector.broadcast %55 : vector<1x640xf32> to vector<6x640xf32>
    %58 = vector.broadcast %56 : vector<6x1xf32> to vector<6x640xf32>
    %59 = arith.mulf %57, %58 : vector<6x640xf32>
    %60 = arith.addf %54, %59 : vector<6x640xf32>
    %c2_30 = arith.constant 2 : index
    %c2_31 = arith.constant 2 : index
    %61 = vector.load %arg0[%c2_30, %c2_31] : memref<4x768xf32, #tpu.memory_space<vmem>>, vector<1x640xf32>
    %c0_32 = arith.constant 0 : index
    %c10 = arith.constant 10 : index
    %62 = vector.load %arg1[%c0_32, %c10] : memref<6x36xf32, #tpu.memory_space<vmem>>, vector<6x1xf32>
    %63 = vector.broadcast %61 : vector<1x640xf32> to vector<6x640xf32>
    %64 = vector.broadcast %62 : vector<6x1xf32> to vector<6x640xf32>
    %65 = arith.mulf %63, %64 : vector<6x640xf32>
    %66 = arith.addf %60, %65 : vector<6x640xf32>
    %c3_33 = arith.constant 3 : index
    %c2_34 = arith.constant 2 : index
    %67 = vector.load %arg0[%c3_33, %c2_34] : memref<4x768xf32, #tpu.memory_space<vmem>>, vector<1x640xf32>
    %c0_35 = arith.constant 0 : index
    %c11 = arith.constant 11 : index
    %68 = vector.load %arg1[%c0_35, %c11] : memref<6x36xf32, #tpu.memory_space<vmem>>, vector<6x1xf32>
    %69 = vector.broadcast %67 : vector<1x640xf32> to vector<6x640xf32>
    %70 = vector.broadcast %68 : vector<6x1xf32> to vector<6x640xf32>
    %71 = arith.mulf %69, %70 : vector<6x640xf32>
    %72 = arith.addf %66, %71 : vector<6x640xf32>
    %c0_36 = arith.constant 0 : index
    %c16 = arith.constant 16 : index
    %73 = vector.load %arg0[%c0_36, %c16] : memref<4x768xf32, #tpu.memory_space<vmem>>, vector<1x640xf32>
    %c0_37 = arith.constant 0 : index
    %c12 = arith.constant 12 : index
    %74 = vector.load %arg1[%c0_37, %c12] : memref<6x36xf32, #tpu.memory_space<vmem>>, vector<6x1xf32>
    %75 = vector.broadcast %73 : vector<1x640xf32> to vector<6x640xf32>
    %76 = vector.broadcast %74 : vector<6x1xf32> to vector<6x640xf32>
    %77 = arith.mulf %75, %76 : vector<6x640xf32>
    %78 = arith.addf %72, %77 : vector<6x640xf32>
    %c1_38 = arith.constant 1 : index
    %c16_39 = arith.constant 16 : index
    %79 = vector.load %arg0[%c1_38, %c16_39] : memref<4x768xf32, #tpu.memory_space<vmem>>, vector<1x640xf32>
    %c0_40 = arith.constant 0 : index
    %c13 = arith.constant 13 : index
    %80 = vector.load %arg1[%c0_40, %c13] : memref<6x36xf32, #tpu.memory_space<vmem>>, vector<6x1xf32>
    %81 = vector.broadcast %79 : vector<1x640xf32> to vector<6x640xf32>
    %82 = vector.broadcast %80 : vector<6x1xf32> to vector<6x640xf32>
    %83 = arith.mulf %81, %82 : vector<6x640xf32>
    %84 = arith.addf %78, %83 : vector<6x640xf32>
    %c2_41 = arith.constant 2 : index
    %c16_42 = arith.constant 16 : index
    %85 = vector.load %arg0[%c2_41, %c16_42] : memref<4x768xf32, #tpu.memory_space<vmem>>, vector<1x640xf32>
    %c0_43 = arith.constant 0 : index
    %c14 = arith.constant 14 : index
    %86 = vector.load %arg1[%c0_43, %c14] : memref<6x36xf32, #tpu.memory_space<vmem>>, vector<6x1xf32>
    %87 = vector.broadcast %85 : vector<1x640xf32> to vector<6x640xf32>
    %88 = vector.broadcast %86 : vector<6x1xf32> to vector<6x640xf32>
    %89 = arith.mulf %87, %88 : vector<6x640xf32>
    %90 = arith.addf %84, %89 : vector<6x640xf32>
    %c3_44 = arith.constant 3 : index
    %c16_45 = arith.constant 16 : index
    %91 = vector.load %arg0[%c3_44, %c16_45] : memref<4x768xf32, #tpu.memory_space<vmem>>, vector<1x640xf32>
    %c0_46 = arith.constant 0 : index
    %c15 = arith.constant 15 : index
    %92 = vector.load %arg1[%c0_46, %c15] : memref<6x36xf32, #tpu.memory_space<vmem>>, vector<6x1xf32>
    %93 = vector.broadcast %91 : vector<1x640xf32> to vector<6x640xf32>
    %94 = vector.broadcast %92 : vector<6x1xf32> to vector<6x640xf32>
    %95 = arith.mulf %93, %94 : vector<6x640xf32>
    %96 = arith.addf %90, %95 : vector<6x640xf32>
    %c0_47 = arith.constant 0 : index
    %c17 = arith.constant 17 : index
    %97 = vector.load %arg0[%c0_47, %c17] : memref<4x768xf32, #tpu.memory_space<vmem>>, vector<1x640xf32>
    %c0_48 = arith.constant 0 : index
    %c16_49 = arith.constant 16 : index
    %98 = vector.load %arg1[%c0_48, %c16_49] : memref<6x36xf32, #tpu.memory_space<vmem>>, vector<6x1xf32>
    %99 = vector.broadcast %97 : vector<1x640xf32> to vector<6x640xf32>
    %100 = vector.broadcast %98 : vector<6x1xf32> to vector<6x640xf32>
    %101 = arith.mulf %99, %100 : vector<6x640xf32>
    %102 = arith.addf %96, %101 : vector<6x640xf32>
    %c1_50 = arith.constant 1 : index
    %c17_51 = arith.constant 17 : index
    %103 = vector.load %arg0[%c1_50, %c17_51] : memref<4x768xf32, #tpu.memory_space<vmem>>, vector<1x640xf32>
    %c0_52 = arith.constant 0 : index
    %c17_53 = arith.constant 17 : index
    %104 = vector.load %arg1[%c0_52, %c17_53] : memref<6x36xf32, #tpu.memory_space<vmem>>, vector<6x1xf32>
    %105 = vector.broadcast %103 : vector<1x640xf32> to vector<6x640xf32>
    %106 = vector.broadcast %104 : vector<6x1xf32> to vector<6x640xf32>
    %107 = arith.mulf %105, %106 : vector<6x640xf32>
    %108 = arith.addf %102, %107 : vector<6x640xf32>
    %c2_54 = arith.constant 2 : index
    %c17_55 = arith.constant 17 : index
    %109 = vector.load %arg0[%c2_54, %c17_55] : memref<4x768xf32, #tpu.memory_space<vmem>>, vector<1x640xf32>
    %c0_56 = arith.constant 0 : index
    %c18 = arith.constant 18 : index
    %110 = vector.load %arg1[%c0_56, %c18] : memref<6x36xf32, #tpu.memory_space<vmem>>, vector<6x1xf32>
    %111 = vector.broadcast %109 : vector<1x640xf32> to vector<6x640xf32>
    %112 = vector.broadcast %110 : vector<6x1xf32> to vector<6x640xf32>
    %113 = arith.mulf %111, %112 : vector<6x640xf32>
    %114 = arith.addf %108, %113 : vector<6x640xf32>
    %c3_57 = arith.constant 3 : index
    %c17_58 = arith.constant 17 : index
    %115 = vector.load %arg0[%c3_57, %c17_58] : memref<4x768xf32, #tpu.memory_space<vmem>>, vector<1x640xf32>
    %c0_59 = arith.constant 0 : index
    %c19 = arith.constant 19 : index
    %116 = vector.load %arg1[%c0_59, %c19] : memref<6x36xf32, #tpu.memory_space<vmem>>, vector<6x1xf32>
    %117 = vector.broadcast %115 : vector<1x640xf32> to vector<6x640xf32>
    %118 = vector.broadcast %116 : vector<6x1xf32> to vector<6x640xf32>
    %119 = arith.mulf %117, %118 : vector<6x640xf32>
    %120 = arith.addf %114, %119 : vector<6x640xf32>
    %c0_60 = arith.constant 0 : index
    %c18_61 = arith.constant 18 : index
    %121 = vector.load %arg0[%c0_60, %c18_61] : memref<4x768xf32, #tpu.memory_space<vmem>>, vector<1x640xf32>
    %c0_62 = arith.constant 0 : index
    %c20 = arith.constant 20 : index
    %122 = vector.load %arg1[%c0_62, %c20] : memref<6x36xf32, #tpu.memory_space<vmem>>, vector<6x1xf32>
    %123 = vector.broadcast %121 : vector<1x640xf32> to vector<6x640xf32>
    %124 = vector.broadcast %122 : vector<6x1xf32> to vector<6x640xf32>
    %125 = arith.mulf %123, %124 : vector<6x640xf32>
    %126 = arith.addf %120, %125 : vector<6x640xf32>
    %c1_63 = arith.constant 1 : index
    %c18_64 = arith.constant 18 : index
    %127 = vector.load %arg0[%c1_63, %c18_64] : memref<4x768xf32, #tpu.memory_space<vmem>>, vector<1x640xf32>
    %c0_65 = arith.constant 0 : index
    %c21 = arith.constant 21 : index
    %128 = vector.load %arg1[%c0_65, %c21] : memref<6x36xf32, #tpu.memory_space<vmem>>, vector<6x1xf32>
    %129 = vector.broadcast %127 : vector<1x640xf32> to vector<6x640xf32>
    %130 = vector.broadcast %128 : vector<6x1xf32> to vector<6x640xf32>
    %131 = arith.mulf %129, %130 : vector<6x640xf32>
    %132 = arith.addf %126, %131 : vector<6x640xf32>
    %c2_66 = arith.constant 2 : index
    %c18_67 = arith.constant 18 : index
    %133 = vector.load %arg0[%c2_66, %c18_67] : memref<4x768xf32, #tpu.memory_space<vmem>>, vector<1x640xf32>
    %c0_68 = arith.constant 0 : index
    %c22 = arith.constant 22 : index
    %134 = vector.load %arg1[%c0_68, %c22] : memref<6x36xf32, #tpu.memory_space<vmem>>, vector<6x1xf32>
    %135 = vector.broadcast %133 : vector<1x640xf32> to vector<6x640xf32>
    %136 = vector.broadcast %134 : vector<6x1xf32> to vector<6x640xf32>
    %137 = arith.mulf %135, %136 : vector<6x640xf32>
    %138 = arith.addf %132, %137 : vector<6x640xf32>
    %c3_69 = arith.constant 3 : index
    %c18_70 = arith.constant 18 : index
    %139 = vector.load %arg0[%c3_69, %c18_70] : memref<4x768xf32, #tpu.memory_space<vmem>>, vector<1x640xf32>
    %c0_71 = arith.constant 0 : index
    %c23 = arith.constant 23 : index
    %140 = vector.load %arg1[%c0_71, %c23] : memref<6x36xf32, #tpu.memory_space<vmem>>, vector<6x1xf32>
    %141 = vector.broadcast %139 : vector<1x640xf32> to vector<6x640xf32>
    %142 = vector.broadcast %140 : vector<6x1xf32> to vector<6x640xf32>
    %143 = arith.mulf %141, %142 : vector<6x640xf32>
    %144 = arith.addf %138, %143 : vector<6x640xf32>
    %c0_72 = arith.constant 0 : index
    %c32 = arith.constant 32 : index
    %145 = vector.load %arg0[%c0_72, %c32] : memref<4x768xf32, #tpu.memory_space<vmem>>, vector<1x640xf32>
    %c0_73 = arith.constant 0 : index
    %c24 = arith.constant 24 : index
    %146 = vector.load %arg1[%c0_73, %c24] : memref<6x36xf32, #tpu.memory_space<vmem>>, vector<6x1xf32>
    %147 = vector.broadcast %145 : vector<1x640xf32> to vector<6x640xf32>
    %148 = vector.broadcast %146 : vector<6x1xf32> to vector<6x640xf32>
    %149 = arith.mulf %147, %148 : vector<6x640xf32>
    %150 = arith.addf %144, %149 : vector<6x640xf32>
    %c1_74 = arith.constant 1 : index
    %c32_75 = arith.constant 32 : index
    %151 = vector.load %arg0[%c1_74, %c32_75] : memref<4x768xf32, #tpu.memory_space<vmem>>, vector<1x640xf32>
    %c0_76 = arith.constant 0 : index
    %c25 = arith.constant 25 : index
    %152 = vector.load %arg1[%c0_76, %c25] : memref<6x36xf32, #tpu.memory_space<vmem>>, vector<6x1xf32>
    %153 = vector.broadcast %151 : vector<1x640xf32> to vector<6x640xf32>
    %154 = vector.broadcast %152 : vector<6x1xf32> to vector<6x640xf32>
    %155 = arith.mulf %153, %154 : vector<6x640xf32>
    %156 = arith.addf %150, %155 : vector<6x640xf32>
    %c2_77 = arith.constant 2 : index
    %c32_78 = arith.constant 32 : index
    %157 = vector.load %arg0[%c2_77, %c32_78] : memref<4x768xf32, #tpu.memory_space<vmem>>, vector<1x640xf32>
    %c0_79 = arith.constant 0 : index
    %c26 = arith.constant 26 : index
    %158 = vector.load %arg1[%c0_79, %c26] : memref<6x36xf32, #tpu.memory_space<vmem>>, vector<6x1xf32>
    %159 = vector.broadcast %157 : vector<1x640xf32> to vector<6x640xf32>
    %160 = vector.broadcast %158 : vector<6x1xf32> to vector<6x640xf32>
    %161 = arith.mulf %159, %160 : vector<6x640xf32>
    %162 = arith.addf %156, %161 : vector<6x640xf32>
    %c3_80 = arith.constant 3 : index
    %c32_81 = arith.constant 32 : index
    %163 = vector.load %arg0[%c3_80, %c32_81] : memref<4x768xf32, #tpu.memory_space<vmem>>, vector<1x640xf32>
    %c0_82 = arith.constant 0 : index
    %c27 = arith.constant 27 : index
    %164 = vector.load %arg1[%c0_82, %c27] : memref<6x36xf32, #tpu.memory_space<vmem>>, vector<6x1xf32>
    %165 = vector.broadcast %163 : vector<1x640xf32> to vector<6x640xf32>
    %166 = vector.broadcast %164 : vector<6x1xf32> to vector<6x640xf32>
    %167 = arith.mulf %165, %166 : vector<6x640xf32>
    %168 = arith.addf %162, %167 : vector<6x640xf32>
    %c0_83 = arith.constant 0 : index
    %c33 = arith.constant 33 : index
    %169 = vector.load %arg0[%c0_83, %c33] : memref<4x768xf32, #tpu.memory_space<vmem>>, vector<1x640xf32>
    %c0_84 = arith.constant 0 : index
    %c28 = arith.constant 28 : index
    %170 = vector.load %arg1[%c0_84, %c28] : memref<6x36xf32, #tpu.memory_space<vmem>>, vector<6x1xf32>
    %171 = vector.broadcast %169 : vector<1x640xf32> to vector<6x640xf32>
    %172 = vector.broadcast %170 : vector<6x1xf32> to vector<6x640xf32>
    %173 = arith.mulf %171, %172 : vector<6x640xf32>
    %174 = arith.addf %168, %173 : vector<6x640xf32>
    %c1_85 = arith.constant 1 : index
    %c33_86 = arith.constant 33 : index
    %175 = vector.load %arg0[%c1_85, %c33_86] : memref<4x768xf32, #tpu.memory_space<vmem>>, vector<1x640xf32>
    %c0_87 = arith.constant 0 : index
    %c29 = arith.constant 29 : index
    %176 = vector.load %arg1[%c0_87, %c29] : memref<6x36xf32, #tpu.memory_space<vmem>>, vector<6x1xf32>
    %177 = vector.broadcast %175 : vector<1x640xf32> to vector<6x640xf32>
    %178 = vector.broadcast %176 : vector<6x1xf32> to vector<6x640xf32>
    %179 = arith.mulf %177, %178 : vector<6x640xf32>
    %180 = arith.addf %174, %179 : vector<6x640xf32>
    %c2_88 = arith.constant 2 : index
    %c33_89 = arith.constant 33 : index
    %181 = vector.load %arg0[%c2_88, %c33_89] : memref<4x768xf32, #tpu.memory_space<vmem>>, vector<1x640xf32>
    %c0_90 = arith.constant 0 : index
    %c30 = arith.constant 30 : index
    %182 = vector.load %arg1[%c0_90, %c30] : memref<6x36xf32, #tpu.memory_space<vmem>>, vector<6x1xf32>
    %183 = vector.broadcast %181 : vector<1x640xf32> to vector<6x640xf32>
    %184 = vector.broadcast %182 : vector<6x1xf32> to vector<6x640xf32>
    %185 = arith.mulf %183, %184 : vector<6x640xf32>
    %186 = arith.addf %180, %185 : vector<6x640xf32>
    %c3_91 = arith.constant 3 : index
    %c33_92 = arith.constant 33 : index
    %187 = vector.load %arg0[%c3_91, %c33_92] : memref<4x768xf32, #tpu.memory_space<vmem>>, vector<1x640xf32>
    %c0_93 = arith.constant 0 : index
    %c31 = arith.constant 31 : index
    %188 = vector.load %arg1[%c0_93, %c31] : memref<6x36xf32, #tpu.memory_space<vmem>>, vector<6x1xf32>
    %189 = vector.broadcast %187 : vector<1x640xf32> to vector<6x640xf32>
    %190 = vector.broadcast %188 : vector<6x1xf32> to vector<6x640xf32>
    %191 = arith.mulf %189, %190 : vector<6x640xf32>
    %192 = arith.addf %186, %191 : vector<6x640xf32>
    %c0_94 = arith.constant 0 : index
    %c34 = arith.constant 34 : index
    %193 = vector.load %arg0[%c0_94, %c34] : memref<4x768xf32, #tpu.memory_space<vmem>>, vector<1x640xf32>
    %c0_95 = arith.constant 0 : index
    %c32_96 = arith.constant 32 : index
    %194 = vector.load %arg1[%c0_95, %c32_96] : memref<6x36xf32, #tpu.memory_space<vmem>>, vector<6x1xf32>
    %195 = vector.broadcast %193 : vector<1x640xf32> to vector<6x640xf32>
    %196 = vector.broadcast %194 : vector<6x1xf32> to vector<6x640xf32>
    %197 = arith.mulf %195, %196 : vector<6x640xf32>
    %198 = arith.addf %192, %197 : vector<6x640xf32>
    %c1_97 = arith.constant 1 : index
    %c34_98 = arith.constant 34 : index
    %199 = vector.load %arg0[%c1_97, %c34_98] : memref<4x768xf32, #tpu.memory_space<vmem>>, vector<1x640xf32>
    %c0_99 = arith.constant 0 : index
    %c33_100 = arith.constant 33 : index
    %200 = vector.load %arg1[%c0_99, %c33_100] : memref<6x36xf32, #tpu.memory_space<vmem>>, vector<6x1xf32>
    %201 = vector.broadcast %199 : vector<1x640xf32> to vector<6x640xf32>
    %202 = vector.broadcast %200 : vector<6x1xf32> to vector<6x640xf32>
    %203 = arith.mulf %201, %202 : vector<6x640xf32>
    %204 = arith.addf %198, %203 : vector<6x640xf32>
    %c2_101 = arith.constant 2 : index
    %c34_102 = arith.constant 34 : index
    %205 = vector.load %arg0[%c2_101, %c34_102] : memref<4x768xf32, #tpu.memory_space<vmem>>, vector<1x640xf32>
    %c0_103 = arith.constant 0 : index
    %c34_104 = arith.constant 34 : index
    %206 = vector.load %arg1[%c0_103, %c34_104] : memref<6x36xf32, #tpu.memory_space<vmem>>, vector<6x1xf32>
    %207 = vector.broadcast %205 : vector<1x640xf32> to vector<6x640xf32>
    %208 = vector.broadcast %206 : vector<6x1xf32> to vector<6x640xf32>
    %209 = arith.mulf %207, %208 : vector<6x640xf32>
    %210 = arith.addf %204, %209 : vector<6x640xf32>
    %c3_105 = arith.constant 3 : index
    %c34_106 = arith.constant 34 : index
    %211 = vector.load %arg0[%c3_105, %c34_106] : memref<4x768xf32, #tpu.memory_space<vmem>>, vector<1x640xf32>
    %c0_107 = arith.constant 0 : index
    %c35 = arith.constant 35 : index
    %212 = vector.load %arg1[%c0_107, %c35] : memref<6x36xf32, #tpu.memory_space<vmem>>, vector<6x1xf32>
    %213 = vector.broadcast %211 : vector<1x640xf32> to vector<6x640xf32>
    %214 = vector.broadcast %212 : vector<6x1xf32> to vector<6x640xf32>
    %215 = arith.mulf %213, %214 : vector<6x640xf32>
    %216 = arith.addf %210, %215 : vector<6x640xf32>
    %c0_108 = arith.constant 0 : index
    %c0_109 = arith.constant 0 : index
    %217 = vector.load %arg2[%c0_108, %c0_109] : memref<6x1xf32, #tpu.memory_space<vmem>>, vector<6x1xf32>
    %218 = vector.broadcast %217 : vector<6x1xf32> to vector<6x640xf32>
    %219 = arith.addf %216, %218 : vector<6x640xf32>
    %cst_110 = arith.constant 0.000000e+00 : f32
    %220 = vector.broadcast %cst_110 : f32 to vector<6x640xf32>
    %221 = arith.maximumf %219, %220 : vector<6x640xf32>
    %c0_111 = arith.constant 0 : index
    %c0_112 = arith.constant 0 : index
    %222 = vector.load %arg6[%c0_111, %c0_112] : memref<6x640xf32, #tpu.memory_space<vmem>>, vector<6x640xf32>
    tpu.vector_store %arg6[%c0_111, %c0_112], %221 {strides = array<i32>} : memref<6x640xf32, #tpu.memory_space<vmem>>, vector<6x640xf32>,
    %cst_113 = arith.constant 0.000000e+00 : f32
    %223 = vector.broadcast %cst_113 : f32 to vector<8x512xf32>
    %c0_114 = arith.constant 0 : index
    %c0_115 = arith.constant 0 : index
    %224 = vector.load %arg6[%c0_114, %c0_115] : memref<6x640xf32, #tpu.memory_space<vmem>>, vector<1x512xf32>
    %c0_116 = arith.constant 0 : index
    %c0_117 = arith.constant 0 : index
    %225 = vector.load %arg3[%c0_116, %c0_117] : memref<8x24xf32, #tpu.memory_space<vmem>>, vector<8x1xf32>
    %226 = vector.broadcast %224 : vector<1x512xf32> to vector<8x512xf32>
    %227 = vector.broadcast %225 : vector<8x1xf32> to vector<8x512xf32>
    %228 = arith.mulf %226, %227 : vector<8x512xf32>
    %229 = arith.addf %223, %228 : vector<8x512xf32>
    %c1_118 = arith.constant 1 : index
    %c0_119 = arith.constant 0 : index
    %230 = vector.load %arg6[%c1_118, %c0_119] : memref<6x640xf32, #tpu.memory_space<vmem>>, vector<1x512xf32>
    %c0_120 = arith.constant 0 : index
    %c1_121 = arith.constant 1 : index
    %231 = vector.load %arg3[%c0_120, %c1_121] : memref<8x24xf32, #tpu.memory_space<vmem>>, vector<8x1xf32>
    %232 = vector.broadcast %230 : vector<1x512xf32> to vector<8x512xf32>
    %233 = vector.broadcast %231 : vector<8x1xf32> to vector<8x512xf32>
    %234 = arith.mulf %232, %233 : vector<8x512xf32>
    %235 = arith.addf %229, %234 : vector<8x512xf32>
    %c2_122 = arith.constant 2 : index
    %c0_123 = arith.constant 0 : index
    %236 = vector.load %arg6[%c2_122, %c0_123] : memref<6x640xf32, #tpu.memory_space<vmem>>, vector<1x512xf32>
    %c0_124 = arith.constant 0 : index
    %c2_125 = arith.constant 2 : index
    %237 = vector.load %arg3[%c0_124, %c2_125] : memref<8x24xf32, #tpu.memory_space<vmem>>, vector<8x1xf32>
    %238 = vector.broadcast %236 : vector<1x512xf32> to vector<8x512xf32>
    %239 = vector.broadcast %237 : vector<8x1xf32> to vector<8x512xf32>
    %240 = arith.mulf %238, %239 : vector<8x512xf32>
    %241 = arith.addf %235, %240 : vector<8x512xf32>
    %c3_126 = arith.constant 3 : index
    %c0_127 = arith.constant 0 : index
    %242 = vector.load %arg6[%c3_126, %c0_127] : memref<6x640xf32, #tpu.memory_space<vmem>>, vector<1x512xf32>
    %c0_128 = arith.constant 0 : index
    %c3_129 = arith.constant 3 : index
    %243 = vector.load %arg3[%c0_128, %c3_129] : memref<8x24xf32, #tpu.memory_space<vmem>>, vector<8x1xf32>
    %244 = vector.broadcast %242 : vector<1x512xf32> to vector<8x512xf32>
    %245 = vector.broadcast %243 : vector<8x1xf32> to vector<8x512xf32>
    %246 = arith.mulf %244, %245 : vector<8x512xf32>
    %247 = arith.addf %241, %246 : vector<8x512xf32>
    %c4_130 = arith.constant 4 : index
    %c0_131 = arith.constant 0 : index
    %248 = vector.load %arg6[%c4_130, %c0_131] : memref<6x640xf32, #tpu.memory_space<vmem>>, vector<1x512xf32>
    %c0_132 = arith.constant 0 : index
    %c4_133 = arith.constant 4 : index
    %249 = vector.load %arg3[%c0_132, %c4_133] : memref<8x24xf32, #tpu.memory_space<vmem>>, vector<8x1xf32>
    %250 = vector.broadcast %248 : vector<1x512xf32> to vector<8x512xf32>
    %251 = vector.broadcast %249 : vector<8x1xf32> to vector<8x512xf32>
    %252 = arith.mulf %250, %251 : vector<8x512xf32>
    %253 = arith.addf %247, %252 : vector<8x512xf32>
    %c5_134 = arith.constant 5 : index
    %c0_135 = arith.constant 0 : index
    %254 = vector.load %arg6[%c5_134, %c0_135] : memref<6x640xf32, #tpu.memory_space<vmem>>, vector<1x512xf32>
    %c0_136 = arith.constant 0 : index
    %c5_137 = arith.constant 5 : index
    %255 = vector.load %arg3[%c0_136, %c5_137] : memref<8x24xf32, #tpu.memory_space<vmem>>, vector<8x1xf32>
    %256 = vector.broadcast %254 : vector<1x512xf32> to vector<8x512xf32>
    %257 = vector.broadcast %255 : vector<8x1xf32> to vector<8x512xf32>
    %258 = arith.mulf %256, %257 : vector<8x512xf32>
    %259 = arith.addf %253, %258 : vector<8x512xf32>
    %c0_138 = arith.constant 0 : index
    %c1_139 = arith.constant 1 : index
    %260 = vector.load %arg6[%c0_138, %c1_139] : memref<6x640xf32, #tpu.memory_space<vmem>>, vector<1x512xf32>
    %c0_140 = arith.constant 0 : index
    %c6_141 = arith.constant 6 : index
    %261 = vector.load %arg3[%c0_140, %c6_141] : memref<8x24xf32, #tpu.memory_space<vmem>>, vector<8x1xf32>
    %262 = vector.broadcast %260 : vector<1x512xf32> to vector<8x512xf32>
    %263 = vector.broadcast %261 : vector<8x1xf32> to vector<8x512xf32>
    %264 = arith.mulf %262, %263 : vector<8x512xf32>
    %265 = arith.addf %259, %264 : vector<8x512xf32>
    %c1_142 = arith.constant 1 : index
    %c1_143 = arith.constant 1 : index
    %266 = vector.load %arg6[%c1_142, %c1_143] : memref<6x640xf32, #tpu.memory_space<vmem>>, vector<1x512xf32>
    %c0_144 = arith.constant 0 : index
    %c7_145 = arith.constant 7 : index
    %267 = vector.load %arg3[%c0_144, %c7_145] : memref<8x24xf32, #tpu.memory_space<vmem>>, vector<8x1xf32>
    %268 = vector.broadcast %266 : vector<1x512xf32> to vector<8x512xf32>
    %269 = vector.broadcast %267 : vector<8x1xf32> to vector<8x512xf32>
    %270 = arith.mulf %268, %269 : vector<8x512xf32>
    %271 = arith.addf %265, %270 : vector<8x512xf32>
    %c2_146 = arith.constant 2 : index
    %c1_147 = arith.constant 1 : index
    %272 = vector.load %arg6[%c2_146, %c1_147] : memref<6x640xf32, #tpu.memory_space<vmem>>, vector<1x512xf32>
    %c0_148 = arith.constant 0 : index
    %c8_149 = arith.constant 8 : index
    %273 = vector.load %arg3[%c0_148, %c8_149] : memref<8x24xf32, #tpu.memory_space<vmem>>, vector<8x1xf32>
    %274 = vector.broadcast %272 : vector<1x512xf32> to vector<8x512xf32>
    %275 = vector.broadcast %273 : vector<8x1xf32> to vector<8x512xf32>
    %276 = arith.mulf %274, %275 : vector<8x512xf32>
    %277 = arith.addf %271, %276 : vector<8x512xf32>
    %c3_150 = arith.constant 3 : index
    %c1_151 = arith.constant 1 : index
    %278 = vector.load %arg6[%c3_150, %c1_151] : memref<6x640xf32, #tpu.memory_space<vmem>>, vector<1x512xf32>
    %c0_152 = arith.constant 0 : index
    %c9_153 = arith.constant 9 : index
    %279 = vector.load %arg3[%c0_152, %c9_153] : memref<8x24xf32, #tpu.memory_space<vmem>>, vector<8x1xf32>
    %280 = vector.broadcast %278 : vector<1x512xf32> to vector<8x512xf32>
    %281 = vector.broadcast %279 : vector<8x1xf32> to vector<8x512xf32>
    %282 = arith.mulf %280, %281 : vector<8x512xf32>
    %283 = arith.addf %277, %282 : vector<8x512xf32>
    %c4_154 = arith.constant 4 : index
    %c1_155 = arith.constant 1 : index
    %284 = vector.load %arg6[%c4_154, %c1_155] : memref<6x640xf32, #tpu.memory_space<vmem>>, vector<1x512xf32>
    %c0_156 = arith.constant 0 : index
    %c10_157 = arith.constant 10 : index
    %285 = vector.load %arg3[%c0_156, %c10_157] : memref<8x24xf32, #tpu.memory_space<vmem>>, vector<8x1xf32>
    %286 = vector.broadcast %284 : vector<1x512xf32> to vector<8x512xf32>
    %287 = vector.broadcast %285 : vector<8x1xf32> to vector<8x512xf32>
    %288 = arith.mulf %286, %287 : vector<8x512xf32>
    %289 = arith.addf %283, %288 : vector<8x512xf32>
    %c5_158 = arith.constant 5 : index
    %c1_159 = arith.constant 1 : index
    %290 = vector.load %arg6[%c5_158, %c1_159] : memref<6x640xf32, #tpu.memory_space<vmem>>, vector<1x512xf32>
    %c0_160 = arith.constant 0 : index
    %c11_161 = arith.constant 11 : index
    %291 = vector.load %arg3[%c0_160, %c11_161] : memref<8x24xf32, #tpu.memory_space<vmem>>, vector<8x1xf32>
    %292 = vector.broadcast %290 : vector<1x512xf32> to vector<8x512xf32>
    %293 = vector.broadcast %291 : vector<8x1xf32> to vector<8x512xf32>
    %294 = arith.mulf %292, %293 : vector<8x512xf32>
    %295 = arith.addf %289, %294 : vector<8x512xf32>
    %c0_162 = arith.constant 0 : index
    %c16_163 = arith.constant 16 : index
    %296 = vector.load %arg6[%c0_162, %c16_163] : memref<6x640xf32, #tpu.memory_space<vmem>>, vector<1x512xf32>
    %c0_164 = arith.constant 0 : index
    %c12_165 = arith.constant 12 : index
    %297 = vector.load %arg3[%c0_164, %c12_165] : memref<8x24xf32, #tpu.memory_space<vmem>>, vector<8x1xf32>
    %298 = vector.broadcast %296 : vector<1x512xf32> to vector<8x512xf32>
    %299 = vector.broadcast %297 : vector<8x1xf32> to vector<8x512xf32>
    %300 = arith.mulf %298, %299 : vector<8x512xf32>
    %301 = arith.addf %295, %300 : vector<8x512xf32>
    %c1_166 = arith.constant 1 : index
    %c16_167 = arith.constant 16 : index
    %302 = vector.load %arg6[%c1_166, %c16_167] : memref<6x640xf32, #tpu.memory_space<vmem>>, vector<1x512xf32>
    %c0_168 = arith.constant 0 : index
    %c13_169 = arith.constant 13 : index
    %303 = vector.load %arg3[%c0_168, %c13_169] : memref<8x24xf32, #tpu.memory_space<vmem>>, vector<8x1xf32>
    %304 = vector.broadcast %302 : vector<1x512xf32> to vector<8x512xf32>
    %305 = vector.broadcast %303 : vector<8x1xf32> to vector<8x512xf32>
    %306 = arith.mulf %304, %305 : vector<8x512xf32>
    %307 = arith.addf %301, %306 : vector<8x512xf32>
    %c2_170 = arith.constant 2 : index
    %c16_171 = arith.constant 16 : index
    %308 = vector.load %arg6[%c2_170, %c16_171] : memref<6x640xf32, #tpu.memory_space<vmem>>, vector<1x512xf32>
    %c0_172 = arith.constant 0 : index
    %c14_173 = arith.constant 14 : index
    %309 = vector.load %arg3[%c0_172, %c14_173] : memref<8x24xf32, #tpu.memory_space<vmem>>, vector<8x1xf32>
    %310 = vector.broadcast %308 : vector<1x512xf32> to vector<8x512xf32>
    %311 = vector.broadcast %309 : vector<8x1xf32> to vector<8x512xf32>
    %312 = arith.mulf %310, %311 : vector<8x512xf32>
    %313 = arith.addf %307, %312 : vector<8x512xf32>
    %c3_174 = arith.constant 3 : index
    %c16_175 = arith.constant 16 : index
    %314 = vector.load %arg6[%c3_174, %c16_175] : memref<6x640xf32, #tpu.memory_space<vmem>>, vector<1x512xf32>
    %c0_176 = arith.constant 0 : index
    %c15_177 = arith.constant 15 : index
    %315 = vector.load %arg3[%c0_176, %c15_177] : memref<8x24xf32, #tpu.memory_space<vmem>>, vector<8x1xf32>
    %316 = vector.broadcast %314 : vector<1x512xf32> to vector<8x512xf32>
    %317 = vector.broadcast %315 : vector<8x1xf32> to vector<8x512xf32>
    %318 = arith.mulf %316, %317 : vector<8x512xf32>
    %319 = arith.addf %313, %318 : vector<8x512xf32>
    %c4_178 = arith.constant 4 : index
    %c16_179 = arith.constant 16 : index
    %320 = vector.load %arg6[%c4_178, %c16_179] : memref<6x640xf32, #tpu.memory_space<vmem>>, vector<1x512xf32>
    %c0_180 = arith.constant 0 : index
    %c16_181 = arith.constant 16 : index
    %321 = vector.load %arg3[%c0_180, %c16_181] : memref<8x24xf32, #tpu.memory_space<vmem>>, vector<8x1xf32>
    %322 = vector.broadcast %320 : vector<1x512xf32> to vector<8x512xf32>
    %323 = vector.broadcast %321 : vector<8x1xf32> to vector<8x512xf32>
    %324 = arith.mulf %322, %323 : vector<8x512xf32>
    %325 = arith.addf %319, %324 : vector<8x512xf32>
    %c5_182 = arith.constant 5 : index
    %c16_183 = arith.constant 16 : index
    %326 = vector.load %arg6[%c5_182, %c16_183] : memref<6x640xf32, #tpu.memory_space<vmem>>, vector<1x512xf32>
    %c0_184 = arith.constant 0 : index
    %c17_185 = arith.constant 17 : index
    %327 = vector.load %arg3[%c0_184, %c17_185] : memref<8x24xf32, #tpu.memory_space<vmem>>, vector<8x1xf32>
    %328 = vector.broadcast %326 : vector<1x512xf32> to vector<8x512xf32>
    %329 = vector.broadcast %327 : vector<8x1xf32> to vector<8x512xf32>
    %330 = arith.mulf %328, %329 : vector<8x512xf32>
    %331 = arith.addf %325, %330 : vector<8x512xf32>
    %c0_186 = arith.constant 0 : index
    %c17_187 = arith.constant 17 : index
    %332 = vector.load %arg6[%c0_186, %c17_187] : memref<6x640xf32, #tpu.memory_space<vmem>>, vector<1x512xf32>
    %c0_188 = arith.constant 0 : index
    %c18_189 = arith.constant 18 : index
    %333 = vector.load %arg3[%c0_188, %c18_189] : memref<8x24xf32, #tpu.memory_space<vmem>>, vector<8x1xf32>
    %334 = vector.broadcast %332 : vector<1x512xf32> to vector<8x512xf32>
    %335 = vector.broadcast %333 : vector<8x1xf32> to vector<8x512xf32>
    %336 = arith.mulf %334, %335 : vector<8x512xf32>
    %337 = arith.addf %331, %336 : vector<8x512xf32>
    %c1_190 = arith.constant 1 : index
    %c17_191 = arith.constant 17 : index
    %338 = vector.load %arg6[%c1_190, %c17_191] : memref<6x640xf32, #tpu.memory_space<vmem>>, vector<1x512xf32>
    %c0_192 = arith.constant 0 : index
    %c19_193 = arith.constant 19 : index
    %339 = vector.load %arg3[%c0_192, %c19_193] : memref<8x24xf32, #tpu.memory_space<vmem>>, vector<8x1xf32>
    %340 = vector.broadcast %338 : vector<1x512xf32> to vector<8x512xf32>
    %341 = vector.broadcast %339 : vector<8x1xf32> to vector<8x512xf32>
    %342 = arith.mulf %340, %341 : vector<8x512xf32>
    %343 = arith.addf %337, %342 : vector<8x512xf32>
    %c2_194 = arith.constant 2 : index
    %c17_195 = arith.constant 17 : index
    %344 = vector.load %arg6[%c2_194, %c17_195] : memref<6x640xf32, #tpu.memory_space<vmem>>, vector<1x512xf32>
    %c0_196 = arith.constant 0 : index
    %c20_197 = arith.constant 20 : index
    %345 = vector.load %arg3[%c0_196, %c20_197] : memref<8x24xf32, #tpu.memory_space<vmem>>, vector<8x1xf32>
    %346 = vector.broadcast %344 : vector<1x512xf32> to vector<8x512xf32>
    %347 = vector.broadcast %345 : vector<8x1xf32> to vector<8x512xf32>
    %348 = arith.mulf %346, %347 : vector<8x512xf32>
    %349 = arith.addf %343, %348 : vector<8x512xf32>
    %c3_198 = arith.constant 3 : index
    %c17_199 = arith.constant 17 : index
    %350 = vector.load %arg6[%c3_198, %c17_199] : memref<6x640xf32, #tpu.memory_space<vmem>>, vector<1x512xf32>
    %c0_200 = arith.constant 0 : index
    %c21_201 = arith.constant 21 : index
    %351 = vector.load %arg3[%c0_200, %c21_201] : memref<8x24xf32, #tpu.memory_space<vmem>>, vector<8x1xf32>
    %352 = vector.broadcast %350 : vector<1x512xf32> to vector<8x512xf32>
    %353 = vector.broadcast %351 : vector<8x1xf32> to vector<8x512xf32>
    %354 = arith.mulf %352, %353 : vector<8x512xf32>
    %355 = arith.addf %349, %354 : vector<8x512xf32>
    %c4_202 = arith.constant 4 : index
    %c17_203 = arith.constant 17 : index
    %356 = vector.load %arg6[%c4_202, %c17_203] : memref<6x640xf32, #tpu.memory_space<vmem>>, vector<1x512xf32>
    %c0_204 = arith.constant 0 : index
    %c22_205 = arith.constant 22 : index
    %357 = vector.load %arg3[%c0_204, %c22_205] : memref<8x24xf32, #tpu.memory_space<vmem>>, vector<8x1xf32>
    %358 = vector.broadcast %356 : vector<1x512xf32> to vector<8x512xf32>
    %359 = vector.broadcast %357 : vector<8x1xf32> to vector<8x512xf32>
    %360 = arith.mulf %358, %359 : vector<8x512xf32>
    %361 = arith.addf %355, %360 : vector<8x512xf32>
    %c5_206 = arith.constant 5 : index
    %c17_207 = arith.constant 17 : index
    %362 = vector.load %arg6[%c5_206, %c17_207] : memref<6x640xf32, #tpu.memory_space<vmem>>, vector<1x512xf32>
    %c0_208 = arith.constant 0 : index
    %c23_209 = arith.constant 23 : index
    %363 = vector.load %arg3[%c0_208, %c23_209] : memref<8x24xf32, #tpu.memory_space<vmem>>, vector<8x1xf32>
    %364 = vector.broadcast %362 : vector<1x512xf32> to vector<8x512xf32>
    %365 = vector.broadcast %363 : vector<8x1xf32> to vector<8x512xf32>
    %366 = arith.mulf %364, %365 : vector<8x512xf32>
    %367 = arith.addf %361, %366 : vector<8x512xf32>
    %c0_210 = arith.constant 0 : index
    %c0_211 = arith.constant 0 : index
    %368 = vector.load %arg4[%c0_210, %c0_211] : memref<8x1xf32, #tpu.memory_space<vmem>>, vector<8x1xf32>
    %369 = vector.broadcast %368 : vector<8x1xf32> to vector<8x512xf32>
    %370 = arith.addf %367, %369 : vector<8x512xf32>
    %cst_212 = arith.constant 0.000000e+00 : f32
    %371 = vector.broadcast %cst_212 : f32 to vector<8x512xf32>
    %372 = arith.maximumf %370, %371 : vector<8x512xf32>
    %c0_213 = arith.constant 0 : index
    %c0_214 = arith.constant 0 : index
    %373 = vector.load %arg5[%c0_213, %c0_214] : memref<8x512xf32, #tpu.memory_space<vmem>>, vector<8x512xf32>
    tpu.vector_store %arg5[%c0_213, %c0_214], %372 {strides = array<i32>} : memref<8x512xf32, #tpu.memory_space<vmem>>, vector<8x512xf32>,
    return
  }
}

</mosaic_0001>

<bundles_post_ra>
// kernel: conv2d_block_forward.1
= control target key start
LH: loop header
LB: loop body
LE: loop exit
PB: predicated region body
PF: predicated region fallthrough
CT: control target
= control target key end

     0   :  { %v5048_v0 = vmov 2   ;;  %v5045_v2 = vmov 1   ;;  %v5042_v3 = vmov 3   ;;  %v5046_v4 = vmov 5   ;;  %s2906_s22 = smov 127   ;;  %s2907_s29 = smov 126   ;;  %s5027_s1 = inlined_call_operand.vmem [shape: f32[6,36], index: 1, kind: input, shape index: {}]   ;;  %s5028_s0 = inlined_call_operand.vmem [shape: f32[4,768], index: 0, kind: input, shape index: {}]   ;;  %s5029_s2 = inlined_call_operand.vmem [shape: f32[6,1], index: 2, kind: input, shape index: {}]   ;;  %s5030_s3 = inlined_call_operand.vmem [shape: f32[8,24], index: 3, kind: input, shape index: {}]   ;;  %s5031_s4 = inlined_call_operand.vmem [shape: f32[8,1], index: 4, kind: input, shape index: {}]   ;;  %s5032_s5 = inlined_call_operand.vmem [shape: f32[8,512], index: 5, kind: output, shape index: {}]  }
   0x1   :  { %2831 = vset.pattern.permute.xlu1 %v5048_v0  ;;  %v2972_v1 = vld [vmem:[%s5027_s1] sm:$0x3f]  ;;  %2830 = vset.pattern.permute.xlu0 %v5045_v2  ;;  %v5040_v5 = vmov 4   ;;  %v5039_v6 = vmov 6   ;;  %v5043_v7 = vmov 7   ;;  %v5038_v8 = vmov 8  }
   0x2   :  { %134 = vperm.xlu1 %2831, %v2972_v1   ;;  %92 = vperm.xlu0 %2830, %v2972_v1   ;;  %v5037_v9 = vmov 9   ;;  %v5036_v10 = vmov 10   ;;  %v5035_v11 = vmov 11   ;;  %v5034_v12 = vmov 12   ;;  %s2909_s30 = smov 112   ;;  %s2914_s6 = smov 111  }
   0x3   :  { %v23_v13 = vlaneseq  ;;  %v189_v16 = vld [vmem:[%s5028_s0] ss:$4 sm:$0x3f]  ;;  %v2783_v32 = vld [vmem:[%s5028_s0 + $0x1] ss:$4 sm:$0x3f] }
   0x4   :  { %v2784_v44 = vld [vmem:[%s5028_s0 + $0x2] ss:$4 sm:$0x3f]  ;;  %v2785_v53 = vld [vmem:[%s5028_s0 + $0x3] ss:$4 sm:$0x3f] }
   0x5   :  { %v24_v15 = vshrl.u32 %v23_v13, 7  ;;  %s2919_s7 = smov 110   ;;  %s2924_s8 = smov 96   ;;  %vm249_vm0 = vcmask 1039360   ;;  %vm521_vm1 = vcmask 1031168   ;;  %vm694_vm2 = vcmask 916480  }
   0x6   :  { %2832 = vset.pattern.permute.xlu1 %v5042_v3  ;;  %2834 = vset.pattern.permute.xlu0 %v5046_v4  ;;  %s2934_s11 = smov 94   ;;  %vm867_vm3 = vcmask 908288   ;;  %vm1040_vm4 = vcmask 900096   ;;  %vm1213_vm5 = vcmask 785408   ;;  %vm1386_vm6 = vcmask 777216  }
   0x7   :  { %176 = vperm.xlu1 %2832, %v2972_v1   ;;  %299 = vperm.xlu0 %2834, %v2972_v1   ;;  %v3001_v17 = vsub.s32 0, %v24_v15  ;;  %v3003_v18 = vsub.s32 1, %v24_v15  ;;  %v3013_v22 = vsub.s32 2, %v24_v15  ;;  %v3015_v23 = vsub.s32 3, %v24_v15 }
   0x8   :  { %v3017_v25 = vsub.s32 5, %v24_v15  ;;  %v3029_v31 = vsub.s32 4, %v24_v15  ;;  %vm1559_vm7 = vcmask 769024  }
   0x9   :  { %5168 = vst [vmem:[#allocation3_spill] sm:$0xff] %v3001_v17  ;;  %5169 = vst [vmem:[#allocation4_spill] sm:$0xff] %v3003_v18  ;;  %v3008_v20 = vrot.slane %v189_v16, %v3003_v18  ;;  %v3011_v21 = vrot.slane %v189_v16, %v3001_v17  ;;  %v3022_v28 = vrot.slane %v189_v16, %v3015_v23 }
   0xa   :  { %5170 = vst [vmem:[#allocation5_spill] sm:$0xff] %v3013_v22  ;;  %5171 = vst [vmem:[#allocation6_spill] sm:$0xff] %v3015_v23  ;;  %v3025_v29 = vrot.slane %v189_v16, %v3013_v22  ;;  %v3039_v35 = vrot.slane %v189_v16, %v3017_v25  ;;  %v3042_v36 = vrot.slane %v189_v16, %v3029_v31 }
   0xb   :  { %2833 = vset.pattern.permute.xlu1 %v5040_v5  ;;  %2835 = vset.pattern.permute.xlu0 %v5039_v6  ;;  %5172 = vst [vmem:[#allocation7_spill] sm:$0xff] %v3029_v31  ;;  %v3047_v37 = vrot.slane %v2783_v32, %v3001_v17  ;;  %v3050_v38 = vrot.slane %v2783_v32, %v3013_v22 }
   0xc   :  { %222 = vperm.xlu1 %2833, %v2972_v1   ;;  %375 = vperm.xlu0 %2835, %v2972_v1   ;;  %v3062_v45 = vrot.slane %v2783_v32, %v3003_v18  ;;  %v3065_v46 = vrot.slane %v2783_v32, %v3029_v31  ;;  %v3070_v47 = vrot.slane %v2784_v44, %v3013_v22 }
   0xd   :  { %v3075_v51 = vrot.slane %v2783_v32, %v3015_v23  ;;  %v3085_v55 = vrot.slane %v2783_v32, %v3017_v25  ;;  %v3088_v56 = vrot.slane %v2784_v44, %v3029_v31  ;;  %v3093_v57 = vrot.slane %v2785_v53, %v3013_v22 }
   0xe   :  { %v3098_v61 = vrot.slane %v2784_v44, %v3001_v17  ;;  %v3105_v13 = vrot.slane %v2784_v44, %v3003_v18  ;;  %v3108_v15 = vrot.slane %v2785_v53, %v3029_v31 }
  0x10   :  { %2836 = vset.pattern.permute.xlu0 %v5043_v7 }
  0x11   :  { %451 = vperm.xlu0 %2836, %v2972_v1  }
  0x15   :  { %2837 = vset.pattern.permute.xlu0 %v5038_v8 }
  0x16   :  { %494 = vperm.xlu0 %2837, %v2972_v1  }
  0x1a   :  { %2838 = vset.pattern.permute.xlu0 %v5037_v9 }
  0x1b   :  { %538 = vperm.xlu0 %2838, %v2972_v1  }
  0x1f   :  { %2839 = vset.pattern.permute.xlu0 %v5036_v10 }
  0x20   :  { %581 = vperm.xlu0 %2839, %v2972_v1  }
  0x24   :  { %2840 = vset.pattern.permute.xlu0 %v5035_v11 }
  0x25   :  { %624 = vperm.xlu0 %2840, %v2972_v1  }
  0x29   :  { %2841 = vset.pattern.permute.xlu0 %v5034_v12 }
  0x81   :  { %v2996_v14 = vpop.permute.xlu1 %134  ;;  %v3027_v30 = vpop.permute.xlu0 %92 }
  0x86   :  { %v3005_v19 = vpop.permute.xlu1 %176  ;;  %v300_v39 = vpop.permute.xlu0 %299 }
  0x87   :  { %v302_v42 = vmul.f32 %v300_v39, %v3047_v37  ;;  %v304_v43 = vmul.f32 %v300_v39, %v3050_v38  ;;  %v303_v49 = vmul.f32 %v300_v39, %v3062_v45  ;;  %v306_v50 = vmul.f32 %v300_v39, %v3065_v46 }
  0x88   :  { %v305_v54 = vmul.f32 %v300_v39, %v3075_v51  ;;  %v307_v59 = vmul.f32 %v300_v39, %v3085_v55 }
  0x8b   :  { %v223_v24 = vpop.permute.xlu1 %222  ;;  %v376_v48 = vpop.permute.xlu0 %375 }
  0x8c   :  { %v226_v26 = vmul.f32 %v223_v24, %v3008_v20  ;;  %v225_v27 = vmul.f32 %v223_v24, %v3011_v21  ;;  %v228_v33 = vmul.f32 %v223_v24, %v3022_v28  ;;  %v227_v34 = vmul.f32 %v223_v24, %v3025_v29 }
  0x8d   :  { %v230_v40 = vmul.f32 %v223_v24, %v3039_v35  ;;  %v229_v41 = vmul.f32 %v223_v24, %v3042_v36  ;;  %v380_v52 = vmul.f32 %v376_v48, %v3070_v47  ;;  %v382_v60 = vmul.f32 %v376_v48, %v3088_v56 }
  0x8e   :  { %239 = vrot.lane.b32.xlu1 %v226_v26, %s2906_s22  ;;  %237 = vrot.lane.b32.xlu0 %v225_v27, %s2906_s22  ;;  %v378_v63 = vmul.f32 %v376_v48, %v3098_v61  ;;  %v379_v24 = vmul.f32 %v376_v48, %v3105_v13  ;;  %v3115_v27 = vrot.slane %v2784_v44, %v3015_v23 }
  0x90   :  { %v452_v58 = vpop.permute.xlu0 %451 }
  0x91   :  { %v456_v62 = vmul.f32 %v452_v58, %v3093_v57  ;;  %v458_v26 = vmul.f32 %v452_v58, %v3108_v15 }
  0x92   :  { %243 = vrot.lane.b32.xlu1 %v228_v33, %s2906_s22  ;;  %241 = vrot.lane.b32.xlu0 %v227_v34, %s2906_s22  ;;  %v381_v33 = vmul.f32 %v376_v48, %v3115_v27  ;;  %v3122_v34 = vrot.slane %v2784_v44, %v3017_v25 }
  0x95   :  { %v495_v16 = vpop.permute.xlu0 %494 }
  0x96   :  { %247 = vrot.lane.b32.xlu1 %v230_v40, %s2906_s22  ;;  %245 = vrot.lane.b32.xlu0 %v229_v41, %s2906_s22  ;;  %v499_v32 = vmul.f32 %v495_v16, %v3025_v29  ;;  %v383_v40 = vmul.f32 %v376_v48, %v3122_v34  ;;  %v501_v41 = vmul.f32 %v495_v16, %v3042_v36 }
  0x9a   :  { %314 = vrot.lane.b32.xlu1 %v302_v42, %s2906_s22  ;;  %318 = vrot.lane.b32.xlu0 %v304_v43, %s2906_s22  ;;  %v539_v39 = vpop.permute.xlu0 %538  ;;  %v3129_v42 = vrot.slane %v2785_v53, %v3001_v17 }
  0x9b   :  { %v543_v43 = vmul.f32 %v539_v39, %v3050_v38 }
  0x9c   :  { %v454_v44 = vmul.f32 %v452_v58, %v3129_v42 }
  0x9e   :  { %316 = vrot.lane.b32.xlu1 %v303_v49, %s2906_s22  ;;  %322 = vrot.lane.b32.xlu0 %v306_v50, %s2906_s22  ;;  %v3136_v49 = vrot.slane %v2785_v53, %v3003_v18 }
  0x9f   :  { %v582_v48 = vpop.permute.xlu0 %581 }
  0xa0   :  { %v455_v50 = vmul.f32 %v452_v58, %v3136_v49 }
  0xa2   :  { %320 = vrot.lane.b32.xlu1 %v305_v54, %s2906_s22  ;;  %394 = vrot.lane.b32.xlu0 %v380_v52, %s2906_s22  ;;  %v545_v52 = vmul.f32 %v539_v39, %v3065_v46  ;;  %v3143_v54 = vrot.slane %v2785_v53, %v3015_v23 }
  0xa6   :  { %324 = vrot.lane.b32.xlu1 %v307_v59, %s2906_s22  ;;  %398 = vrot.lane.b32.xlu0 %v382_v60, %s2906_s22  ;;  %v586_v59 = vmul.f32 %v582_v48, %v3070_v47  ;;  %v457_v60 = vmul.f32 %v452_v58, %v3143_v54 }
  0xaa   :  { %390 = vrot.lane.b32.xlu1 %v378_v63, %s2906_s22  ;;  %470 = vrot.lane.b32.xlu0 %v456_v62, %s2906_s22  ;;  %v3150_v62 = vrot.slane %v2785_v53, %v3017_v25  ;;  %v625_v63 = vpop.permute.xlu0 %624  ;;  %v498_v25 = vmul.f32 %v495_v16, %v3008_v20 }
  0xab   :  { %v631_v53 = vmul.f32 %v625_v63, %v3108_v15 }
  0xae   :  { %392 = vrot.lane.b32.xlu1 %v379_v24, %s2906_s22  ;;  %474 = vrot.lane.b32.xlu0 %v458_v26, %s2906_s22  ;;  %v459_v24 = vmul.f32 %v452_v58, %v3150_v62  ;;  %v588_v26 = vmul.f32 %v582_v48, %v3088_v56  ;;  %v500_v58 = vmul.f32 %v495_v16, %v3022_v28 }
  0xb2   :  { %396 = vrot.lane.b32.xlu1 %v381_v33, %s2906_s22  ;;  %513 = vrot.lane.b32.xlu0 %v499_v32, %s2907_s29  ;;  %v629_v32 = vmul.f32 %v625_v63, %v3093_v57  ;;  %v497_v33 = vmul.f32 %v495_v16, %v3011_v21 }
  0xb6   :  { %400 = vrot.lane.b32.xlu1 %v383_v40, %s2906_s22  ;;  %517 = vrot.lane.b32.xlu0 %v501_v41, %s2907_s29  ;;  %v502_v40 = vmul.f32 %v495_v16, %v3039_v35  ;;  %v541_v41 = vmul.f32 %v539_v39, %v3047_v37  ;;  %v584_v16 = vmul.f32 %v582_v48, %v3098_v61 }
  0xba   :  { %466 = vrot.lane.b32.xlu1 %v454_v44, %s2906_s22  ;;  %557 = vrot.lane.b32.xlu0 %v543_v43, %s2907_s29  ;;  %v5033_v43 = vmov 13   ;;  %v542_v44 = vmul.f32 %v539_v39, %v3062_v45 }
  0xbe   :  { %468 = vrot.lane.b32.xlu1 %v455_v50, %s2906_s22  ;;  %561 = vrot.lane.b32.xlu0 %v545_v52, %s2907_s29  ;;  %v544_v50 = vmul.f32 %v539_v39, %v3075_v51  ;;  %v546_v52 = vmul.f32 %v539_v39, %v3085_v55  ;;  %v627_v39 = vmul.f32 %v625_v63, %v3129_v42 }
  0xc2   :  { %472 = vrot.lane.b32.xlu1 %v457_v60, %s2906_s22  ;;  %600 = vrot.lane.b32.xlu0 %v586_v59, %s2907_s29  ;;  %v585_v59 = vmul.f32 %v582_v48, %v3105_v13  ;;  %v587_v60 = vmul.f32 %v582_v48, %v3115_v27 }
  0xc6   :  { %476 = vrot.lane.b32.xlu1 %v459_v24, %s2906_s22  ;;  %604 = vrot.lane.b32.xlu0 %v588_v26, %s2907_s29  ;;  %v589_v24 = vmul.f32 %v582_v48, %v3122_v34  ;;  %v628_v26 = vmul.f32 %v625_v63, %v3136_v49  ;;  %v632_v48 = vmul.f32 %v625_v63, %v3150_v62 }
  0xca   :  { %509 = vrot.lane.b32.xlu1 %v497_v33, %s2907_s29  ;;  %643 = vrot.lane.b32.xlu0 %v629_v32, %s2907_s29  ;;  %v630_v33 = vmul.f32 %v625_v63, %v3143_v54 }
  0xce   :  { %511 = vrot.lane.b32.xlu1 %v498_v25, %s2907_s29  ;;  %647 = vrot.lane.b32.xlu0 %v631_v53, %s2907_s29 }
  0xd2   :  { %515 = vrot.lane.b32.xlu1 %v500_v58, %s2907_s29  ;;  %667 = vperm.xlu0 %2841, %v2972_v1  }
  0xd6   :  { %519 = vrot.lane.b32.xlu1 %v502_v40, %s2907_s29  ;;  %2842 = vset.pattern.permute.xlu0 %v5033_v43 }
  0xda   :  { %553 = vrot.lane.b32.xlu1 %v541_v41, %s2907_s29 }
  0xde   :  { %555 = vrot.lane.b32.xlu1 %v542_v44, %s2907_s29 }
  0xe2   :  { %559 = vrot.lane.b32.xlu1 %v544_v50, %s2907_s29 }
  0xe6   :  { %563 = vrot.lane.b32.xlu1 %v546_v52, %s2907_s29 }
  0xea   :  { %596 = vrot.lane.b32.xlu1 %v584_v16, %s2907_s29 }
  0xee   :  { %598 = vrot.lane.b32.xlu1 %v585_v59, %s2907_s29 }
  0xf2   :  { %602 = vrot.lane.b32.xlu1 %v587_v60, %s2907_s29 }
  0xf6   :  { %606 = vrot.lane.b32.xlu1 %v589_v24, %s2907_s29 }
  0xfa   :  { %639 = vrot.lane.b32.xlu1 %v627_v39, %s2907_s29 }
  0xfe   :  { %641 = vrot.lane.b32.xlu1 %v628_v26, %s2907_s29 }
 0x100   :  { %v3192_v32 = vpop.permute.xlu0 %237 }
 0x102   :  { %645 = vrot.lane.b32.xlu1 %v630_v33, %s2907_s29 }
 0x104   :  { %v3196_v25 = vpop.permute.xlu0 %241 }
 0x106   :  { %649 = vrot.lane.b32.xlu1 %v632_v48, %s2907_s29 }
 0x108   :  { %v3200_v53 = vpop.permute.xlu0 %245 }
 0x10c   :  { %v3202_v58 = vpop.permute.xlu0 %318 }
 0x110   :  { %v3204_v40 = vpop.permute.xlu0 %322 }
 0x114   :  { %v3206_v41 = vpop.permute.xlu0 %394 }
 0x118   :  { %v3208_v44 = vpop.permute.xlu0 %398 }
 0x11c   :  { %v3210_v50 = vpop.permute.xlu0 %470 }
 0x11d   :  { %5173 = vst [vmem:[#allocation8_spill] sm:$0xff] %v3210_v50 }
 0x120   :  { %v3212_v52 = vpop.permute.xlu0 %474 }
 0x121   :  { %5174 = vst [vmem:[#allocation9_spill] sm:$0xff] %v3212_v52 }
 0x124   :  { %v3214_v16 = vpop.permute.xlu0 %513 }
 0x125   :  { %5175 = vst [vmem:[#allocation10_spill] sm:$0xff] %v3214_v16 }
 0x128   :  { %v3216_v59 = vpop.permute.xlu0 %517 }
 0x129   :  { %5176 = vst [vmem:[#allocation11_spill] sm:$0xff] %v3216_v59 }
 0x12c   :  { %v3218_v63 = vpop.permute.xlu0 %557 }
 0x12d   :  { %5177 = vst [vmem:[#allocation12_spill] sm:$0xff] %v3218_v63 }
 0x130   :  { %v3220_v60 = vpop.permute.xlu0 %561 }
 0x131   :  { %5178 = vst [vmem:[#allocation13_spill] sm:$0xff] %v3220_v60 }
 0x134   :  { %v3222_v24 = vpop.permute.xlu0 %600 }
 0x135   :  { %5179 = vst [vmem:[#allocation14_spill] sm:$0xff] %v3222_v24 }
 0x138   :  { %v3224_v39 = vpop.permute.xlu0 %604 }
 0x139   :  { %5180 = vst [vmem:[#allocation15_spill] sm:$0xff] %v3224_v39 }
 0x13c   :  { %v3226_v26 = vpop.permute.xlu0 %643 }
 0x13d   :  { %5181 = vst [vmem:[#allocation16_spill] sm:$0xff] %v3226_v26 }
 0x140   :  { %v3228_v33 = vpop.permute.xlu0 %647 }
 0x141   :  { %5182 = vst [vmem:[#allocation17_spill] sm:$0xff] %v3228_v33 }
 0x151   :  { %v668_v48 = vpop.permute.xlu0 %667 }
 0x152   :  { %v672_v43 = vmul.f32 %v668_v48, %v3025_v29  ;;  %v670_v12 = vmul.f32 %v668_v48, %v3011_v21  ;;  %v674_v11 = vmul.f32 %v668_v48, %v3042_v36  ;;  %v671_v10 = vmul.f32 %v668_v48, %v3008_v20 }
 0x153   :  { %v673_v9 = vmul.f32 %v668_v48, %v3022_v28  ;;  %v675_v8 = vmul.f32 %v668_v48, %v3039_v35 }
 0x154   :  { %686 = vrot.lane.b32.xlu0 %v672_v43, %s2909_s30  ;;  %682 = vrot.lane.b32.xlu1 %v670_v12, %s2909_s30  ;;  %v5041_v43 = vmov 14  }
 0x158   :  { %690 = vrot.lane.b32.xlu0 %v674_v11, %s2909_s30  ;;  %684 = vrot.lane.b32.xlu1 %v671_v10, %s2909_s30 }
 0x15c   :  { %711 = vperm.xlu0 %2842, %v2972_v1   ;;  %688 = vrot.lane.b32.xlu1 %v673_v9, %s2909_s30 }
 0x160   :  { %692 = vrot.lane.b32.xlu1 %v675_v8, %s2909_s30  ;;  %2843 = vset.pattern.permute.xlu0 %v5041_v43 }
 0x1c6   :  { %v3244_v12 = vpop.permute.xlu0 %686 }
 0x1c7   :  { %5183 = vst [vmem:[#allocation18_spill] sm:$0xff] %v3244_v12 }
 0x1ca   :  { %v3246_v6 = vpop.permute.xlu0 %690 }
 0x1cb   :  { %5184 = vst [vmem:[#allocation19_spill] sm:$0xff] %v3246_v6 }
 0x1db   :  { %v712_v11 = vpop.permute.xlu0 %711 }
 0x1dc   :  { %v716_v10 = vmul.f32 %v712_v11, %v3050_v38  ;;  %v714_v5 = vmul.f32 %v712_v11, %v3047_v37  ;;  %v718_v9 = vmul.f32 %v712_v11, %v3065_v46  ;;  %v715_v8 = vmul.f32 %v712_v11, %v3062_v45 }
 0x1dd   :  { %v717_v48 = vmul.f32 %v712_v11, %v3075_v51  ;;  %v719_v43 = vmul.f32 %v712_v11, %v3085_v55 }
 0x1de   :  { %730 = vrot.lane.b32.xlu0 %v716_v10, %s2909_s30  ;;  %726 = vrot.lane.b32.xlu1 %v714_v5, %s2909_s30  ;;  %v5044_v10 = vmov 15  }
 0x1e2   :  { %734 = vrot.lane.b32.xlu0 %v718_v9, %s2909_s30  ;;  %728 = vrot.lane.b32.xlu1 %v715_v8, %s2909_s30 }
 0x1e6   :  { %754 = vperm.xlu0 %2843, %v2972_v1   ;;  %732 = vrot.lane.b32.xlu1 %v717_v48, %s2909_s30 }
 0x1ea   :  { %736 = vrot.lane.b32.xlu1 %v719_v43, %s2909_s30  ;;  %2844 = vset.pattern.permute.xlu0 %v5044_v10 }
 0x250   :  { %v3262_v5 = vpop.permute.xlu0 %730 }
 0x251   :  { %5185 = vst [vmem:[#allocation20_spill] sm:$0xff] %v3262_v5 }
 0x254   :  { %v3264_v3 = vpop.permute.xlu0 %734 }
 0x255   :  { %5186 = vst [vmem:[#allocation21_spill] sm:$0xff] %v3264_v3 }
 0x265   :  { %v755_v9 = vpop.permute.xlu0 %754 }
 0x266   :  { %v759_v8 = vmul.f32 %v755_v9, %v3070_v47  ;;  %v757_v7 = vmul.f32 %v755_v9, %v3098_v61  ;;  %v761_v11 = vmul.f32 %v755_v9, %v3088_v56  ;;  %v758_v43 = vmul.f32 %v755_v9, %v3105_v13 }
 0x267   :  { %v760_v48 = vmul.f32 %v755_v9, %v3115_v27  ;;  %v762_v10 = vmul.f32 %v755_v9, %v3122_v34 }
 0x268   :  { %773 = vrot.lane.b32.xlu0 %v759_v8, %s2909_s30  ;;  %769 = vrot.lane.b32.xlu1 %v757_v7, %s2909_s30  ;;  %v5047_v8 = vmov 16  }
 0x26c   :  { %777 = vrot.lane.b32.xlu0 %v761_v11, %s2909_s30  ;;  %771 = vrot.lane.b32.xlu1 %v758_v43, %s2909_s30 }
 0x270   :  { %797 = vperm.xlu0 %2844, %v2972_v1   ;;  %775 = vrot.lane.b32.xlu1 %v760_v48, %s2909_s30 }
 0x274   :  { %779 = vrot.lane.b32.xlu1 %v762_v10, %s2909_s30  ;;  %2845 = vset.pattern.permute.xlu0 %v5047_v8 }
 0x2da   :  { %v3280_v7 = vpop.permute.xlu0 %773 }
 0x2db   :  { %5187 = vst [vmem:[#allocation22_spill] sm:$0xff] %v3280_v7 }
 0x2de   :  { %v3282_v2 = vpop.permute.xlu0 %777 }
 0x2df   :  { %5188 = vst [vmem:[#allocation23_spill] sm:$0xff] %v3282_v2 }
 0x2ef   :  { %v798_v11 = vpop.permute.xlu0 %797 }
 0x2f0   :  { %v802_v43 = vmul.f32 %v798_v11, %v3093_v57  ;;  %v800_v4 = vmul.f32 %v798_v11, %v3129_v42  ;;  %v804_v9 = vmul.f32 %v798_v11, %v3108_v15  ;;  %v801_v10 = vmul.f32 %v798_v11, %v3136_v49 }
 0x2f1   :  { %v803_v48 = vmul.f32 %v798_v11, %v3143_v54  ;;  %v805_v8 = vmul.f32 %v798_v11, %v3150_v62 }
 0x2f2   :  { %816 = vrot.lane.b32.xlu0 %v802_v43, %s2909_s30  ;;  %812 = vrot.lane.b32.xlu1 %v800_v4, %s2909_s30  ;;  %v5050_v43 = vmov 17  }
 0x2f6   :  { %820 = vrot.lane.b32.xlu0 %v804_v9, %s2909_s30  ;;  %814 = vrot.lane.b32.xlu1 %v801_v10, %s2909_s30 }
 0x2fa   :  { %840 = vperm.xlu0 %2845, %v2972_v1   ;;  %818 = vrot.lane.b32.xlu1 %v803_v48, %s2909_s30  ;;  %v3310_v48 = vpop.permute.xlu1 %239 }
 0x2fe   :  { %822 = vrot.lane.b32.xlu1 %v805_v8, %s2909_s30  ;;  %2846 = vset.pattern.permute.xlu0 %v5050_v43 }
 0x364   :  { %v3298_v4 = vpop.permute.xlu0 %816 }
 0x365   :  { %5189 = vst [vmem:[#allocation24_spill] sm:$0xff] %v3298_v4 }
 0x368   :  { %v3300_v0 = vpop.permute.xlu0 %820 }
 0x369   :  { %5190 = vst [vmem:[#allocation25_spill] sm:$0xff] %v3300_v0  ;;  %v3316_v0 = vpop.permute.xlu1 %243 }
 0x36d   :  { %v3324_v4 = vpop.permute.xlu1 %247 }
 0x371   :  { %v3328_v5 = vpop.permute.xlu1 %314 }
 0x379   :  { %v841_v9 = vpop.permute.xlu0 %840 }
 0x37a   :  { %v845_v10 = vmul.f32 %v841_v9, %v3025_v29  ;;  %v843_v2 = vmul.f32 %v841_v9, %v3011_v21  ;;  %v847_v11 = vmul.f32 %v841_v9, %v3042_v36  ;;  %v844_v8 = vmul.f32 %v841_v9, %v3008_v20 }
 0x37b   :  { %v846_v43 = vmul.f32 %v841_v9, %v3022_v28 }
 0x37c   :  { %859 = vrot.lane.b32.xlu0 %v845_v10, %s2914_s6  ;;  %855 = vrot.lane.b32.xlu1 %v843_v2, %s2914_s6  ;;  %v848_v10 = vmul.f32 %v841_v9, %v3039_v35  ;;  %v5056_v2 = vmov 18  }
 0x380   :  { %863 = vrot.lane.b32.xlu0 %v847_v11, %s2914_s6  ;;  %857 = vrot.lane.b32.xlu1 %v844_v8, %s2914_s6 }
 0x384   :  { %884 = vperm.xlu0 %2846, %v2972_v1   ;;  %861 = vrot.lane.b32.xlu1 %v846_v43, %s2914_s6 }
 0x388   :  { %865 = vrot.lane.b32.xlu1 %v848_v10, %s2914_s6  ;;  %2847 = vset.pattern.permute.xlu0 %v5056_v2  ;;  %v3336_v2 = vpop.permute.xlu1 %316 }
 0x3ee   :  { %v3320_v11 = vpop.permute.xlu0 %859 }
 0x3ef   :  { %5191 = vst [vmem:[#allocation26_spill] sm:$0xff] %v3320_v11  ;;  %v3342_v11 = vpop.permute.xlu1 %320 }
 0x3f2   :  { %v3322_v8 = vpop.permute.xlu0 %863 }
 0x3f3   :  { %5192 = vst [vmem:[#allocation27_spill] sm:$0xff] %v3322_v8  ;;  %v3350_v6 = vpop.permute.xlu1 %324 }
 0x3f7   :  { %v3354_v26 = vpop.permute.xlu1 %390 }
 0x403   :  { %v885_v7 = vpop.permute.xlu0 %884 }
 0x404   :  { %v889_v3 = vmul.f32 %v885_v7, %v3050_v38  ;;  %v887_v43 = vmul.f32 %v885_v7, %v3047_v37  ;;  %v891_v9 = vmul.f32 %v885_v7, %v3065_v46  ;;  %v888_v10 = vmul.f32 %v885_v7, %v3062_v45 }
 0x405   :  { %v890_v8 = vmul.f32 %v885_v7, %v3075_v51 }
 0x406   :  { %903 = vrot.lane.b32.xlu0 %v889_v3, %s2914_s6  ;;  %899 = vrot.lane.b32.xlu1 %v887_v43, %s2914_s6  ;;  %v892_v3 = vmul.f32 %v885_v7, %v3085_v55  ;;  %v5063_v43 = vmov 19  }
 0x40a   :  { %907 = vrot.lane.b32.xlu0 %v891_v9, %s2914_s6  ;;  %901 = vrot.lane.b32.xlu1 %v888_v10, %s2914_s6 }
 0x40e   :  { %927 = vperm.xlu0 %2847, %v2972_v1   ;;  %905 = vrot.lane.b32.xlu1 %v890_v8, %s2914_s6 }
 0x412   :  { %909 = vrot.lane.b32.xlu1 %v892_v3, %s2914_s6  ;;  %2848 = vset.pattern.permute.xlu0 %v5063_v43  ;;  %v3362_v43 = vpop.permute.xlu1 %392 }
 0x478   :  { %v3346_v9 = vpop.permute.xlu0 %903 }
 0x479   :  { %5193 = vst [vmem:[#allocation28_spill] sm:$0xff] %v3346_v9  ;;  %v3368_v9 = vpop.permute.xlu1 %396 }
 0x47c   :  { %v3348_v10 = vpop.permute.xlu0 %907 }
 0x47d   :  { %5194 = vst [vmem:[#allocation29_spill] sm:$0xff] %v3348_v10  ;;  %v3376_v39 = vpop.permute.xlu1 %400 }
 0x481   :  { %v3380_v63 = vpop.permute.xlu1 %466 }
 0x48d   :  { %v928_v12 = vpop.permute.xlu0 %927 }
 0x48e   :  { %v932_v33 = vmul.f32 %v928_v12, %v3070_v47  ;;  %v930_v8 = vmul.f32 %v928_v12, %v3098_v61  ;;  %v934_v7 = vmul.f32 %v928_v12, %v3088_v56  ;;  %v931_v3 = vmul.f32 %v928_v12, %v3105_v13 }
 0x48f   :  { %v933_v10 = vmul.f32 %v928_v12, %v3115_v27 }
 0x490   :  { %946 = vrot.lane.b32.xlu0 %v932_v33, %s2914_s6  ;;  %942 = vrot.lane.b32.xlu1 %v930_v8, %s2914_s6  ;;  %v935_v33 = vmul.f32 %v928_v12, %v3122_v34  ;;  %v5070_v8 = vmov 20  }
 0x494   :  { %950 = vrot.lane.b32.xlu0 %v934_v7, %s2914_s6  ;;  %944 = vrot.lane.b32.xlu1 %v931_v3, %s2914_s6 }
 0x498   :  { %970 = vperm.xlu0 %2848, %v2972_v1   ;;  %948 = vrot.lane.b32.xlu1 %v933_v10, %s2914_s6 }
 0x49c   :  { %952 = vrot.lane.b32.xlu1 %v935_v33, %s2914_s6  ;;  %2849 = vset.pattern.permute.xlu0 %v5070_v8  ;;  %v3388_v8 = vpop.permute.xlu1 %468 }
 0x502   :  { %v3372_v7 = vpop.permute.xlu0 %946 }
 0x503   :  { %5195 = vst [vmem:[#allocation30_spill] sm:$0xff] %v3372_v7  ;;  %v3394_v7 = vpop.permute.xlu1 %472 }
 0x504   :  { %5197 = vst [vmem:[#allocation32_spill] sm:$0xff] %v3394_v7 }
 0x506   :  { %v3374_v3 = vpop.permute.xlu0 %950 }
 0x507   :  { %5196 = vst [vmem:[#allocation31_spill] sm:$0xff] %v3374_v3  ;;  %v3402_v59 = vpop.permute.xlu1 %476 }
 0x508   :  { %5200 = vst [vmem:[#allocation35_spill] sm:$0xff] %v3402_v59 }
 0x50b   :  { %v3406_v50 = vpop.permute.xlu1 %509 }
 0x50c   :  { %5201 = vst [vmem:[#allocation36_spill] sm:$0xff] %v3406_v50 }
 0x517   :  { %v971_v24 = vpop.permute.xlu0 %970 }
 0x518   :  { %v975_v60 = vmul.f32 %v971_v24, %v3093_v57  ;;  %v973_v10 = vmul.f32 %v971_v24, %v3129_v42  ;;  %v977_v12 = vmul.f32 %v971_v24, %v3108_v15  ;;  %v974_v33 = vmul.f32 %v971_v24, %v3136_v49 }
 0x519   :  { %v976_v3 = vmul.f32 %v971_v24, %v3143_v54 }
 0x51a   :  { %989 = vrot.lane.b32.xlu0 %v975_v60, %s2914_s6  ;;  %985 = vrot.lane.b32.xlu1 %v973_v10, %s2914_s6  ;;  %v978_v60 = vmul.f32 %v971_v24, %v3150_v62  ;;  %v5077_v10 = vmov 21  }
 0x51e   :  { %993 = vrot.lane.b32.xlu0 %v977_v12, %s2914_s6  ;;  %987 = vrot.lane.b32.xlu1 %v974_v33, %s2914_s6 }
 0x522   :  { %1013 = vperm.xlu0 %2849, %v2972_v1   ;;  %991 = vrot.lane.b32.xlu1 %v976_v3, %s2914_s6 }
 0x526   :  { %995 = vrot.lane.b32.xlu1 %v978_v60, %s2914_s6  ;;  %2850 = vset.pattern.permute.xlu0 %v5077_v10  ;;  %v3414_v10 = vpop.permute.xlu1 %511 }
 0x527   :  { %5202 = vst [vmem:[#allocation37_spill] sm:$0xff] %v3414_v10 }
 0x58c   :  { %v3398_v12 = vpop.permute.xlu0 %989 }
 0x58d   :  { %5198 = vst [vmem:[#allocation33_spill] sm:$0xff] %v3398_v12  ;;  %v3420_v12 = vpop.permute.xlu1 %515 }
 0x58e   :  { %5203 = vst [vmem:[#allocation38_spill] sm:$0xff] %v3420_v12 }
 0x590   :  { %v3400_v33 = vpop.permute.xlu0 %993 }
 0x591   :  { %5199 = vst [vmem:[#allocation34_spill] sm:$0xff] %v3400_v33  ;;  %v3428_v50 = vpop.permute.xlu1 %519 }
 0x592   :  { %5206 = vst [vmem:[#allocation41_spill] sm:$0xff] %v3428_v50 }
 0x595   :  { %v3432_v7 = vpop.permute.xlu1 %553 }
 0x596   :  { %5207 = vst [vmem:[#allocation42_spill] sm:$0xff] %v3432_v7 }
 0x5a1   :  { %v1014_v16 = vpop.permute.xlu0 %1013 }
 0x5a2   :  { %v1018_v52 = vmul.f32 %v1014_v16, %v3025_v29  ;;  %v1016_v3 = vmul.f32 %v1014_v16, %v3011_v21  ;;  %v1020_v24 = vmul.f32 %v1014_v16, %v3042_v36  ;;  %v1017_v60 = vmul.f32 %v1014_v16, %v3008_v20 }
 0x5a3   :  { %v1019_v33 = vmul.f32 %v1014_v16, %v3022_v28 }
 0x5a4   :  { %1032 = vrot.lane.b32.xlu0 %v1018_v52, %s2919_s7  ;;  %1028 = vrot.lane.b32.xlu1 %v1016_v3, %s2919_s7  ;;  %v1021_v52 = vmul.f32 %v1014_v16, %v3039_v35  ;;  %v5082_v3 = vmov 22  }
 0x5a8   :  { %1036 = vrot.lane.b32.xlu0 %v1020_v24, %s2919_s7  ;;  %1030 = vrot.lane.b32.xlu1 %v1017_v60, %s2919_s7 }
 0x5ac   :  { %1057 = vperm.xlu0 %2850, %v2972_v1   ;;  %1034 = vrot.lane.b32.xlu1 %v1019_v33, %s2919_s7 }
 0x5b0   :  { %1038 = vrot.lane.b32.xlu1 %v1021_v52, %s2919_s7  ;;  %2851 = vset.pattern.permute.xlu0 %v5082_v3  ;;  %v3440_v3 = vpop.permute.xlu1 %555 }
 0x5b1   :  { %5208 = vst [vmem:[#allocation43_spill] sm:$0xff] %v3440_v3 }
 0x616   :  { %v3424_v24 = vpop.permute.xlu0 %1032 }
 0x617   :  { %5204 = vst [vmem:[#allocation39_spill] sm:$0xff] %v3424_v24  ;;  %v3446_v24 = vpop.permute.xlu1 %559 }
 0x618   :  { %5209 = vst [vmem:[#allocation44_spill] sm:$0xff] %v3446_v24 }
 0x61a   :  { %v3426_v60 = vpop.permute.xlu0 %1036 }
 0x61b   :  { %5205 = vst [vmem:[#allocation40_spill] sm:$0xff] %v3426_v60  ;;  %v3454_v7 = vpop.permute.xlu1 %563 }
 0x61c   :  { %5212 = vst [vmem:[#allocation47_spill] sm:$0xff] %v3454_v7 }
 0x61f   :  { %v3458_v12 = vpop.permute.xlu1 %596 }
 0x620   :  { %5213 = vst [vmem:[#allocation48_spill] sm:$0xff] %v3458_v12 }
 0x62b   :  { %v1058_v10 = vpop.permute.xlu0 %1057 }
 0x62c   :  { %v1062_v59 = vmul.f32 %v1058_v10, %v3050_v38  ;;  %v1060_v33 = vmul.f32 %v1058_v10, %v3047_v37  ;;  %v1064_v16 = vmul.f32 %v1058_v10, %v3065_v46  ;;  %v1061_v52 = vmul.f32 %v1058_v10, %v3062_v45 }
 0x62d   :  { %v1063_v60 = vmul.f32 %v1058_v10, %v3075_v51 }
 0x62e   :  { %1076 = vrot.lane.b32.xlu0 %v1062_v59, %s2919_s7  ;;  %1072 = vrot.lane.b32.xlu1 %v1060_v33, %s2919_s7  ;;  %v1065_v59 = vmul.f32 %v1058_v10, %v3085_v55  ;;  %v5087_v33 = vmov 23  }
 0x632   :  { %1080 = vrot.lane.b32.xlu0 %v1064_v16, %s2919_s7  ;;  %1074 = vrot.lane.b32.xlu1 %v1061_v52, %s2919_s7 }
 0x636   :  { %1100 = vperm.xlu0 %2851, %v2972_v1   ;;  %1078 = vrot.lane.b32.xlu1 %v1063_v60, %s2919_s7 }
 0x63a   :  { %1082 = vrot.lane.b32.xlu1 %v1065_v59, %s2919_s7  ;;  %2852 = vset.pattern.permute.xlu0 %v5087_v33  ;;  %v3466_v33 = vpop.permute.xlu1 %598 }
 0x63b   :  { %5214 = vst [vmem:[#allocation49_spill] sm:$0xff] %v3466_v33 }
 0x6a0   :  { %v3450_v16 = vpop.permute.xlu0 %1076 }
 0x6a1   :  { %5210 = vst [vmem:[#allocation45_spill] sm:$0xff] %v3450_v16  ;;  %v3472_v16 = vpop.permute.xlu1 %602 }
 0x6a2   :  { %5215 = vst [vmem:[#allocation50_spill] sm:$0xff] %v3472_v16 }
 0x6a4   :  { %v3452_v52 = vpop.permute.xlu0 %1080 }
 0x6a5   :  { %5211 = vst [vmem:[#allocation46_spill] sm:$0xff] %v3452_v52 }
 0x6b5   :  { %v1101_v3 = vpop.permute.xlu0 %1100 }
 0x6b6   :  { %v1105_v50 = vmul.f32 %v1101_v3, %v3070_v47  ;;  %v1103_v60 = vmul.f32 %v1101_v3, %v3098_v61  ;;  %v1107_v10 = vmul.f32 %v1101_v3, %v3088_v56  ;;  %v1104_v59 = vmul.f32 %v1101_v3, %v3105_v13 }
 0x6b7   :  { %v1106_v52 = vmul.f32 %v1101_v3, %v3115_v27 }
 0x6b8   :  { %1119 = vrot.lane.b32.xlu0 %v1105_v50, %s2919_s7  ;;  %1115 = vrot.lane.b32.xlu1 %v1103_v60, %s2919_s7  ;;  %v1108_v50 = vmul.f32 %v1101_v3, %v3122_v34  ;;  %v2922_v60 = vmov 24  }
 0x6bc   :  { %1123 = vrot.lane.b32.xlu0 %v1107_v10, %s2919_s7  ;;  %1117 = vrot.lane.b32.xlu1 %v1104_v59, %s2919_s7  ;;  %v3479_v59 = vpop.permute.xlu1 %606 }
 0x6bd   :  { %5218 = vst [vmem:[#allocation53_spill] sm:$0xff] %v3479_v59 }
 0x6c0   :  { %1143 = vperm.xlu0 %2852, %v2972_v1   ;;  %1121 = vrot.lane.b32.xlu1 %v1106_v52, %s2919_s7  ;;  %v3483_v52 = vpop.permute.xlu1 %639 }
 0x6c1   :  { %5219 = vst [vmem:[#allocation54_spill] sm:$0xff] %v3483_v52 }
 0x6c4   :  { %1125 = vrot.lane.b32.xlu1 %v1108_v50, %s2919_s7  ;;  %2853 = vset.pattern.permute.xlu0 %v2922_v60  ;;  %v3491_v60 = vpop.permute.xlu1 %641 }
 0x6c5   :  { %5220 = vst [vmem:[#allocation55_spill] sm:$0xff] %v3491_v60 }
 0x72a   :  { %v3475_v12 = vpop.permute.xlu0 %1119 }
 0x72b   :  { %5216 = vst [vmem:[#allocation51_spill] sm:$0xff] %v3475_v12  ;;  %v3497_v12 = vpop.permute.xlu1 %645 }
 0x72c   :  { %5221 = vst [vmem:[#allocation56_spill] sm:$0xff] %v3497_v12 }
 0x72e   :  { %v3477_v10 = vpop.permute.xlu0 %1123 }
 0x72f   :  { %5217 = vst [vmem:[#allocation52_spill] sm:$0xff] %v3477_v10 }
 0x73f   :  { %v1144_v33 = vpop.permute.xlu0 %1143 }
 0x740   :  { %v1148_v7 = vmul.f32 %v1144_v33, %v3093_v57  ;;  %v1146_v24 = vmul.f32 %v1144_v33, %v3129_v42  ;;  %v1150_v3 = vmul.f32 %v1144_v33, %v3108_v15  ;;  %v1147_v50 = vmul.f32 %v1144_v33, %v3136_v49 }
 0x741   :  { %v1149_v10 = vmul.f32 %v1144_v33, %v3143_v54 }
 0x742   :  { %1162 = vrot.lane.b32.xlu0 %v1148_v7, %s2919_s7  ;;  %1158 = vrot.lane.b32.xlu1 %v1146_v24, %s2919_s7  ;;  %v1151_v7 = vmul.f32 %v1144_v33, %v3150_v62  ;;  %v2923_v24 = vmov 25  }
 0x746   :  { %1166 = vrot.lane.b32.xlu0 %v1150_v3, %s2919_s7  ;;  %1160 = vrot.lane.b32.xlu1 %v1147_v50, %s2919_s7  ;;  %v3504_v50 = vpop.permute.xlu1 %649 }
 0x747   :  { %5224 = vst [vmem:[#allocation59_spill] sm:$0xff] %v3504_v50 }
 0x74a   :  { %1186 = vperm.xlu0 %2853, %v2972_v1   ;;  %1164 = vrot.lane.b32.xlu1 %v1149_v10, %s2919_s7  ;;  %v3508_v10 = vpop.permute.xlu1 %682 }
 0x74b   :  { %5225 = vst [vmem:[#allocation60_spill] sm:$0xff] %v3508_v10 }
 0x74e   :  { %1168 = vrot.lane.b32.xlu1 %v1151_v7, %s2919_s7  ;;  %2854 = vset.pattern.permute.xlu0 %v2923_v24  ;;  %v3516_v24 = vpop.permute.xlu1 %684 }
 0x74f   :  { %5226 = vst [vmem:[#allocation61_spill] sm:$0xff] %v3516_v24 }
 0x7b4   :  { %v3500_v52 = vpop.permute.xlu0 %1162 }
 0x7b5   :  { %5222 = vst [vmem:[#allocation57_spill] sm:$0xff] %v3500_v52  ;;  %v3522_v52 = vpop.permute.xlu1 %688 }
 0x7b6   :  { %5227 = vst [vmem:[#allocation62_spill] sm:$0xff] %v3522_v52 }
 0x7b8   :  { %v3502_v3 = vpop.permute.xlu0 %1166 }
 0x7b9   :  { %5223 = vst [vmem:[#allocation58_spill] sm:$0xff] %v3502_v3 }
 0x7c9   :  { %v1187_v60 = vpop.permute.xlu0 %1186 }
 0x7ca   :  { %v1191_v59 = vmul.f32 %v1187_v60, %v3025_v29  ;;  %v1189_v16 = vmul.f32 %v1187_v60, %v3011_v21  ;;  %v1193_v33 = vmul.f32 %v1187_v60, %v3042_v36  ;;  %v1190_v7 = vmul.f32 %v1187_v60, %v3008_v20 }
 0x7cb   :  { %v1192_v3 = vmul.f32 %v1187_v60, %v3022_v28 }
 0x7cc   :  { %1205 = vrot.lane.b32.xlu0 %v1191_v59, %s2924_s8  ;;  %1201 = vrot.lane.b32.xlu1 %v1189_v16, %s2924_s8  ;;  %v1194_v59 = vmul.f32 %v1187_v60, %v3039_v35  ;;  %v2925_v16 = vmov 26  }
 0x7d0   :  { %1209 = vrot.lane.b32.xlu0 %v1193_v33, %s2924_s8  ;;  %1203 = vrot.lane.b32.xlu1 %v1190_v7, %s2924_s8  ;;  %v3529_v7 = vpop.permute.xlu1 %692 }
 0x7d1   :  { %5230 = vst [vmem:[#allocation65_spill] sm:$0xff] %v3529_v7 }
 0x7d4   :  { %1230 = vperm.xlu0 %2854, %v2972_v1   ;;  %1207 = vrot.lane.b32.xlu1 %v1192_v3, %s2924_s8  ;;  %v3533_v3 = vpop.permute.xlu1 %726 }
 0x7d5   :  { %5231 = vst [vmem:[#allocation66_spill] sm:$0xff] %v3533_v3 }
 0x7d8   :  { %1211 = vrot.lane.b32.xlu1 %v1194_v59, %s2924_s8  ;;  %2855 = vset.pattern.permute.xlu0 %v2925_v16  ;;  %v3541_v16 = vpop.permute.xlu1 %728 }
 0x7d9   :  { %5232 = vst [vmem:[#allocation67_spill] sm:$0xff] %v3541_v16 }
 0x83e   :  { %v3525_v10 = vpop.permute.xlu0 %1205 }
 0x83f   :  { %5228 = vst [vmem:[#allocation63_spill] sm:$0xff] %v3525_v10  ;;  %v3547_v10 = vpop.permute.xlu1 %732 }
 0x840   :  { %5233 = vst [vmem:[#allocation68_spill] sm:$0xff] %v3547_v10 }
 0x842   :  { %v3527_v33 = vpop.permute.xlu0 %1209 }
 0x843   :  { %5229 = vst [vmem:[#allocation64_spill] sm:$0xff] %v3527_v33 }
 0x853   :  { %v1231_v24 = vpop.permute.xlu0 %1230 }
 0x854   :  { %v1235_v50 = vmul.f32 %v1231_v24, %v3050_v38  ;;  %v1233_v12 = vmul.f32 %v1231_v24, %v3047_v37  ;;  %v1237_v60 = vmul.f32 %v1231_v24, %v3065_v46  ;;  %v1234_v59 = vmul.f32 %v1231_v24, %v3062_v45 }
 0x855   :  { %v1236_v33 = vmul.f32 %v1231_v24, %v3075_v51 }
 0x856   :  { %1249 = vrot.lane.b32.xlu0 %v1235_v50, %s2924_s8  ;;  %1245 = vrot.lane.b32.xlu1 %v1233_v12, %s2924_s8  ;;  %v1238_v50 = vmul.f32 %v1231_v24, %v3085_v55  ;;  %v2926_v12 = vmov 27  }
 0x85a   :  { %1253 = vrot.lane.b32.xlu0 %v1237_v60, %s2924_s8  ;;  %1247 = vrot.lane.b32.xlu1 %v1234_v59, %s2924_s8  ;;  %v3554_v59 = vpop.permute.xlu1 %736 }
 0x85b   :  { %5236 = vst [vmem:[#allocation71_spill] sm:$0xff] %v3554_v59 }
 0x85e   :  { %1273 = vperm.xlu0 %2855, %v2972_v1   ;;  %1251 = vrot.lane.b32.xlu1 %v1236_v33, %s2924_s8  ;;  %v3558_v33 = vpop.permute.xlu1 %769 }
 0x85f   :  { %5237 = vst [vmem:[#allocation72_spill] sm:$0xff] %v3558_v33 }
 0x862   :  { %1255 = vrot.lane.b32.xlu1 %v1238_v50, %s2924_s8  ;;  %2856 = vset.pattern.permute.xlu0 %v2926_v12  ;;  %v3566_v12 = vpop.permute.xlu1 %771 }
 0x863   :  { %5238 = vst [vmem:[#allocation73_spill] sm:$0xff] %v3566_v12 }
 0x8c8   :  { %v3550_v3 = vpop.permute.xlu0 %1249 }
 0x8c9   :  { %5234 = vst [vmem:[#allocation69_spill] sm:$0xff] %v3550_v3  ;;  %v3572_v3 = vpop.permute.xlu1 %775 }
 0x8ca   :  { %5239 = vst [vmem:[#allocation74_spill] sm:$0xff] %v3572_v3 }
 0x8cc   :  { %v3552_v60 = vpop.permute.xlu0 %1253 }
 0x8cd   :  { %5235 = vst [vmem:[#allocation70_spill] sm:$0xff] %v3552_v60 }
 0x8dd   :  { %v1274_v16 = vpop.permute.xlu0 %1273 }
 0x8de   :  { %v1278_v7 = vmul.f32 %v1274_v16, %v3070_v47  ;;  %v1276_v52 = vmul.f32 %v1274_v16, %v3098_v61  ;;  %v1280_v24 = vmul.f32 %v1274_v16, %v3088_v56  ;;  %v1277_v50 = vmul.f32 %v1274_v16, %v3105_v13 }
 0x8df   :  { %v1279_v60 = vmul.f32 %v1274_v16, %v3115_v27 }
 0x8e0   :  { %1292 = vrot.lane.b32.xlu0 %v1278_v7, %s2924_s8  ;;  %1288 = vrot.lane.b32.xlu1 %v1276_v52, %s2924_s8  ;;  %v1281_v7 = vmul.f32 %v1274_v16, %v3122_v34  ;;  %v2927_v52 = vmov 28  }
 0x8e4   :  { %1296 = vrot.lane.b32.xlu0 %v1280_v24, %s2924_s8  ;;  %1290 = vrot.lane.b32.xlu1 %v1277_v50, %s2924_s8  ;;  %v3579_v50 = vpop.permute.xlu1 %779 }
 0x8e5   :  { %5242 = vst [vmem:[#allocation77_spill] sm:$0xff] %v3579_v50 }
 0x8e8   :  { %1316 = vperm.xlu0 %2856, %v2972_v1   ;;  %1294 = vrot.lane.b32.xlu1 %v1279_v60, %s2924_s8  ;;  %v3583_v60 = vpop.permute.xlu1 %812 }
 0x8e9   :  { %5243 = vst [vmem:[#allocation78_spill] sm:$0xff] %v3583_v60 }
 0x8ec   :  { %1298 = vrot.lane.b32.xlu1 %v1281_v7, %s2924_s8  ;;  %2857 = vset.pattern.permute.xlu0 %v2927_v52  ;;  %v3591_v52 = vpop.permute.xlu1 %814 }
 0x8ed   :  { %5244 = vst [vmem:[#allocation79_spill] sm:$0xff] %v3591_v52 }
 0x952   :  { %v3575_v33 = vpop.permute.xlu0 %1292 }
 0x953   :  { %5240 = vst [vmem:[#allocation75_spill] sm:$0xff] %v3575_v33  ;;  %v3597_v33 = vld [vmem:[%s5027_s1] sm:$0x3f]  ;;  %s2929_s1 = smov 95  }
 0x956   :  { %v3577_v24 = vpop.permute.xlu0 %1296 }
 0x957   :  { %5241 = vst [vmem:[#allocation76_spill] sm:$0xff] %v3577_v24 }
 0x967   :  { %v1317_v12 = vpop.permute.xlu0 %1316 }
 0x968   :  { %v1321_v59 = vmul.f32 %v1317_v12, %v3093_v57  ;;  %v1319_v1 = vmul.f32 %v1317_v12, %v3129_v42  ;;  %v1323_v16 = vmul.f32 %v1317_v12, %v3108_v15  ;;  %v1320_v7 = vmul.f32 %v1317_v12, %v3136_v49 }
 0x969   :  { %v1322_v24 = vmul.f32 %v1317_v12, %v3143_v54 }
 0x96a   :  { %1335 = vrot.lane.b32.xlu0 %v1321_v59, %s2924_s8  ;;  %1331 = vrot.lane.b32.xlu1 %v1319_v1, %s2924_s8  ;;  %v1324_v59 = vmul.f32 %v1317_v12, %v3150_v62  ;;  %v3602_v1 = vpop.permute.xlu1 %818 }
 0x96b   :  { %5245 = vst [vmem:[#allocation80_spill] sm:$0xff] %v3602_v1 }
 0x96e   :  { %1339 = vrot.lane.b32.xlu0 %v1323_v16, %s2924_s8  ;;  %1333 = vrot.lane.b32.xlu1 %v1320_v7, %s2924_s8  ;;  %v2928_v16 = vmov 29   ;;  %v3609_v52 = vpop.permute.xlu1 %822 }
 0x96f   :  { %5248 = vst [vmem:[#allocation83_spill] sm:$0xff] %v3609_v52 }
 0x972   :  { %1359 = vperm.xlu0 %2857, %v3597_v33   ;;  %1337 = vrot.lane.b32.xlu1 %v1322_v24, %s2924_s8  ;;  %v3613_v24 = vpop.permute.xlu1 %855 }
 0x973   :  { %5249 = vst [vmem:[#allocation84_spill] sm:$0xff] %v3613_v24 }
 0x976   :  { %1341 = vrot.lane.b32.xlu1 %v1324_v59, %s2924_s8  ;;  %2858 = vset.pattern.permute.xlu0 %v2928_v16  ;;  %v3621_v16 = vpop.permute.xlu1 %857 }
 0x977   :  { %5250 = vst [vmem:[#allocation85_spill] sm:$0xff] %v3621_v16 }
 0x9dc   :  { %v3605_v7 = vpop.permute.xlu0 %1335 }
 0x9dd   :  { %5246 = vst [vmem:[#allocation81_spill] sm:$0xff] %v3605_v7  ;;  %v3627_v7 = vpop.permute.xlu1 %861 }
 0x9de   :  { %5251 = vst [vmem:[#allocation86_spill] sm:$0xff] %v3627_v7 }
 0x9e0   :  { %v3607_v60 = vpop.permute.xlu0 %1339 }
 0x9e1   :  { %5247 = vst [vmem:[#allocation82_spill] sm:$0xff] %v3607_v60 }
 0x9f1   :  { %v1360_v50 = vpop.permute.xlu0 %1359 }
 0x9f2   :  { %v1364_v3 = vmul.f32 %v1360_v50, %v3025_v29  ;;  %v1362_v10 = vmul.f32 %v1360_v50, %v3011_v21  ;;  %v1366_v12 = vmul.f32 %v1360_v50, %v3042_v36  ;;  %v1363_v59 = vmul.f32 %v1360_v50, %v3008_v20 }
 0x9f3   :  { %v1365_v60 = vmul.f32 %v1360_v50, %v3022_v28 }
 0x9f4   :  { %1378 = vrot.lane.b32.xlu0 %v1364_v3, %s2929_s1  ;;  %1374 = vrot.lane.b32.xlu1 %v1362_v10, %s2929_s1  ;;  %v1367_v3 = vmul.f32 %v1360_v50, %v3039_v35  ;;  %v2930_v10 = vmov 30  }
 0x9f8   :  { %1382 = vrot.lane.b32.xlu0 %v1366_v12, %s2929_s1  ;;  %1376 = vrot.lane.b32.xlu1 %v1363_v59, %s2929_s1  ;;  %v3634_v59 = vpop.permute.xlu1 %865 }
 0x9f9   :  { %5254 = vst [vmem:[#allocation89_spill] sm:$0xff] %v3634_v59 }
 0x9fc   :  { %1403 = vperm.xlu0 %2858, %v3597_v33   ;;  %1380 = vrot.lane.b32.xlu1 %v1365_v60, %s2929_s1  ;;  %v3638_v60 = vpop.permute.xlu1 %899 }
 0x9fd   :  { %5255 = vst [vmem:[#allocation90_spill] sm:$0xff] %v3638_v60 }
 0xa00   :  { %1384 = vrot.lane.b32.xlu1 %v1367_v3, %s2929_s1  ;;  %2859 = vset.pattern.permute.xlu0 %v2930_v10  ;;  %v3646_v10 = vpop.permute.xlu1 %901 }
 0xa01   :  { %5256 = vst [vmem:[#allocation91_spill] sm:$0xff] %v3646_v10 }
 0xa66   :  { %v3630_v24 = vpop.permute.xlu0 %1378 }
 0xa67   :  { %5252 = vst [vmem:[#allocation87_spill] sm:$0xff] %v3630_v24  ;;  %v3652_v24 = vpop.permute.xlu1 %905 }
 0xa68   :  { %5257 = vst [vmem:[#allocation92_spill] sm:$0xff] %v3652_v24 }
 0xa6a   :  { %v3632_v12 = vpop.permute.xlu0 %1382 }
 0xa6b   :  { %5253 = vst [vmem:[#allocation88_spill] sm:$0xff] %v3632_v12 }
 0xa7b   :  { %v1404_v16 = vpop.permute.xlu0 %1403 }
 0xa7c   :  { %v1408_v52 = vmul.f32 %v1404_v16, %v3050_v38  ;;  %v1406_v1 = vmul.f32 %v1404_v16, %v3047_v37  ;;  %v1410_v50 = vmul.f32 %v1404_v16, %v3065_v46  ;;  %v1407_v3 = vmul.f32 %v1404_v16, %v3062_v45 }
 0xa7d   :  { %v1409_v12 = vmul.f32 %v1404_v16, %v3075_v51 }
 0xa7e   :  { %1422 = vrot.lane.b32.xlu0 %v1408_v52, %s2929_s1  ;;  %1418 = vrot.lane.b32.xlu1 %v1406_v1, %s2929_s1  ;;  %v1411_v52 = vmul.f32 %v1404_v16, %v3085_v55  ;;  %v2931_v1 = vmov 31  }
 0xa82   :  { %1426 = vrot.lane.b32.xlu0 %v1410_v50, %s2929_s1  ;;  %1420 = vrot.lane.b32.xlu1 %v1407_v3, %s2929_s1  ;;  %v3659_v3 = vpop.permute.xlu1 %909 }
 0xa83   :  { %5260 = vst [vmem:[#allocation95_spill] sm:$0xff] %v3659_v3 }
 0xa86   :  { %1446 = vperm.xlu0 %2859, %v3597_v33   ;;  %1424 = vrot.lane.b32.xlu1 %v1409_v12, %s2929_s1  ;;  %v3663_v12 = vpop.permute.xlu1 %942 }
 0xa87   :  { %5261 = vst [vmem:[#allocation96_spill] sm:$0xff] %v3663_v12 }
 0xa8a   :  { %1428 = vrot.lane.b32.xlu1 %v1411_v52, %s2929_s1  ;;  %2860 = vset.pattern.permute.xlu0 %v2931_v1  ;;  %v3671_v1 = vpop.permute.xlu1 %944 }
 0xa8b   :  { %5262 = vst [vmem:[#allocation97_spill] sm:$0xff] %v3671_v1 }
 0xaf0   :  { %v3655_v60 = vpop.permute.xlu0 %1422 }
 0xaf1   :  { %5258 = vst [vmem:[#allocation93_spill] sm:$0xff] %v3655_v60  ;;  %v3677_v60 = vpop.permute.xlu1 %948 }
 0xaf2   :  { %5263 = vst [vmem:[#allocation98_spill] sm:$0xff] %v3677_v60 }
 0xaf4   :  { %v3657_v50 = vpop.permute.xlu0 %1426 }
 0xaf5   :  { %5259 = vst [vmem:[#allocation94_spill] sm:$0xff] %v3657_v50 }
 0xb05   :  { %v1447_v10 = vpop.permute.xlu0 %1446 }
 0xb06   :  { %v1451_v59 = vmul.f32 %v1447_v10, %v3070_v47  ;;  %v1449_v7 = vmul.f32 %v1447_v10, %v3098_v61  ;;  %v1453_v16 = vmul.f32 %v1447_v10, %v3088_v56  ;;  %v1450_v52 = vmul.f32 %v1447_v10, %v3105_v13 }
 0xb07   :  { %v1452_v50 = vmul.f32 %v1447_v10, %v3115_v27 }
 0xb08   :  { %1465 = vrot.lane.b32.xlu0 %v1451_v59, %s2929_s1  ;;  %1461 = vrot.lane.b32.xlu1 %v1449_v7, %s2929_s1  ;;  %v1454_v59 = vmul.f32 %v1447_v10, %v3122_v34  ;;  %v2932_v7 = vmov 32  }
 0xb0c   :  { %1469 = vrot.lane.b32.xlu0 %v1453_v16, %s2929_s1  ;;  %1463 = vrot.lane.b32.xlu1 %v1450_v52, %s2929_s1  ;;  %v3684_v52 = vpop.permute.xlu1 %952 }
 0xb0d   :  { %5266 = vst [vmem:[#allocation101_spill] sm:$0xff] %v3684_v52 }
 0xb10   :  { %1489 = vperm.xlu0 %2860, %v3597_v33   ;;  %1467 = vrot.lane.b32.xlu1 %v1452_v50, %s2929_s1  ;;  %v3688_v50 = vpop.permute.xlu1 %985 }
 0xb11   :  { %5267 = vst [vmem:[#allocation102_spill] sm:$0xff] %v3688_v50 }
 0xb14   :  { %1471 = vrot.lane.b32.xlu1 %v1454_v59, %s2929_s1  ;;  %2861 = vset.pattern.permute.xlu0 %v2932_v7  ;;  %v3696_v7 = vpop.permute.xlu1 %987 }
 0xb15   :  { %5268 = vst [vmem:[#allocation103_spill] sm:$0xff] %v3696_v7 }
 0xb7a   :  { %v3680_v12 = vpop.permute.xlu0 %1465 }
 0xb7b   :  { %5264 = vst [vmem:[#allocation99_spill] sm:$0xff] %v3680_v12  ;;  %v3702_v12 = vpop.permute.xlu1 %991 }
 0xb7e   :  { %v3682_v16 = vpop.permute.xlu0 %1469 }
 0xb7f   :  { %5265 = vst [vmem:[#allocation100_spill] sm:$0xff] %v3682_v16 }
 0xb8f   :  { %v1490_v1 = vpop.permute.xlu0 %1489 }
 0xb90   :  { %v1494_v3 = vmul.f32 %v1490_v1, %v3093_v57  ;;  %v1492_v24 = vmul.f32 %v1490_v1, %v3129_v42  ;;  %v1496_v10 = vmul.f32 %v1490_v1, %v3108_v15  ;;  %v1493_v59 = vmul.f32 %v1490_v1, %v3136_v49 }
 0xb91   :  { %v1495_v16 = vmul.f32 %v1490_v1, %v3143_v54 }
 0xb92   :  { %1508 = vrot.lane.b32.xlu0 %v1494_v3, %s2929_s1  ;;  %1504 = vrot.lane.b32.xlu1 %v1492_v24, %s2929_s1  ;;  %v1497_v3 = vmul.f32 %v1490_v1, %v3150_v62  ;;  %v2933_v24 = vmov 33  }
 0xb96   :  { %1512 = vrot.lane.b32.xlu0 %v1496_v10, %s2929_s1  ;;  %1506 = vrot.lane.b32.xlu1 %v1493_v59, %s2929_s1  ;;  %v3709_v59 = vpop.permute.xlu1 %995 }
 0xb9a   :  { %1532 = vperm.xlu0 %2861, %v3597_v33   ;;  %1510 = vrot.lane.b32.xlu1 %v1495_v16, %s2929_s1  ;;  %v3713_v16 = vpop.permute.xlu1 %1028 }
 0xb9b   :  { %5271 = vst [vmem:[#allocation106_spill] sm:$0xff] %v3713_v16 }
 0xb9e   :  { %1514 = vrot.lane.b32.xlu1 %v1497_v3, %s2929_s1  ;;  %2862 = vset.pattern.permute.xlu0 %v2933_v24  ;;  %v3721_v24 = vpop.permute.xlu1 %1030 }
 0xb9f   :  { %5272 = vst [vmem:[#allocation107_spill] sm:$0xff] %v3721_v24 }
 0xc04   :  { %v3705_v50 = vpop.permute.xlu0 %1508 }
 0xc05   :  { %5269 = vst [vmem:[#allocation104_spill] sm:$0xff] %v3705_v50 }
 0xc08   :  { %v3707_v10 = vpop.permute.xlu0 %1512 }
 0xc09   :  { %5270 = vst [vmem:[#allocation105_spill] sm:$0xff] %v3707_v10 }
 0xc19   :  { %v1533_v7 = vpop.permute.xlu0 %1532 }
 0xc1a   :  { %v1537_v52 = vmul.f32 %v1533_v7, %v3025_v29  ;;  %v1535_v60 = vmul.f32 %v1533_v7, %v3011_v21  ;;  %v1539_v1 = vmul.f32 %v1533_v7, %v3042_v36  ;;  %v1536_v3 = vmul.f32 %v1533_v7, %v3008_v20 }
 0xc1b   :  { %v1538_v29 = vmul.f32 %v1533_v7, %v3022_v28  ;;  %v1540_v21 = vmul.f32 %v1533_v7, %v3039_v35  ;;  %v2935_v36 = vmov 34  }
 0xc1c   :  { %1551 = vrot.lane.b32.xlu0 %v1537_v52, %s2934_s11  ;;  %1547 = vrot.lane.b32.xlu1 %v1535_v60, %s2934_s11  ;;  %v3727_v52 = vpop.permute.xlu1 %1034 }
 0xc1d   :  { %5273 = vst [vmem:[#allocation108_spill] sm:$0xff] %v3727_v52 }
 0xc20   :  { %1555 = vrot.lane.b32.xlu0 %v1539_v1, %s2934_s11  ;;  %1549 = vrot.lane.b32.xlu1 %v1536_v3, %s2934_s11  ;;  %v3734_v1 = vpop.permute.xlu1 %1038 }
 0xc21   :  { %5276 = vst [vmem:[#allocation111_spill] sm:$0xff] %v3734_v1 }
 0xc24   :  { %1576 = vperm.xlu0 %2862, %v3597_v33   ;;  %1553 = vrot.lane.b32.xlu1 %v1538_v29, %s2934_s11  ;;  %v3738_v29 = vpop.permute.xlu1 %1072 }
 0xc25   :  { %5277 = vst [vmem:[#allocation112_spill] sm:$0xff] %v3738_v29 }
 0xc28   :  { %1557 = vrot.lane.b32.xlu1 %v1540_v21, %s2934_s11  ;;  %2863 = vset.pattern.permute.xlu0 %v2935_v36  ;;  %v3746_v21 = vpop.permute.xlu1 %1074 }
 0xc29   :  { %5278 = vst [vmem:[#allocation113_spill] sm:$0xff] %v3746_v21 }
 0xc2c   :  { %v3752_v36 = vpop.permute.xlu1 %1078 }
 0xc2d   :  { %5279 = vst [vmem:[#allocation114_spill] sm:$0xff] %v3752_v36 }
 0xc8e   :  { %v3730_v20 = vpop.permute.xlu0 %1551 }
 0xc8f   :  { %5274 = vst [vmem:[#allocation109_spill] sm:$0xff] %v3730_v20 }
 0xc92   :  { %v3732_v60 = vpop.permute.xlu0 %1555 }
 0xc93   :  { %5275 = vst [vmem:[#allocation110_spill] sm:$0xff] %v3732_v60 }
 0xca3   :  { %v1577_v3 = vpop.permute.xlu0 %1576 }
 0xca4   :  { %v1581_v28 = vmul.f32 %v1577_v3, %v3050_v38  ;;  %v1579_v10 = vmul.f32 %v1577_v3, %v3047_v37  ;;  %v1583_v35 = vmul.f32 %v1577_v3, %v3065_v46  ;;  %v1580_v7 = vmul.f32 %v1577_v3, %v3062_v45 }
 0xca5   :  { %v1582_v38 = vmul.f32 %v1577_v3, %v3075_v51  ;;  %v1584_v37 = vmul.f32 %v1577_v3, %v3085_v55  ;;  %v2936_v46 = vmov 35   ;;  %v5129_v45 = vmov 0  }
 0xca6   :  { %1595 = vrot.lane.b32.xlu0 %v1581_v28, %s2934_s11  ;;  %1591 = vrot.lane.b32.xlu1 %v1579_v10, %s2934_s11  ;;  %v3756_v10 = vpop.permute.xlu1 %1082 }
 0xca7   :  { %2866 = vset.pattern.permute.xlu1 %v5129_v45  ;;  %5280 = vst [vmem:[#allocation115_spill] sm:$0xff] %v3756_v10 }
 0xcaa   :  { %1599 = vrot.lane.b32.xlu0 %v1583_v35, %s2934_s11  ;;  %1593 = vrot.lane.b32.xlu1 %v1580_v7, %s2934_s11  ;;  %v3758_v28 = vpop.permute.xlu1 %1115 }
 0xcab   :  { %5281 = vst [vmem:[#allocation116_spill] sm:$0xff] %v3758_v28 }
 0xcae   :  { %1619 = vperm.xlu0 %2863, %v3597_v33   ;;  %1597 = vrot.lane.b32.xlu1 %v1582_v38, %s2934_s11  ;;  %v3760_v51 = vpop.permute.xlu1 %1117 }
 0xcaf   :  { %5282 = vst [vmem:[#allocation117_spill] sm:$0xff] %v3760_v51 }
 0xcb2   :  { %1601 = vrot.lane.b32.xlu1 %v1584_v37, %s2934_s11  ;;  %2864 = vset.pattern.permute.xlu0 %v2936_v46  ;;  %v3762_v35 = vpop.permute.xlu1 %1121 }
 0xcb3   :  { %5283 = vst [vmem:[#allocation118_spill] sm:$0xff] %v3762_v35 }
 0xcb6   :  { %v3764_v7 = vpop.permute.xlu1 %1125 }
 0xcb7   :  { %5284 = vst [vmem:[#allocation119_spill] sm:$0xff] %v3764_v7 }
 0xcba   :  { %v3768_v3 = vpop.permute.xlu1 %1158 }
 0xcbb   :  { %5286 = vst [vmem:[#allocation121_spill] sm:$0xff] %v3768_v3 }
 0xcbe   :  { %v3772_v37 = vpop.permute.xlu1 %1160 }
 0xcbf   :  { %5288 = vst [vmem:[#allocation123_spill] sm:$0xff] %v3772_v37 }
 0xcc2   :  { %v3776_v20 = vpop.permute.xlu1 %1164 }
 0xcc3   :  { %5289 = vst [vmem:[#allocation124_spill] sm:$0xff] %v3776_v20 }
 0xd18   :  { %v3766_v55 = vpop.permute.xlu0 %1595 }
 0xd19   :  { %5285 = vst [vmem:[#allocation120_spill] sm:$0xff] %v3766_v55 }
 0xd1c   :  { %v3770_v38 = vpop.permute.xlu0 %1599 }
 0xd1d   :  { %5287 = vst [vmem:[#allocation122_spill] sm:$0xff] %v3770_v38  ;;  %v3784_v38 = vpop.permute.xlu1 %1168 }
 0xd1e   :  { %5290 = vst [vmem:[#allocation125_spill] sm:$0xff] %v3784_v38 }
 0xd2d   :  { %v1620_v46 = vpop.permute.xlu0 %1619 }
 0xd2e   :  { %v1624_v45 = vmul.f32 %v1620_v46, %v3070_v47  ;;  %v1622_v60 = vmul.f32 %v1620_v46, %v3098_v61  ;;  %v1626_v50 = vmul.f32 %v1620_v46, %v3088_v56  ;;  %v1623_v55 = vmul.f32 %v1620_v46, %v3105_v13  ;;  %v3789_v61 = vpop.permute.xlu1 %1201 }
 0xd2f   :  { %v1625_v47 = vmul.f32 %v1620_v46, %v3115_v27  ;;  %5291 = vst [vmem:[#allocation126_spill] sm:$0xff] %v3789_v61 }
 0xd30   :  { %1638 = vrot.lane.b32.xlu0 %v1624_v45, %s2934_s11  ;;  %1634 = vrot.lane.b32.xlu1 %v1622_v60, %s2934_s11  ;;  %v1627_v60 = vmul.f32 %v1620_v46, %v3122_v34  ;;  %v5292_v45 = vmov 0  }
 0xd32   :  { %v3795_v56 = vpop.permute.xlu1 %1203 }
 0xd33   :  { %5293 = vst [vmem:[#allocation127_spill] sm:$0xff] %v3795_v56 }
 0xd34   :  { %1642 = vrot.lane.b32.xlu0 %v1626_v50, %s2934_s11  ;;  %1636 = vrot.lane.b32.xlu1 %v1623_v55, %s2934_s11 }
 0xd36   :  { %v3797_v13 = vpop.permute.xlu1 %1207 }
 0xd37   :  { %5294 = vst [vmem:[#allocation128_spill] sm:$0xff] %v3797_v13 }
 0xd38   :  { %1662 = vperm.xlu0 %2864, %v3597_v33   ;;  %1640 = vrot.lane.b32.xlu1 %v1625_v47, %s2934_s11 }
 0xd3a   :  { %v3799_v50 = vpop.permute.xlu1 %1211 }
 0xd3b   :  { %5295 = vst [vmem:[#allocation129_spill] sm:$0xff] %v3799_v50 }
 0xd3c   :  { %2865 = vset.pattern.permute.xlu0 %v5292_v45  ;;  %1644 = vrot.lane.b32.xlu1 %v1627_v60, %s2934_s11 }
 0xd3d   :  { %50 = vperm.xlu0 %2865, %v3597_v33  }
 0xd3e   :  { %v3801_v27 = vpop.permute.xlu1 %1245 }
 0xd3f   :  { %5296 = vst [vmem:[#allocation130_spill] sm:$0xff] %v3801_v27 }
 0xd42   :  { %v3803_v55 = vpop.permute.xlu1 %1247 }
 0xd43   :  { %5297 = vst [vmem:[#allocation131_spill] sm:$0xff] %v3803_v55 }
 0xd46   :  { %v3805_v47 = vpop.permute.xlu1 %1251 }
 0xd47   :  { %5298 = vst [vmem:[#allocation132_spill] sm:$0xff] %v3805_v47 }
 0xd4a   :  { %v3807_v61 = vpop.permute.xlu1 %1255 }
 0xd4b   :  { %5299 = vst [vmem:[#allocation133_spill] sm:$0xff] %v3807_v61 }
 0xd4e   :  { %v3809_v34 = vpop.permute.xlu1 %1288 }
 0xd4f   :  { %5300 = vst [vmem:[#allocation134_spill] sm:$0xff] %v3809_v34 }
 0xd52   :  { %v3811_v46 = vpop.permute.xlu1 %1290 }
 0xd53   :  { %5301 = vst [vmem:[#allocation135_spill] sm:$0xff] %v3811_v46 }
 0xd56   :  { %v3813_v60 = vpop.permute.xlu1 %1294 }
 0xd57   :  { %5302 = vst [vmem:[#allocation136_spill] sm:$0xff] %v3813_v60 }
 0xd5a   :  { %v3815_v33 = vpop.permute.xlu1 %1298 }
 0xd5b   :  { %5303 = vst [vmem:[#allocation137_spill] sm:$0xff] %v3815_v33 }
 0xd5e   :  { %v3817_v45 = vpop.permute.xlu1 %1331 }
 0xd5f   :  { %5304 = vst [vmem:[#allocation138_spill] sm:$0xff] %v3817_v45 }
 0xd62   :  { %v3819_v13 = vpop.permute.xlu1 %1333 }
 0xd63   :  { %5305 = vst [vmem:[#allocation139_spill] sm:$0xff] %v3819_v13 }
 0xd66   :  { %v3821_v50 = vpop.permute.xlu1 %1337 }
 0xd67   :  { %5306 = vst [vmem:[#allocation140_spill] sm:$0xff] %v3821_v50  ;;  %v2781_v50 = vld [vmem:[%s5028_s0 + $0x2] ss:$4 sm:$0x1f] }
 0xd68   :  { %v127_v45 = vrot.slane %v2781_v50, %v3029_v31 }
 0xd6a   :  { %v3823_v27 = vpop.permute.xlu1 %1341 }
 0xd6b   :  { %5307 = vst [vmem:[#allocation141_spill] sm:$0xff] %v3823_v27  ;;  %v123_v27 = vrot.slane %v2781_v50, %v3015_v23 }
 0xd6e   :  { %v3825_v55 = vpop.permute.xlu1 %1374 }
 0xd6f   :  { %5308 = vst [vmem:[#allocation142_spill] sm:$0xff] %v3825_v55  ;;  %v3845_v55 = vld [vmem:[%s5028_s0 + $0x3] ss:$4 sm:$0x1f] }
 0xd70   :  { %v153_v13 = vrot.slane %v3845_v55, %v3001_v17  ;;  %v157_v56 = vrot.slane %v3845_v55, %v3003_v18  ;;  %v165_v38 = vrot.slane %v3845_v55, %v3015_v23  ;;  %v169_v20 = vrot.slane %v3845_v55, %v3029_v31 }
 0xd72   :  { %v3827_v47 = vpop.permute.xlu1 %1376 }
 0xd73   :  { %5309 = vst [vmem:[#allocation143_spill] sm:$0xff] %v3827_v47 }
 0xd76   :  { %v3829_v61 = vpop.permute.xlu1 %1380 }
 0xd77   :  { %5310 = vst [vmem:[#allocation144_spill] sm:$0xff] %v3829_v61  ;;  %v2780_v61 = vld [vmem:[%s5028_s0 + $0x1] ss:$4 sm:$0x1f] }
 0xd78   :  { %v73_v3 = vrot.slane %v2780_v61, %v3003_v18  ;;  %v77_v37 = vrot.slane %v2780_v61, %v3013_v22  ;;  %v81_v7 = vrot.slane %v2780_v61, %v3015_v23  ;;  %v85_v35 = vrot.slane %v2780_v61, %v3029_v31 }
 0xd7a   :  { %v3831_v34 = vpop.permute.xlu1 %1384 }
 0xd7b   :  { %5311 = vst [vmem:[#allocation145_spill] sm:$0xff] %v3831_v34 }
 0xd7e   :  { %v3833_v46 = vpop.permute.xlu1 %1418 }
 0xd7f   :  { %5312 = vst [vmem:[#allocation146_spill] sm:$0xff] %v3833_v46  ;;  %v111_v46 = vrot.slane %v2781_v50, %v3001_v17 }
 0xd81   :  { %v137_v51 = vmul.f32 %v2996_v14, %v111_v46 }
 0xd82   :  { %v3837_v33 = vpop.permute.xlu1 %1420 }
 0xd83   :  { %5314 = vst [vmem:[#allocation148_spill] sm:$0xff] %v3837_v33  ;;  %v119_v33 = vrot.slane %v2781_v50, %v3013_v22 }
 0xd85   :  { %v139_v16 = vmul.f32 %v2996_v14, %v119_v33  ;;  %v98_v33 = vmul.f32 %v3027_v30, %v81_v7 }
 0xd86   :  { %v3855_v47 = vpop.permute.xlu1 %1424 }
 0xd87   :  { %5316 = vst [vmem:[#allocation150_spill] sm:$0xff] %v3855_v47  ;;  %v69_v47 = vrot.slane %v2780_v61, %v3001_v17  ;;  %v140_v61 = vmul.f32 %v2996_v14, %v123_v27  ;;  %v99_v27 = vmul.f32 %v3027_v30, %v85_v35 }
 0xd89   :  { %v95_v46 = vmul.f32 %v3027_v30, %v69_v47  ;;  %v183_v47 = vmul.f32 %v3005_v19, %v169_v20  ;;  %v3926_v20 = vld [vmem:[%s5030_s3] sm:$0xff] }
 0xd8a   :  { %v3887_v24 = vpop.permute.xlu1 %1428 }
 0xda2   :  { %v3835_v60 = vpop.permute.xlu0 %1638 }
 0xda3   :  { %5313 = vst [vmem:[#allocation147_spill] sm:$0xff] %v3835_v60  ;;  %v115_v60 = vrot.slane %v2781_v50, %v3003_v18  ;;  %v20_v50 = vld [vmem:[%s5028_s0] ss:$4 sm:$0x1f] }
 0xda4   :  { %v26_v29 = vrot.slane %v20_v50, %v3001_v17  ;;  %v30_v21 = vrot.slane %v20_v50, %v3003_v18  ;;  %v34_v1 = vrot.slane %v20_v50, %v3013_v22  ;;  %v38_v52 = vrot.slane %v20_v50, %v3015_v23 }
 0xda5   :  { %v138_v10 = vmul.f32 %v2996_v14, %v115_v60  ;;  %v96_v60 = vmul.f32 %v3027_v30, %v73_v3  ;;  %v3902_v3 = vpop.permute.xlu1 %1461 }
 0xda6   :  { %v3850_v34 = vpop.permute.xlu0 %1642 }
 0xda7   :  { %5315 = vst [vmem:[#allocation149_spill] sm:$0xff] %v3850_v34  ;;  %v161_v34 = vrot.slane %v3845_v55, %v3013_v22  ;;  %v97_v22 = vmul.f32 %v3027_v30, %v77_v37 }
 0xdb7   :  { %v1663_v28 = vpop.permute.xlu0 %1662 }
 0xdb8   :  { %v1667_v55 = vmul.f32 %v1663_v28, %v3093_v57  ;;  %v1665_v36 = vmul.f32 %v1663_v28, %v3129_v42  ;;  %v42_v57 = vrot.slane %v20_v50, %v3029_v31  ;;  %v141_v42 = vmul.f32 %v2996_v14, %v127_v45 }
 0xdb9   :  { %v1669_v17 = vmul.f32 %v1663_v28, %v3108_v15  ;;  %v179_v14 = vmul.f32 %v3005_v19, %v153_v13  ;;  %v180_v45 = vmul.f32 %v3005_v19, %v157_v56  ;;  %v1668_v7 = vmul.f32 %v1663_v28, %v3143_v54 }
 0xdba   :  { %1681 = vrot.lane.b32.xlu0 %v1667_v55, %s2934_s11  ;;  %1677 = vrot.lane.b32.xlu1 %v1665_v36, %s2934_s11  ;;  %v1666_v55 = vmul.f32 %v1663_v28, %v3136_v49  ;;  %v251_v54 = vsel %vm249_vm0, %v3310_v48, %v3196_v25 }
 0xdbc   :  { %v51_v23 = vpop.permute.xlu0 %50 }
 0xdbd   :  { %v53_v36 = vmul.f32 %v51_v23, %v26_v29  ;;  %v54_v18 = vmul.f32 %v51_v23, %v30_v21  ;;  %v55_v50 = vmul.f32 %v51_v23, %v34_v1  ;;  %v56_v31 = vmul.f32 %v51_v23, %v38_v52  ;;  %v1704_v52 = vld [vmem:[%s5029_s2] sm:$0x3f] }
 0xdbe   :  { %v57_v37 = vmul.f32 %v51_v23, %v42_v57  ;;  %1685 = vrot.lane.b32.xlu0 %v1669_v17, %s2934_s11  ;;  %1679 = vrot.lane.b32.xlu1 %v1666_v55, %s2934_s11  ;;  %v181_v1 = vmul.f32 %v3005_v19, %v161_v34  ;;  %v182_v29 = vmul.f32 %v3005_v19, %v165_v38 }
 0xdbf   :  { %v100_v30 = vadd.f32 %v95_v46, %v53_v36  ;;  %v101_v15 = vadd.f32 %v96_v60, %v54_v18  ;;  %v102_v35 = vadd.f32 %v97_v22, %v55_v50  ;;  %v103_v49 = vadd.f32 %v98_v33, %v56_v31 }
 0xdc0   :  { %v104_v21 = vadd.f32 %v99_v27, %v57_v37  ;;  %v250_v38 = vsel %vm249_vm0, %v3192_v32, %v3310_v48  ;;  %v1670_v19 = vmul.f32 %v1663_v28, %v3150_v62  ;;  %v253_v32 = vsel %vm249_vm0, %v3316_v0, %v3200_v53 }
 0xdc1   :  { %v142_v23 = vadd.f32 %v137_v51, %v100_v30  ;;  %v143_v56 = vadd.f32 %v138_v10, %v101_v15  ;;  %v144_v17 = vadd.f32 %v139_v16, %v102_v35  ;;  %v145_v13 = vadd.f32 %v140_v61, %v103_v49  ;;  %v3920_v16 = vpop.permute.xlu1 %1463 }
 0xdc2   :  { %v146_v18 = vadd.f32 %v141_v42, %v104_v21  ;;  %1707 = vperm.xlu0 %2865, %v1704_v52   ;;  %1683 = vrot.lane.b32.xlu1 %v1668_v7, %s2934_s11  ;;  %v252_v51 = vsel %vm249_vm0, %v3196_v25, %v3316_v0  ;;  %v254_v48 = vsel %vm249_vm0, %v3200_v53, %v3324_v4  ;;  %v5317_v42 = vmov 2   ;;  %v5323_v21 = vld [vmem:[#allocation9_spill] sm:$0xff]  ;;  %v5324_v7 = vld [vmem:[#allocation35_spill] sm:$0xff] }
 0xdc3   :  { %v184_v22 = vadd.f32 %v179_v14, %v142_v23  ;;  %v185_v31 = vadd.f32 %v180_v45, %v143_v56  ;;  %v186_v57 = vadd.f32 %v181_v1, %v144_v17  ;;  %v187_v46 = vadd.f32 %v182_v29, %v145_v13  ;;  %v5321_v1 = vld [vmem:[#allocation8_spill] sm:$0xff] }
 0xdc4   :  { %v188_v10 = vadd.f32 %v183_v47, %v146_v18  ;;  %v326_v25 = vsel %vm249_vm0, %v3328_v5, %v3336_v2  ;;  %v327_v53 = vsel %vm249_vm0, %v3336_v2, %v3202_v58  ;;  %v328_v4 = vsel %vm249_vm0, %v3202_v58, %v3342_v11  ;;  %v5325_v47 = vld [vmem:[#allocation37_spill] sm:$0xff]  ;;  %v5326_v18 = vld [vmem:[#allocation36_spill] sm:$0xff] }
 0xdc5   :  { %v260_v34 = vadd.f32 %v250_v38, %v184_v22  ;;  %v261_v61 = vadd.f32 %v251_v54, %v185_v31  ;;  %v262_v62 = vadd.f32 %v252_v51, %v186_v57  ;;  %v263_v28 = vadd.f32 %v253_v32, %v187_v46  ;;  %v3955_v27 = vpop.permute.xlu1 %1467  ;;  %v5328_v38 = vld [vmem:[#allocation10_spill] sm:$0xff]  ;;  %v5330_v51 = vld [vmem:[#allocation11_spill] sm:$0xff] }
 0xdc6   :  { %1687 = vrot.lane.b32.xlu1 %v1670_v19, %s2934_s11  ;;  %2868 = vset.pattern.permute.xlu0 %v5317_v42  ;;  %v264_v60 = vadd.f32 %v254_v48, %v188_v10  ;;  %v329_v33 = vsel %vm249_vm0, %v3342_v11, %v3204_v40  ;;  %v330_v5 = vsel %vm249_vm0, %v3204_v40, %v3350_v6  ;;  %v5318_v14 = vmov 5   ;;  %v5329_v10 = vld [vmem:[#allocation38_spill] sm:$0xff]  ;;  %v5331_v48 = vld [vmem:[#allocation41_spill] sm:$0xff]  ;;  %v5332_v42 = vld [vmem:[#allocation43_spill] sm:$0xff] }
 0xdc7   :  { %1820 = vperm.xlu0 %2868, %v3926_v20   ;;  %v336_v0 = vadd.f32 %v326_v25, %v260_v34  ;;  %v337_v55 = vadd.f32 %v327_v53, %v261_v61  ;;  %v338_v36 = vadd.f32 %v328_v4, %v262_v62  ;;  %v339_v50 = vadd.f32 %v329_v33, %v263_v28  ;;  %v5333_v25 = vld [vmem:[#allocation42_spill] sm:$0xff]  ;;  %v5335_v33 = vld [vmem:[#allocation12_spill] sm:$0xff] }
 0xdc8   :  { %v402_v2 = vsel %vm249_vm0, %v3354_v26, %v3362_v43  ;;  %v340_v58 = vadd.f32 %v330_v5, %v264_v60  ;;  %v403_v6 = vsel %vm249_vm0, %v3362_v43, %v3206_v41  ;;  %v404_v40 = vsel %vm249_vm0, %v3206_v41, %v3368_v9 }
 0xdc9   :  { %v412_v45 = vadd.f32 %v402_v2, %v336_v0  ;;  %v405_v11 = vsel %vm249_vm0, %v3368_v9, %v3208_v44  ;;  %v406_v26 = vsel %vm249_vm0, %v3208_v44, %v3376_v39  ;;  %v413_v37 = vadd.f32 %v403_v6, %v337_v55  ;;  %v3980_v41 = vpop.permute.xlu1 %1471  ;;  %v5322_v39 = vld [vmem:[#allocation32_spill] sm:$0xff] }
 0xdca   :  { %1750 = vperm.xlu1 %2866, %v3926_v20   ;;  %v414_v30 = vadd.f32 %v404_v40, %v338_v36  ;;  %v415_v15 = vadd.f32 %v405_v11, %v339_v50  ;;  %v5319_v35 = vmov 1   ;;  %v478_v43 = vsel %vm249_vm0, %v3380_v63, %v3388_v8  ;;  %v5336_v55 = vld [vmem:[#allocation44_spill] sm:$0xff]  ;;  %v5337_v50 = vld [vmem:[#allocation13_spill] sm:$0xff] }
 0xdcb   :  { %2871 = vset.pattern.permute.xlu0 %v5318_v14  ;;  %v416_v49 = vadd.f32 %v406_v26, %v340_v58  ;;  %v488_v9 = vadd.f32 %v478_v43, %v412_v45  ;;  %v5320_v52 = vmov 7   ;;  %v479_v44 = vsel %vm249_vm0, %v3388_v8, %v5321_v1  ;;  %v5338_v58 = vld [vmem:[#allocation47_spill] sm:$0xff]  ;;  %v5339_v26 = vld [vmem:[#allocation49_spill] sm:$0xff]  ;;  %v5341_v43 = vld [vmem:[#allocation14_spill] sm:$0xff] }
 0xdcc   :  { %1925 = vperm.xlu0 %2871, %v3926_v20   ;;  %v480_v29 = vsel %vm249_vm0, %v5321_v1, %v5322_v39  ;;  %v481_v63 = vsel %vm249_vm0, %v5322_v39, %v5323_v21  ;;  %v482_v23 = vsel %vm249_vm0, %v5323_v21, %v5324_v7  ;;  %v489_v56 = vadd.f32 %v479_v44, %v413_v37  ;;  %v5340_v37 = vld [vmem:[#allocation48_spill] sm:$0xff]  ;;  %v5343_v1 = vld [vmem:[#allocation15_spill] sm:$0xff] }
 0xdcd   :  { %v490_v17 = vadd.f32 %v480_v29, %v414_v30  ;;  %v491_v13 = vadd.f32 %v481_v63, %v415_v15  ;;  %v522_v22 = vsel %vm521_vm1, %v5326_v18, %v5325_v47  ;;  %v492_v8 = vadd.f32 %v482_v23, %v416_v49  ;;  %v3999_v57 = vpop.permute.xlu1 %1504  ;;  %v5345_v29 = vld [vmem:[#allocation53_spill] sm:$0xff] }
 0xdce   :  { %2867 = vset.pattern.permute.xlu1 %v5319_v35  ;;  %v5327_v31 = vmov 3   ;;  %v532_v46 = vadd.f32 %v522_v22, %v488_v9  ;;  %v523_v54 = vsel %vm521_vm1, %v5325_v47, %v5328_v38  ;;  %v524_v19 = vsel %vm521_vm1, %v5328_v38, %v5329_v10  ;;  %v5342_v9 = vld [vmem:[#allocation50_spill] sm:$0xff] }
 0xdcf   :  { %1785 = vperm.xlu1 %2867, %v3926_v20   ;;  %v525_v32 = vsel %vm521_vm1, %v5329_v10, %v5330_v51  ;;  %v526_v34 = vsel %vm521_vm1, %v5330_v51, %v5331_v48  ;;  %v533_v61 = vadd.f32 %v523_v54, %v489_v56  ;;  %v534_v62 = vadd.f32 %v524_v19, %v490_v17  ;;  %v5346_v56 = vld [vmem:[#allocation55_spill] sm:$0xff]  ;;  %v5347_v17 = vld [vmem:[#allocation54_spill] sm:$0xff]  ;;  %v5350_v54 = vld [vmem:[#allocation17_spill] sm:$0xff] }
 0xdd0   :  { %2873 = vset.pattern.permute.xlu0 %v5320_v52  ;;  %v535_v28 = vadd.f32 %v525_v32, %v491_v13  ;;  %v565_v60 = vsel %vm521_vm1, %v5333_v25, %v5332_v42  ;;  %v536_v0 = vadd.f32 %v526_v34, %v492_v8  ;;  %v5334_v4 = vmov 4   ;;  %v5348_v8 = vld [vmem:[#allocation16_spill] sm:$0xff]  ;;  %v5351_v19 = vld [vmem:[#allocation59_spill] sm:$0xff] }
 0xdd1   :  { %v575_v53 = vadd.f32 %v565_v60, %v532_v46  ;;  %v566_v5 = vsel %vm521_vm1, %v5332_v42, %v5335_v33  ;;  %v567_v36 = vsel %vm521_vm1, %v5335_v33, %v5336_v55  ;;  %v568_v2 = vsel %vm521_vm1, %v5336_v55, %v5337_v50  ;;  %v4031_v45 = vpop.permute.xlu1 %1506  ;;  %v5349_v46 = vld [vmem:[#allocation56_spill] sm:$0xff] }
 0xdd2   :  { %v569_v14 = vsel %vm521_vm1, %v5337_v50, %v5338_v58  ;;  %v576_v6 = vadd.f32 %v566_v5, %v533_v61  ;;  %v577_v40 = vadd.f32 %v567_v36, %v534_v62  ;;  %v578_v11 = vadd.f32 %v568_v2, %v535_v28  ;;  %v5353_v62 = vld [vmem:[#allocation61_spill] sm:$0xff]  ;;  %v5354_v28 = vld [vmem:[#allocation60_spill] sm:$0xff]  ;;  %v5357_v5 = vld [vmem:[#allocation19_spill] sm:$0xff] }
 0xdd3   :  { %2869 = vset.pattern.permute.xlu1 %v5327_v31  ;;  %v608_v30 = vsel %vm521_vm1, %v5340_v37, %v5339_v26  ;;  %v579_v15 = vadd.f32 %v569_v14, %v536_v0  ;;  %v609_v49 = vsel %vm521_vm1, %v5339_v26, %v5341_v43  ;;  %v610_v52 = vsel %vm521_vm1, %v5341_v43, %v5342_v9  ;;  %v5355_v0 = vld [vmem:[#allocation18_spill] sm:$0xff]  ;;  %v5358_v36 = vld [vmem:[#allocation65_spill] sm:$0xff]  ;;  %v5362_v43 = vld [vmem:[#allocation68_spill] sm:$0xff] }
 0xdd4   :  { %1855 = vperm.xlu1 %2869, %v3926_v20   ;;  %v618_v35 = vadd.f32 %v608_v30, %v575_v53  ;;  %v611_v44 = vsel %vm521_vm1, %v5342_v9, %v5343_v1  ;;  %v5344_v39 = vmov 6   ;;  %v612_v21 = vsel %vm521_vm1, %v5343_v1, %v5345_v29  ;;  %v5363_v9 = vld [vmem:[#allocation21_spill] sm:$0xff]  ;;  %v5364_v1 = vld [vmem:[#allocation71_spill] sm:$0xff] }
 0xdd5   :  { %v619_v63 = vadd.f32 %v609_v49, %v576_v6  ;;  %v620_v7 = vadd.f32 %v610_v52, %v577_v40  ;;  %v621_v23 = vadd.f32 %v611_v44, %v578_v11  ;;  %v651_v13 = vsel %vm521_vm1, %v5347_v17, %v5346_v56  ;;  %v4053_v18 = vpop.permute.xlu1 %1510  ;;  %v5359_v40 = vld [vmem:[#allocation67_spill] sm:$0xff]  ;;  %v5360_v11 = vld [vmem:[#allocation66_spill] sm:$0xff] }
 0xdd6   :  { %v622_v47 = vadd.f32 %v612_v21, %v579_v15  ;;  %v661_v22 = vadd.f32 %v651_v13, %v618_v35  ;;  %v652_v31 = vsel %vm521_vm1, %v5346_v56, %v5348_v8  ;;  %v653_v38 = vsel %vm521_vm1, %v5348_v8, %v5349_v46  ;;  %v5361_v15 = vld [vmem:[#allocation20_spill] sm:$0xff]  ;;  %v5368_v8 = vld [vmem:[#allocation74_spill] sm:$0xff] }
 0xdd7   :  { %v654_v10 = vsel %vm521_vm1, %v5349_v46, %v5350_v54  ;;  %v655_v51 = vsel %vm521_vm1, %v5350_v54, %v5351_v19  ;;  %v662_v32 = vadd.f32 %v652_v31, %v619_v63  ;;  %v663_v48 = vadd.f32 %v653_v38, %v620_v7  ;;  %v5365_v7 = vld [vmem:[#allocation73_spill] sm:$0xff]  ;;  %v5369_v46 = vld [vmem:[#allocation23_spill] sm:$0xff] }
 0xdd8   :  { %2870 = vset.pattern.permute.xlu1 %v5334_v4  ;;  %v664_v34 = vadd.f32 %v654_v10, %v621_v23  ;;  %v5352_v61 = vmov 8   ;;  %v695_v42 = vsel %vm694_vm2, %v5354_v28, %v5353_v62  ;;  %v665_v25 = vadd.f32 %v655_v51, %v622_v47  ;;  %v5356_v4 = vld [vmem:[#allocation62_spill] sm:$0xff]  ;;  %v5366_v23 = vld [vmem:[#allocation72_spill] sm:$0xff]  ;;  %v5370_v54 = vld [vmem:[#allocation77_spill] sm:$0xff] }
 0xdd9   :  { %1890 = vperm.xlu1 %2870, %v3926_v20   ;;  %v705_v60 = vadd.f32 %v695_v42, %v661_v22  ;;  %v696_v53 = vsel %vm694_vm2, %v5353_v62, %v5355_v0  ;;  %v697_v33 = vsel %vm694_vm2, %v5355_v0, %v5356_v4  ;;  %v698_v55 = vsel %vm694_vm2, %v5356_v4, %v5357_v5  ;;  %v4083_v2 = vpop.permute.xlu1 %1514  ;;  %v5367_v47 = vld [vmem:[#allocation22_spill] sm:$0xff]  ;;  %v5374_v0 = vld [vmem:[#allocation80_spill] sm:$0xff]  ;;  %v5375_v4 = vld [vmem:[#allocation25_spill] sm:$0xff] }
 0xdda   :  { %v699_v50 = vsel %vm694_vm2, %v5357_v5, %v5358_v36  ;;  %v706_v58 = vadd.f32 %v696_v53, %v662_v32  ;;  %v707_v14 = vadd.f32 %v697_v33, %v663_v48  ;;  %v708_v6 = vadd.f32 %v698_v55, %v664_v34  ;;  %v5371_v48 = vld [vmem:[#allocation79_spill] sm:$0xff]  ;;  %v5372_v34 = vld [vmem:[#allocation78_spill] sm:$0xff] }
 0xddb   :  { %v738_v26 = vsel %vm694_vm2, %v5360_v11, %v5359_v40  ;;  %v709_v37 = vadd.f32 %v699_v50, %v665_v25  ;;  %v739_v35 = vsel %vm694_vm2, %v5359_v40, %v5361_v15  ;;  %v740_v49 = vsel %vm694_vm2, %v5361_v15, %v5362_v43  ;;  %v5373_v25 = vld [vmem:[#allocation24_spill] sm:$0xff]  ;;  %v5376_v5 = vld [vmem:[#allocation83_spill] sm:$0xff]  ;;  %v5380_v15 = vld [vmem:[#allocation86_spill] sm:$0xff] }
 0xddc   :  { %v748_v30 = vadd.f32 %v738_v26, %v705_v60  ;;  %v741_v52 = vsel %vm694_vm2, %v5362_v43, %v5363_v9  ;;  %v742_v44 = vsel %vm694_vm2, %v5363_v9, %v5364_v1  ;;  %v749_v29 = vadd.f32 %v739_v35, %v706_v58  ;;  %v5381_v43 = vld [vmem:[#allocation27_spill] sm:$0xff]  ;;  %v5382_v9 = vld [vmem:[#allocation89_spill] sm:$0xff] }
 0xddd   :  { %2872 = vset.pattern.permute.xlu1 %v5344_v39  ;;  %v4100_v39 = vpop.permute.xlu1 %1547  ;;  %v750_v21 = vadd.f32 %v740_v49, %v707_v14  ;;  %v751_v63 = vadd.f32 %v741_v52, %v708_v6  ;;  %v781_v56 = vsel %vm694_vm2, %v5366_v23, %v5365_v7  ;;  %v752_v17 = vadd.f32 %v742_v44, %v709_v37  ;;  %v5377_v14 = vld [vmem:[#allocation85_spill] sm:$0xff]  ;;  %v5378_v6 = vld [vmem:[#allocation84_spill] sm:$0xff]  ;;  %v5379_v37 = vld [vmem:[#allocation26_spill] sm:$0xff] }
 0xdde   :  { %1966 = vperm.xlu1 %2872, %v3926_v20   ;;  %v791_v13 = vadd.f32 %v781_v56, %v748_v30  ;;  %v782_v22 = vsel %vm694_vm2, %v5365_v7, %v5367_v47  ;;  %v783_v31 = vsel %vm694_vm2, %v5367_v47, %v5368_v8  ;;  %v784_v38 = vsel %vm694_vm2, %v5368_v8, %v5369_v46  ;;  %v5384_v7 = vld [vmem:[#allocation90_spill] sm:$0xff] }
 0xddf   :  { %v785_v10 = vsel %vm694_vm2, %v5369_v46, %v5370_v54  ;;  %v792_v19 = vadd.f32 %v782_v22, %v749_v29  ;;  %v793_v51 = vadd.f32 %v783_v31, %v750_v21  ;;  %v794_v32 = vadd.f32 %v784_v38, %v751_v63  ;;  %v5383_v63 = vld [vmem:[#allocation91_spill] sm:$0xff]  ;;  %v5386_v22 = vld [vmem:[#allocation92_spill] sm:$0xff]  ;;  %v5387_v31 = vld [vmem:[#allocation29_spill] sm:$0xff] }
 0xde0   :  { %v795_v62 = vadd.f32 %v785_v10, %v752_v17  ;;  %v825_v60 = vsel %vm694_vm2, %v5371_v48, %v5373_v25  ;;  %v826_v53 = vsel %vm694_vm2, %v5373_v25, %v5374_v0  ;;  %v827_v33 = vsel %vm694_vm2, %v5374_v0, %v5375_v4  ;;  %v5388_v38 = vld [vmem:[#allocation95_spill] sm:$0xff]  ;;  %v5391_v25 = vld [vmem:[#allocation30_spill] sm:$0xff] }
 0xde1   :  { %v4120_v28 = vpop.permute.xlu1 %1549  ;;  %v828_v55 = vsel %vm694_vm2, %v5375_v4, %v5376_v5  ;;  %v835_v36 = vadd.f32 %v825_v60, %v792_v19  ;;  %v836_v50 = vadd.f32 %v826_v53, %v793_v51  ;;  %v837_v58 = vadd.f32 %v827_v33, %v794_v32  ;;  %v5389_v32 = vld [vmem:[#allocation97_spill] sm:$0xff]  ;;  %v5392_v0 = vld [vmem:[#allocation98_spill] sm:$0xff]  ;;  %v5393_v4 = vld [vmem:[#allocation31_spill] sm:$0xff] }
 0xde2   :  { %2874 = vset.pattern.permute.xlu1 %v5352_v61  ;;  %v824_v61 = vsel %vm694_vm2, %v5372_v34, %v5371_v48  ;;  %v868_v40 = vsel %vm867_vm3, %v5378_v6, %v5377_v14  ;;  %v838_v11 = vadd.f32 %v828_v55, %v795_v62  ;;  %v869_v30 = vsel %vm867_vm3, %v5377_v14, %v5379_v37  ;;  %v5390_v48 = vld [vmem:[#allocation96_spill] sm:$0xff]  ;;  %v5394_v5 = vld [vmem:[#allocation101_spill] sm:$0xff]  ;;  %v5395_v14 = vld [vmem:[#allocation103_spill] sm:$0xff] }
 0xde3   :  { %v834_v42 = vadd.f32 %v824_v61, %v791_v13  ;;  %v870_v35 = vsel %vm867_vm3, %v5379_v37, %v5380_v15  ;;  %v871_v49 = vsel %vm867_vm3, %v5380_v15, %v5381_v43  ;;  %v872_v52 = vsel %vm867_vm3, %v5381_v43, %v5382_v9  ;;  %v5385_v13 = vld [vmem:[#allocation28_spill] sm:$0xff]  ;;  %v5396_v6 = vld [vmem:[#allocation102_spill] sm:$0xff] }
 0xde4   :  { %v879_v44 = vadd.f32 %v869_v30, %v835_v36  ;;  %v880_v29 = vadd.f32 %v870_v35, %v836_v50  ;;  %v881_v21 = vadd.f32 %v871_v49, %v837_v58  ;;  %v911_v23 = vsel %vm867_vm3, %v5384_v7, %v5383_v63  ;;  %v5397_v30 = vld [vmem:[#allocation33_spill] sm:$0xff]  ;;  %v5398_v43 = vld [vmem:[#allocation34_spill] sm:$0xff] }
 0xde5   :  { %v878_v26 = vadd.f32 %v868_v40, %v834_v42  ;;  %v4149_v1 = vpop.permute.xlu1 %1553  ;;  %v882_v56 = vadd.f32 %v872_v52, %v838_v11  ;;  %v912_v47 = vsel %vm867_vm3, %v5383_v63, %v5385_v13  ;;  %v913_v8 = vsel %vm867_vm3, %v5385_v13, %v5386_v22  ;;  %v5400_v63 = vld [vmem:[#allocation106_spill] sm:$0xff] }
 0xde6   :  { %v914_v46 = vsel %vm867_vm3, %v5386_v22, %v5387_v31  ;;  %v915_v54 = vsel %vm867_vm3, %v5387_v31, %v5388_v38  ;;  %v922_v10 = vadd.f32 %v912_v47, %v879_v44  ;;  %v923_v19 = vadd.f32 %v913_v8, %v880_v29  ;;  %v5402_v47 = vld [vmem:[#allocation108_spill] sm:$0xff]  ;;  %v5404_v8 = vld [vmem:[#allocation111_spill] sm:$0xff] }
 0xde7   :  { %v921_v17 = vadd.f32 %v911_v23, %v878_v26  ;;  %v924_v51 = vadd.f32 %v914_v46, %v881_v21  ;;  %v954_v34 = vsel %vm867_vm3, %v5390_v48, %v5389_v32  ;;  %v925_v61 = vadd.f32 %v915_v54, %v882_v56  ;;  %v5399_v21 = vld [vmem:[#allocation107_spill] sm:$0xff]  ;;  %v5403_v22 = vld [vmem:[#allocation40_spill] sm:$0xff] }
 0xde8   :  { %v955_v60 = vsel %vm867_vm3, %v5389_v32, %v5391_v25  ;;  %v956_v53 = vsel %vm867_vm3, %v5391_v25, %v5392_v0  ;;  %v957_v33 = vsel %vm867_vm3, %v5392_v0, %v5393_v4  ;;  %v958_v55 = vsel %vm867_vm3, %v5393_v4, %v5394_v5  ;;  %v5408_v25 = vld [vmem:[#allocation114_spill] sm:$0xff]  ;;  %v5410_v4 = vld [vmem:[#allocation115_spill] sm:$0xff] }
 0xde9   :  { %v4169_v62 = vpop.permute.xlu1 %1557  ;;  %v964_v42 = vadd.f32 %v954_v34, %v921_v17  ;;  %v965_v36 = vadd.f32 %v955_v60, %v922_v10  ;;  %v966_v50 = vadd.f32 %v956_v53, %v923_v19  ;;  %v967_v58 = vadd.f32 %v957_v33, %v924_v51  ;;  %v5401_v17 = vld [vmem:[#allocation39_spill] sm:$0xff]  ;;  %v5405_v19 = vld [vmem:[#allocation113_spill] sm:$0xff]  ;;  %v5406_v51 = vld [vmem:[#allocation112_spill] sm:$0xff] }
 0xdea   :  { %v997_v40 = vsel %vm867_vm3, %v5396_v6, %v5395_v14  ;;  %v968_v11 = vadd.f32 %v958_v55, %v925_v61  ;;  %v998_v15 = vsel %vm867_vm3, %v5395_v14, %v5397_v30  ;;  %v999_v35 = vsel %vm867_vm3, %v5397_v30, %v3702_v12  ;;  %v5407_v61 = vld [vmem:[#allocation45_spill] sm:$0xff]  ;;  %v5409_v0 = vld [vmem:[#allocation46_spill] sm:$0xff] }
 0xdeb   :  { %v1007_v37 = vadd.f32 %v997_v40, %v964_v42  ;;  %v1000_v49 = vsel %vm867_vm3, %v3702_v12, %v5398_v43  ;;  %v1001_v9 = vsel %vm867_vm3, %v5398_v43, %v3709_v59  ;;  %v1008_v52 = vadd.f32 %v998_v15, %v965_v36  ;;  %v5414_v15 = vld [vmem:[#allocation118_spill] sm:$0xff]  ;;  %v5415_v43 = vld [vmem:[#allocation52_spill] sm:$0xff] }
 0xdec   :  { %v1009_v44 = vadd.f32 %v999_v35, %v966_v50  ;;  %v1010_v29 = vadd.f32 %v1000_v49, %v967_v58  ;;  %v1041_v7 = vsel %vm1040_vm4, %v5400_v63, %v5399_v21  ;;  %v1011_v23 = vadd.f32 %v1001_v9, %v968_v11  ;;  %v5411_v50 = vld [vmem:[#allocation117_spill] sm:$0xff]  ;;  %v5412_v58 = vld [vmem:[#allocation116_spill] sm:$0xff]  ;;  %v5416_v9 = vld [vmem:[#allocation119_spill] sm:$0xff] }
 0xded   :  { %v4186_v26 = vpop.permute.xlu1 %1591  ;;  %v1051_v56 = vadd.f32 %v1041_v7, %v1007_v37  ;;  %v1042_v13 = vsel %vm1040_vm4, %v5399_v21, %v5401_v17  ;;  %v1043_v12 = vsel %vm1040_vm4, %v5401_v17, %v5402_v47  ;;  %v1044_v59 = vsel %vm1040_vm4, %v5402_v47, %v5403_v22  ;;  %v5413_v37 = vld [vmem:[#allocation51_spill] sm:$0xff]  ;;  %v5418_v7 = vld [vmem:[#allocation121_spill] sm:$0xff] }
 0xdee   :  { %v1045_v31 = vsel %vm1040_vm4, %v5403_v22, %v5404_v8  ;;  %v1052_v38 = vadd.f32 %v1042_v13, %v1008_v52  ;;  %v1053_v54 = vadd.f32 %v1043_v12, %v1009_v44  ;;  %v1054_v10 = vadd.f32 %v1044_v59, %v1010_v29  ;;  %v5417_v63 = vld [vmem:[#allocation123_spill] sm:$0xff]  ;;  %v5419_v13 = vld [vmem:[#allocation57_spill] sm:$0xff]  ;;  %v5420_v12 = vld [vmem:[#allocation124_spill] sm:$0xff] }
 0xdef   :  { %v1084_v32 = vsel %vm1040_vm4, %v5406_v51, %v5405_v19  ;;  %v1055_v48 = vadd.f32 %v1045_v31, %v1011_v23  ;;  %v1085_v42 = vsel %vm1040_vm4, %v5405_v19, %v5407_v61  ;;  %v1086_v60 = vsel %vm1040_vm4, %v5407_v61, %v5408_v25  ;;  %v5421_v59 = vld [vmem:[#allocation58_spill] sm:$0xff]  ;;  %v5422_v31 = vld [vmem:[#allocation125_spill] sm:$0xff] }
 0xdf0   :  { %v1094_v34 = vadd.f32 %v1084_v32, %v1051_v56  ;;  %v1087_v53 = vsel %vm1040_vm4, %v5408_v25, %v5409_v0  ;;  %v1088_v33 = vsel %vm1040_vm4, %v5409_v0, %v5410_v4  ;;  %v1095_v5 = vadd.f32 %v1085_v42, %v1052_v38  ;;  %v5423_v32 = vld [vmem:[#allocation127_spill] sm:$0xff]  ;;  %v5426_v0 = vld [vmem:[#allocation128_spill] sm:$0xff] }
 0xdf1   :  { %v4215_v46 = vpop.permute.xlu1 %1593  ;;  %v1096_v55 = vadd.f32 %v1086_v60, %v1053_v54  ;;  %v1097_v36 = vadd.f32 %v1087_v53, %v1054_v10  ;;  %v1127_v14 = vsel %vm1040_vm4, %v5412_v58, %v5411_v50  ;;  %v1098_v6 = vadd.f32 %v1088_v33, %v1055_v48  ;;  %v5424_v48 = vld [vmem:[#allocation126_spill] sm:$0xff]  ;;  %v5425_v25 = vld [vmem:[#allocation63_spill] sm:$0xff]  ;;  %v5427_v4 = vld [vmem:[#allocation64_spill] sm:$0xff] }
 0xdf2   :  { %v1137_v11 = vadd.f32 %v1127_v14, %v1094_v34  ;;  %v1128_v30 = vsel %vm1040_vm4, %v5411_v50, %v5413_v37  ;;  %v1129_v35 = vsel %vm1040_vm4, %v5413_v37, %v5414_v15  ;;  %v1130_v49 = vsel %vm1040_vm4, %v5414_v15, %v5415_v43 }
 0xdf3   :  { %v1131_v52 = vsel %vm1040_vm4, %v5415_v43, %v5416_v9  ;;  %v1138_v44 = vadd.f32 %v1128_v30, %v1095_v5  ;;  %v1139_v29 = vadd.f32 %v1129_v35, %v1096_v55  ;;  %v1140_v21 = vadd.f32 %v1130_v49, %v1097_v36  ;;  %v5428_v5 = vld [vmem:[#allocation129_spill] sm:$0xff]  ;;  %v5432_v49 = vld [vmem:[#allocation132_spill] sm:$0xff] }
 0xdf4   :  { %v1170_v23 = vsel %vm1040_vm4, %v5418_v7, %v5417_v63  ;;  %v1141_v56 = vadd.f32 %v1131_v52, %v1098_v6  ;;  %v1171_v47 = vsel %vm1040_vm4, %v5417_v63, %v5419_v13  ;;  %v1172_v22 = vsel %vm1040_vm4, %v5419_v13, %v5420_v12  ;;  %v5429_v6 = vld [vmem:[#allocation131_spill] sm:$0xff]  ;;  %v5431_v35 = vld [vmem:[#allocation69_spill] sm:$0xff]  ;;  %v5433_v52 = vld [vmem:[#allocation70_spill] sm:$0xff] }
 0xdf5   :  { %v4235_v40 = vpop.permute.xlu1 %1597  ;;  %v1180_v17 = vadd.f32 %v1170_v23, %v1137_v11  ;;  %v1173_v8 = vsel %vm1040_vm4, %v5420_v12, %v5421_v59  ;;  %v1174_v38 = vsel %vm1040_vm4, %v5421_v59, %v5422_v31  ;;  %v1181_v10 = vadd.f32 %v1171_v47, %v1138_v44  ;;  %v5430_v11 = vld [vmem:[#allocation130_spill] sm:$0xff]  ;;  %v5437_v59 = vld [vmem:[#allocation75_spill] sm:$0xff]  ;;  %v5438_v31 = vld [vmem:[#allocation136_spill] sm:$0xff] }
 0xdf6   :  { %v1182_v19 = vadd.f32 %v1172_v22, %v1139_v29  ;;  %v1183_v51 = vadd.f32 %v1173_v8, %v1140_v21  ;;  %v1214_v34 = vsel %vm1213_vm5, %v5424_v48, %v5423_v32  ;;  %v1184_v61 = vadd.f32 %v1174_v38, %v1141_v56  ;;  %v5434_v29 = vld [vmem:[#allocation133_spill] sm:$0xff]  ;;  %v5435_v56 = vld [vmem:[#allocation135_spill] sm:$0xff] }
 0xdf7   :  { %v1224_v42 = vadd.f32 %v1214_v34, %v1180_v17  ;;  %v1215_v60 = vsel %vm1213_vm5, %v5423_v32, %v5425_v25  ;;  %v1216_v53 = vsel %vm1213_vm5, %v5425_v25, %v5426_v0  ;;  %v1217_v33 = vsel %vm1213_vm5, %v5426_v0, %v5427_v4  ;;  %v5436_v17 = vld [vmem:[#allocation134_spill] sm:$0xff] }
 0xdf8   :  { %v1218_v55 = vsel %vm1213_vm5, %v5427_v4, %v5428_v5  ;;  %v1225_v50 = vadd.f32 %v1215_v60, %v1181_v10  ;;  %v1226_v58 = vadd.f32 %v1216_v53, %v1182_v19  ;;  %v1227_v14 = vadd.f32 %v1217_v33, %v1183_v51  ;;  %v5439_v10 = vld [vmem:[#allocation76_spill] sm:$0xff]  ;;  %v5440_v51 = vld [vmem:[#allocation137_spill] sm:$0xff]  ;;  %v5442_v25 = vld [vmem:[#allocation138_spill] sm:$0xff] }
 0xdf9   :  { %v4264_v54 = vpop.permute.xlu1 %1601  ;;  %v1257_v37 = vsel %vm1213_vm5, %v5430_v11, %v5429_v6  ;;  %v1228_v30 = vadd.f32 %v1218_v55, %v1184_v61  ;;  %v1258_v43 = vsel %vm1213_vm5, %v5429_v6, %v5431_v35  ;;  %v1259_v9 = vsel %vm1213_vm5, %v5431_v35, %v5432_v49  ;;  %v5443_v4 = vld [vmem:[#allocation81_spill] sm:$0xff]  ;;  %v5444_v5 = vld [vmem:[#allocation140_spill] sm:$0xff]  ;;  %v5447_v35 = vld [vmem:[#allocation143_spill] sm:$0xff] }
 0xdfa   :  { %v1267_v15 = vadd.f32 %v1257_v37, %v1224_v42  ;;  %v1260_v44 = vsel %vm1213_vm5, %v5432_v49, %v5433_v52  ;;  %v1261_v21 = vsel %vm1213_vm5, %v5433_v52, %v5434_v29  ;;  %v1268_v63 = vadd.f32 %v1258_v43, %v1225_v50  ;;  %v5441_v42 = vld [vmem:[#allocation139_spill] sm:$0xff]  ;;  %v5445_v50 = vld [vmem:[#allocation82_spill] sm:$0xff] }
 0xdfb   :  { %v1269_v7 = vadd.f32 %v1259_v9, %v1226_v58  ;;  %v1270_v23 = vadd.f32 %v1260_v44, %v1227_v14  ;;  %v1300_v13 = vsel %vm1213_vm5, %v5436_v17, %v5435_v56  ;;  %v1271_v47 = vadd.f32 %v1261_v21, %v1228_v30  ;;  %v5446_v14 = vld [vmem:[#allocation141_spill] sm:$0xff]  ;;  %v5448_v43 = vld [vmem:[#allocation142_spill] sm:$0xff]  ;;  %v5449_v44 = vld [vmem:[#allocation87_spill] sm:$0xff] }
 0xdfc   :  { %v1310_v22 = vadd.f32 %v1300_v13, %v1267_v15  ;;  %v1301_v8 = vsel %vm1213_vm5, %v5435_v56, %v5437_v59  ;;  %v1302_v38 = vsel %vm1213_vm5, %v5437_v59, %v5438_v31  ;;  %v1303_v19 = vsel %vm1213_vm5, %v5438_v31, %v5439_v10  ;;  %v5450_v21 = vld [vmem:[#allocation144_spill] sm:$0xff]  ;;  %v5452_v56 = vld [vmem:[#allocation145_spill] sm:$0xff] }
 0xdfd   :  { %v4281_v36 = vpop.permute.xlu1 %1634  ;;  %v1304_v32 = vsel %vm1213_vm5, %v5439_v10, %v5440_v51  ;;  %v1311_v48 = vadd.f32 %v1301_v8, %v1268_v63  ;;  %v1312_v34 = vadd.f32 %v1302_v38, %v1269_v7  ;;  %v1313_v61 = vadd.f32 %v1303_v19, %v1270_v23  ;;  %v5451_v7 = vld [vmem:[#allocation88_spill] sm:$0xff]  ;;  %v5454_v8 = vld [vmem:[#allocation146_spill] sm:$0xff]  ;;  %v5455_v51 = vld [vmem:[#allocation93_spill] sm:$0xff] }
 0xdfe   :  { %v1343_v60 = vsel %vm1213_vm5, %v5442_v25, %v5441_v42  ;;  %v1314_v0 = vadd.f32 %v1304_v32, %v1271_v47  ;;  %v1344_v33 = vsel %vm1213_vm5, %v5441_v42, %v5443_v4  ;;  %v1345_v55 = vsel %vm1213_vm5, %v5443_v4, %v5444_v5  ;;  %v5453_v59 = vld [vmem:[#allocation148_spill] sm:$0xff] }
 0xdff   :  { %v1353_v53 = vadd.f32 %v1343_v60, %v1310_v22  ;;  %v1346_v58 = vsel %vm1213_vm5, %v5444_v5, %v5445_v50  ;;  %v1347_v6 = vsel %vm1213_vm5, %v5445_v50, %v5446_v14  ;;  %v1354_v37 = vadd.f32 %v1344_v33, %v1311_v48  ;;  %v5456_v48 = vld [vmem:[#allocation150_spill] sm:$0xff]  ;;  %v5458_v50 = vld [vmem:[#allocation99_spill] sm:$0xff] }
 0xe00   :  { %v1355_v30 = vadd.f32 %v1345_v55, %v1312_v34  ;;  %v1356_v15 = vadd.f32 %v1346_v58, %v1313_v61  ;;  %v1387_v49 = vsel %vm1386_vm6, %v5448_v43, %v5447_v35  ;;  %v1357_v9 = vadd.f32 %v1347_v6, %v1314_v0  ;;  %v5457_v61 = vld [vmem:[#allocation94_spill] sm:$0xff]  ;;  %v5459_v6 = vld [vmem:[#allocation100_spill] sm:$0xff] }
 0xe01   :  { %v4301_v12 = vpop.permute.xlu1 %1636  ;;  %v1397_v52 = vadd.f32 %v1387_v49, %v1353_v53  ;;  %v1388_v29 = vsel %vm1386_vm6, %v5447_v35, %v5449_v44  ;;  %v1389_v63 = vsel %vm1386_vm6, %v5449_v44, %v5450_v21  ;;  %v1390_v23 = vsel %vm1386_vm6, %v5450_v21, %v5451_v7 }
 0xe02   :  { %v1391_v17 = vsel %vm1386_vm6, %v5451_v7, %v5452_v56  ;;  %v1398_v13 = vadd.f32 %v1388_v29, %v1354_v37  ;;  %v1399_v47 = vadd.f32 %v1389_v63, %v1355_v30  ;;  %v1400_v22 = vadd.f32 %v1390_v23, %v1356_v15  ;;  %v5462_v56 = vld [vmem:[#allocation109_spill] sm:$0xff] }
 0xe03   :  { %v1430_v31 = vsel %vm1386_vm6, %v5454_v8, %v5453_v59  ;;  %v1401_v38 = vadd.f32 %v1391_v17, %v1357_v9  ;;  %v1431_v32 = vsel %vm1386_vm6, %v5453_v59, %v5455_v51  ;;  %v1432_v34 = vsel %vm1386_vm6, %v5455_v51, %v5456_v48  ;;  %v5460_v9 = vld [vmem:[#allocation104_spill] sm:$0xff] }
 0xe04   :  { %v1440_v19 = vadd.f32 %v1430_v31, %v1397_v52  ;;  %v1433_v42 = vsel %vm1386_vm6, %v5456_v48, %v5457_v61  ;;  %v1434_v25 = vsel %vm1386_vm6, %v5457_v61, %v3887_v24  ;;  %v1441_v60 = vadd.f32 %v1431_v32, %v1398_v13  ;;  %v5463_v13 = vld [vmem:[#allocation110_spill] sm:$0xff]  ;;  %v5464_v51 = vld [vmem:[#allocation120_spill] sm:$0xff] }
 0xe05   :  { %v4330_v11 = vpop.permute.xlu1 %1640  ;;  %v1442_v0 = vadd.f32 %v1432_v34, %v1399_v47  ;;  %v1443_v53 = vadd.f32 %v1433_v42, %v1400_v22  ;;  %v1473_v4 = vsel %vm1386_vm6, %v3902_v3, %v3920_v16  ;;  %v1444_v33 = vadd.f32 %v1434_v25, %v1401_v38  ;;  %v5465_v48 = vld [vmem:[#allocation122_spill] sm:$0xff] }
 0xe06   :  { %v1483_v55 = vadd.f32 %v1473_v4, %v1440_v19  ;;  %v1474_v58 = vsel %vm1386_vm6, %v3920_v16, %v5458_v50  ;;  %v1475_v14 = vsel %vm1386_vm6, %v5458_v50, %v3955_v27  ;;  %v1476_v24 = vsel %vm1386_vm6, %v3955_v27, %v5459_v6  ;;  %v5467_v4 = vld [vmem:[#allocation149_spill] sm:$0xff] }
 0xe07   :  { %v1477_v37 = vsel %vm1386_vm6, %v5459_v6, %v3980_v41  ;;  %v1484_v3 = vadd.f32 %v1474_v58, %v1441_v60  ;;  %v1485_v30 = vadd.f32 %v1475_v14, %v1442_v0  ;;  %v1486_v15 = vadd.f32 %v1476_v24, %v1443_v53  ;;  %v5461_v41 = vld [vmem:[#allocation105_spill] sm:$0xff] }
 0xe08   :  { %v1516_v35 = vsel %vm1386_vm6, %v3999_v57, %v4031_v45  ;;  %v1487_v16 = vadd.f32 %v1477_v37, %v1444_v33  ;;  %v1517_v52 = vsel %vm1386_vm6, %v4031_v45, %v5460_v9  ;;  %v1518_v27 = vsel %vm1386_vm6, %v5460_v9, %v4053_v18 }
 0xe09   :  { %v1645_v10 = vpop.permute.xlu1 %1644  ;;  %v1526_v49 = vadd.f32 %v1516_v35, %v1483_v55  ;;  %v1519_v44 = vsel %vm1386_vm6, %v4053_v18, %v5461_v41  ;;  %v1520_v57 = vsel %vm1386_vm6, %v5461_v41, %v4083_v2  ;;  %v1527_v29 = vadd.f32 %v1517_v52, %v1484_v3 }
 0xe0a   :  { %v1528_v21 = vadd.f32 %v1518_v27, %v1485_v30  ;;  %v1529_v63 = vadd.f32 %v1519_v44, %v1486_v15  ;;  %v1560_v7 = vsel %vm1559_vm7, %v4100_v39, %v4120_v28  ;;  %v1530_v45 = vadd.f32 %v1520_v57, %v1487_v16 }
 0xe0b   :  { %v1570_v23 = vadd.f32 %v1560_v7, %v1526_v49  ;;  %v1561_v17 = vsel %vm1559_vm7, %v4120_v28, %v5462_v56  ;;  %v1562_v18 = vsel %vm1559_vm7, %v5462_v56, %v4149_v1  ;;  %v1563_v2 = vsel %vm1559_vm7, %v4149_v1, %v5463_v13 }
 0xe0c   :  { %v1564_v22 = vsel %vm1559_vm7, %v5463_v13, %v4169_v62  ;;  %v1571_v59 = vadd.f32 %v1561_v17, %v1527_v29  ;;  %v1572_v8 = vadd.f32 %v1562_v18, %v1528_v21  ;;  %v1573_v31 = vadd.f32 %v1563_v2, %v1529_v63  ;;  %v5468_v13 = vld [vmem:[#allocation4_spill] sm:$0xff] }
 0xe0d   :  { %v1603_v28 = vsel %vm1559_vm7, %v4186_v26, %v4215_v46  ;;  %v1574_v38 = vadd.f32 %v1564_v22, %v1530_v45  ;;  %v1604_v32 = vsel %vm1559_vm7, %v4215_v46, %v5464_v51  ;;  %v1605_v1 = vsel %vm1559_vm7, %v5464_v51, %v4235_v40  ;;  %v5466_v46 = vld [vmem:[#allocation147_spill] sm:$0xff] }
 0xe0e   :  { %v1613_v19 = vadd.f32 %v1603_v28, %v1570_v23  ;;  %v1606_v62 = vsel %vm1559_vm7, %v4235_v40, %v5465_v48  ;;  %v1607_v34 = vsel %vm1559_vm7, %v5465_v48, %v4264_v54  ;;  %v1614_v61 = vadd.f32 %v1604_v32, %v1571_v59 }
 0xe0f   :  { %v1615_v26 = vadd.f32 %v1605_v1, %v1572_v8  ;;  %v1616_v42 = vadd.f32 %v1606_v62, %v1573_v31  ;;  %v1646_v25 = vsel %vm1559_vm7, %v4281_v36, %v4301_v12  ;;  %v1647_v60 = vsel %vm1559_vm7, %v4301_v12, %v5466_v46  ;;  %v5470_v31 = vld [vmem:[#allocation6_spill] sm:$0xff]  ;;  %v5472_v1 = vld [vmem:[#allocation7_spill] sm:$0xff] }
 0xe10   :  { %v1617_v53 = vadd.f32 %v1607_v34, %v1574_v38  ;;  %v1648_v40 = vsel %vm1559_vm7, %v5466_v46, %v4330_v11  ;;  %v1649_v54 = vsel %vm1559_vm7, %v4330_v11, %v5467_v4  ;;  %v1650_v33 = vsel %vm1559_vm7, %v5467_v4, %v1645_v10  ;;  %v5471_v38 = vld [vmem:[#allocation5_spill] sm:$0xff] }
 0xe11   :  { %v1656_v50 = vadd.f32 %v1646_v25, %v1613_v19  ;;  %v1657_v6 = vadd.f32 %v1647_v60, %v1614_v61  ;;  %v1658_v24 = vadd.f32 %v1648_v40, %v1615_v26  ;;  %v1659_v37 = vadd.f32 %v1649_v54, %v1616_v42 }
 0xe12   :  { %v1660_v30 = vadd.f32 %v1650_v33, %v1617_v53  ;;  %v5473_v34 = vmov 14  }
 0xe2c   :  { %v1678_v5 = vpop.permute.xlu1 %1677  ;;  %v1682_v39 = vpop.permute.xlu0 %1681 }
 0xe30   :  { %v1680_v43 = vpop.permute.xlu1 %1679  ;;  %v1686_v55 = vpop.permute.xlu0 %1685 }
 0xe31   :  { %v1689_v36 = vsel %vm1559_vm7, %v1678_v5, %v1680_v43  ;;  %v1690_v58 = vsel %vm1559_vm7, %v1680_v43, %v1682_v39 }
 0xe32   :  { %v1699_v11 = vadd.f32 %v1689_v36, %v1656_v50  ;;  %v1700_v15 = vadd.f32 %v1690_v58, %v1657_v6  ;;  %v5474_v6 = vmov 9  }
 0xe34   :  { %v1684_v47 = vpop.permute.xlu1 %1683 }
 0xe35   :  { %v1691_v12 = vsel %vm1559_vm7, %v1682_v39, %v1684_v47  ;;  %v1692_v14 = vsel %vm1559_vm7, %v1684_v47, %v1686_v55  ;;  %v5469_v47 = vld [vmem:[#allocation3_spill] sm:$0xff] }
 0xe36   :  { %v1701_v35 = vadd.f32 %v1691_v12, %v1658_v24  ;;  %v1702_v10 = vadd.f32 %v1692_v14, %v1659_v37 }
 0xe38   :  { %v1688_v0 = vpop.permute.xlu1 %1687 }
 0xe39   :  { %v1693_v3 = vsel %vm1559_vm7, %v1686_v55, %v1688_v0 }
 0xe3a   :  { %v1703_v16 = vadd.f32 %v1693_v3, %v1660_v30 }
 0xe41   :  { %v1708_v49 = vpop.permute.xlu0 %1707 }
 0xe42   :  { %v1710_v9 = vadd.f32 %v1708_v49, %v1699_v11  ;;  %v1711_v5 = vadd.f32 %v1708_v49, %v1700_v15  ;;  %v1712_v52 = vadd.f32 %v1708_v49, %v1701_v35  ;;  %v1713_v43 = vadd.f32 %v1708_v49, %v1702_v10 }
 0xe43   :  { %v1714_v27 = vadd.f32 %v1708_v49, %v1703_v16 }
 0xe44   :  { %v1715_v41 = vmax.f32 %v1710_v9, 0.0  ;;  %v1716_v44 = vmax.f32 %v1711_v5, 0.0  ;;  %v1717_v57 = vmax.f32 %v1712_v52, 0.0  ;;  %v1718_v29 = vmax.f32 %v1713_v43, 0.0 }
 0xe45   :  { %v1719_v21 = vmax.f32 %v1714_v27, 0.0 }
 0xe46   :  { %1720 = vst [vmem:[#allocation2] sm:$0x3f] %v1715_v41  ;;  %1721 = vst [vmem:[#allocation2 + $0x8] sm:$0x3f] %v1716_v44  ;;  %v4476_v61 = vpop.permute.xlu0 %1820 }
 0xe47   :  { %1722 = vst [vmem:[#allocation2 + $0x10] sm:$0x3f] %v1717_v57  ;;  %1723 = vst [vmem:[#allocation2 + $0x18] sm:$0x3f] %v1718_v29 }
 0xe48   :  { %1724 = vst [vmem:[#allocation2 + $0x20] sm:$0x3f] %v1719_v21 }
 0xe49   :  { %v4441_v63 = vpop.permute.xlu1 %1750 }
 0xe4b   :  { %v4478_v26 = vpop.permute.xlu0 %1925 }
 0xe4e   :  { %v4443_v7 = vpop.permute.xlu1 %1785  ;;  %v1936_v23 = vld [vmem:[#allocation2] ss:$8 sm:$0xf]  ;;  %v2001_v25 = vld [vmem:[#allocation2 + $0x1] ss:$8 sm:$0xf] }
 0xe4f   :  { %v1937_v56 = vld [vmem:[#allocation2] ss:$8 sm:$0x10]  ;;  %v2002_v46 = vld [vmem:[#allocation2 + $0x1] ss:$8 sm:$0x10] }
 0xe50   :  { %v1938_v18 = vor.u32 %v1937_v56, %v1936_v23  ;;  %v2003_v60 = vor.u32 %v2002_v46, %v2001_v25  ;;  %v2066_v15 = vld [vmem:[#allocation2 + $0x2] ss:$8 sm:$0xf]  ;;  %v5475_v23 = vmov 10  }
 0xe51   :  { %v2067_v35 = vld [vmem:[#allocation2 + $0x2] ss:$8 sm:$0x10]  ;;  %v4550_v56 = vld [vmem:[#allocation2] ss:$8 sm:$0xf] }
 0xe52   :  { %v4450_v2 = vrot.slane %v1938_v18, %v5468_v13  ;;  %v4453_v22 = vrot.slane %v1938_v18, %v5469_v47  ;;  %v4460_v28 = vrot.slane %v1938_v18, %v5470_v31  ;;  %v4463_v19 = vrot.slane %v1938_v18, %v5471_v38 }
 0xe53   :  { %v4445_v45 = vpop.permute.xlu1 %1855  ;;  %v4470_v48 = vrot.slane %v1938_v18, %v5472_v1  ;;  %v4485_v53 = vrot.slane %v2003_v60, %v5471_v38  ;;  %v4488_v40 = vrot.slane %v2003_v60, %v5469_v47  ;;  %v4495_v55 = vrot.slane %v2003_v60, %v5472_v1  ;;  %v4552_v18 = vld [vmem:[#allocation2 + $0x1] ss:$8 sm:$0xf] }
 0xe54   :  { %v4498_v50 = vrot.slane %v2003_v60, %v5468_v13  ;;  %v4505_v12 = vrot.slane %v2003_v60, %v5470_v31  ;;  %v2068_v10 = vor.u32 %v2067_v35, %v2066_v15 }
 0xe56   :  { %v4524_v49 = vrot.slane %v2068_v10, %v5468_v13  ;;  %v4527_v9 = vrot.slane %v2068_v10, %v5469_v47  ;;  %v4534_v27 = vrot.slane %v2068_v10, %v5470_v31  ;;  %v4537_v41 = vrot.slane %v2068_v10, %v5471_v38 }
 0xe57   :  { %v4544_v29 = vrot.slane %v2068_v10, %v5472_v1 }
 0xe58   :  { %v4447_v17 = vpop.permute.xlu1 %1890 }
 0xe5d   :  { %v1967_v39 = vpop.permute.xlu1 %1966 }
 0xe5e   :  { %v1970_v59 = vmul.f32 %v1967_v39, %v4450_v2  ;;  %v1969_v8 = vmul.f32 %v1967_v39, %v4453_v22  ;;  %v1972_v51 = vmul.f32 %v1967_v39, %v4460_v28  ;;  %v1971_v32 = vmul.f32 %v1967_v39, %v4463_v19 }
 0xe5f   :  { %v1973_v62 = vmul.f32 %v1967_v39, %v4470_v48  ;;  %v1735_v39 = vrot.slane %v4550_v56, %v5468_v13 }
 0xe60   :  { %1981 = vrot.lane.b32.xlu0 %v1970_v59, %s2906_s22  ;;  %1979 = vrot.lane.b32.xlu1 %v1969_v8, %s2906_s22  ;;  %v1739_v59 = vrot.slane %v4550_v56, %v5471_v38  ;;  %v1771_v8 = vrot.slane %v4552_v18, %v5468_v13 }
 0xe64   :  { %1985 = vrot.lane.b32.xlu0 %v1972_v51, %s2906_s22  ;;  %1983 = vrot.lane.b32.xlu1 %v1971_v32, %s2906_s22  ;;  %v4562_v51 = vld [vmem:[#allocation2 + $0x2] ss:$8 sm:$0xf]  ;;  %v1754_v32 = vmul.f32 %v4441_v63, %v1735_v39 }
 0xe65   :  { %v1806_v46 = vrot.slane %v4562_v51, %v5468_v13  ;;  %v1810_v60 = vrot.slane %v4562_v51, %v5471_v38 }
 0xe67   :  { %v1825_v15 = vmul.f32 %v4476_v61, %v1810_v60 }
 0xe68   :  { %2031 = vperm.xlu0 %2873, %v3926_v20   ;;  %1987 = vrot.lane.b32.xlu1 %v1973_v62, %s2906_s22  ;;  %v1755_v62 = vmul.f32 %v4441_v63, %v1739_v59 }
 0xe6c   :  { %2880 = vset.pattern.permute.xlu0 %v5473_v34  ;;  %v1789_v34 = vmul.f32 %v4443_v7, %v1771_v8 }
 0xed2   :  { %v4480_v42 = vpop.permute.xlu0 %1981  ;;  %v4511_v24 = vpop.permute.xlu1 %1979 }
 0xed6   :  { %v4482_v0 = vpop.permute.xlu0 %1985  ;;  %v4513_v37 = vpop.permute.xlu1 %1983 }
 0xeda   :  { %v4515_v3 = vpop.permute.xlu1 %1987 }
 0xee7   :  { %v2032_v4 = vpop.permute.xlu0 %2031 }
 0xee8   :  { %v2036_v54 = vmul.f32 %v2032_v4, %v4485_v53  ;;  %v2034_v33 = vmul.f32 %v2032_v4, %v4488_v40  ;;  %v2038_v36 = vmul.f32 %v2032_v4, %v4495_v55  ;;  %v2035_v58 = vmul.f32 %v2032_v4, %v4498_v50 }
 0xee9   :  { %v2037_v14 = vmul.f32 %v2032_v4, %v4505_v12  ;;  %v4572_v4 = vld [vmem:[#allocation2 + $0x3] ss:$8 sm:$0xf] }
 0xeea   :  { %2048 = vrot.lane.b32.xlu0 %v2036_v54, %s2906_s22  ;;  %2044 = vrot.lane.b32.xlu1 %v2034_v33, %s2906_s22  ;;  %v1793_v54 = vadd.f32 %v1789_v34, %v1754_v32 }
 0xeee   :  { %2052 = vrot.lane.b32.xlu0 %v2038_v36, %s2906_s22  ;;  %2046 = vrot.lane.b32.xlu1 %v2035_v58, %s2906_s22  ;;  %v1841_v36 = vrot.slane %v4572_v4, %v5468_v13  ;;  %v1845_v58 = vrot.slane %v4572_v4, %v5471_v38 }
 0xef0   :  { %v1859_v35 = vmul.f32 %v4445_v45, %v1841_v36  ;;  %v1860_v10 = vmul.f32 %v4445_v45, %v1845_v58 }
 0xef2   :  { %2050 = vrot.lane.b32.xlu1 %v2037_v14, %s2906_s22  ;;  %v4578_v14 = vld [vmem:[#allocation2 + $0x4] ss:$8 sm:$0xf] }
 0xef6   :  { %2096 = vperm.xlu1 %2874, %v3926_v20  }
 0xefa   :  { %2875 = vset.pattern.permute.xlu1 %v5474_v6  ;;  %v1824_v6 = vmul.f32 %v4476_v61, %v1806_v46 }
 0xf5c   :  { %v4517_v30 = vpop.permute.xlu1 %2044 }
 0xf60   :  { %v4519_v11 = vpop.permute.xlu1 %2046 }
 0xf64   :  { %v4521_v16 = vpop.permute.xlu1 %2050 }
 0xf75   :  { %v2097_v5 = vpop.permute.xlu1 %2096 }
 0xf76   :  { %v2100_v52 = vmul.f32 %v2097_v5, %v4524_v49  ;;  %v2099_v43 = vmul.f32 %v2097_v5, %v4527_v9  ;;  %v2102_v44 = vmul.f32 %v2097_v5, %v4534_v27  ;;  %v2101_v57 = vmul.f32 %v2097_v5, %v4537_v41 }
 0xf77   :  { %v2103_v21 = vmul.f32 %v2097_v5, %v4544_v29  ;;  %v1876_v5 = vrot.slane %v4578_v14, %v5468_v13 }
 0xf78   :  { %2111 = vrot.lane.b32.xlu1 %v2100_v52, %s2906_s22  ;;  %2109 = vrot.lane.b32.xlu0 %v2099_v43, %s2906_s22  ;;  %v1880_v52 = vrot.slane %v4578_v14, %v5471_v38  ;;  %v1828_v43 = vadd.f32 %v1824_v6, %v1793_v54  ;;  %v1990_v54 = vsel %vm249_vm0, %v4480_v42, %v4513_v37 }
 0xf7a   :  { %v1895_v39 = vmul.f32 %v4447_v17, %v1880_v52  ;;  %v1863_v59 = vadd.f32 %v1859_v35, %v1828_v43 }
 0xf7c   :  { %2115 = vrot.lane.b32.xlu1 %v2102_v44, %s2906_s22  ;;  %2113 = vrot.lane.b32.xlu0 %v2101_v57, %s2906_s22  ;;  %v2049_v57 = vpop.permute.xlu0 %2048 }
 0xf7d   :  { %v2055_v35 = vsel %vm249_vm0, %v4519_v11, %v2049_v57 }
 0xf80   :  { %2161 = vperm.xlu1 %2875, %v3926_v20   ;;  %2117 = vrot.lane.b32.xlu0 %v2103_v21, %s2906_s22  ;;  %v1775_v20 = vrot.slane %v4552_v18, %v5471_v38  ;;  %v4588_v21 = vld [vmem:[#allocation2 + $0x5] ss:$8 sm:$0xf] }
 0xf81   :  { %v1915_v32 = vrot.slane %v4588_v21, %v5471_v38 }
 0xf82   :  { %v1790_v25 = vmul.f32 %v4443_v7, %v1775_v20  ;;  %v1911_v20 = vrot.slane %v4588_v21, %v5468_v13 }
 0xf83   :  { %v1930_v60 = vmul.f32 %v4478_v26, %v1915_v32  ;;  %v2131_v32 = vld [vmem:[#allocation2 + $0x3] ss:$8 sm:$0xf] }
 0xf84   :  { %2876 = vset.pattern.permute.xlu1 %v5475_v23  ;;  %v1794_v33 = vadd.f32 %v1790_v25, %v1755_v62  ;;  %v1894_v23 = vmul.f32 %v4447_v17, %v1876_v5  ;;  %v4596_v25 = vpop.permute.xlu0 %2052  ;;  %v1929_v46 = vmul.f32 %v4478_v26, %v1911_v20 }
 0xf86   :  { %v1829_v44 = vadd.f32 %v1825_v15, %v1794_v33  ;;  %v1898_v62 = vadd.f32 %v1894_v23, %v1863_v59  ;;  %v1991_v33 = vsel %vm249_vm0, %v4513_v37, %v4482_v0 }
 0xf88   :  { %v1864_v8 = vadd.f32 %v1860_v10, %v1829_v44  ;;  %v1933_v36 = vadd.f32 %v1929_v46, %v1898_v62  ;;  %v2056_v10 = vsel %vm249_vm0, %v2049_v57, %v4521_v16  ;;  %v2132_v62 = vld [vmem:[#allocation2 + $0x3] ss:$8 sm:$0x10] }
 0xf89   :  { %v2133_v57 = vor.u32 %v2132_v62, %v2131_v32  ;;  %v1802_v62 = vrot.slane %v4562_v51, %v5469_v47 }
 0xf8a   :  { %v1899_v34 = vadd.f32 %v1895_v39, %v1864_v8  ;;  %v1998_v5 = vadd.f32 %v1990_v54, %v1933_v36 }
 0xf8b   :  { %v4628_v46 = vrot.slane %v2133_v57, %v5469_v47  ;;  %v4635_v36 = vrot.slane %v2133_v57, %v5470_v31 }
 0xf8c   :  { %v1934_v58 = vadd.f32 %v1930_v60, %v1899_v34  ;;  %v2063_v43 = vadd.f32 %v2055_v35, %v1998_v5  ;;  %v4625_v34 = vrot.slane %v2133_v57, %v5468_v13  ;;  %v4645_v5 = vrot.slane %v2133_v57, %v5472_v1 }
 0xf8e   :  { %v1999_v52 = vadd.f32 %v1991_v33, %v1934_v58  ;;  %v4638_v58 = vrot.slane %v2133_v57, %v5471_v38  ;;  %v1743_v57 = vrot.slane %v4550_v56, %v5470_v31 }
 0xf90   :  { %v2064_v44 = vadd.f32 %v2056_v10, %v1999_v52 }
 0xfea   :  { %v4606_v6 = vpop.permute.xlu1 %2111  ;;  %v4608_v15 = vpop.permute.xlu0 %2109 }
 0xfee   :  { %v4614_v23 = vpop.permute.xlu1 %2115  ;;  %v2114_v39 = vpop.permute.xlu0 %2113 }
 0xfef   :  { %v2120_v37 = vsel %vm249_vm0, %v4606_v6, %v2114_v39  ;;  %v2121_v59 = vsel %vm249_vm0, %v2114_v39, %v4614_v23  ;;  %v1731_v39 = vrot.slane %v4550_v56, %v5469_v47  ;;  %v1814_v56 = vrot.slane %v4562_v51, %v5470_v31 }
 0xff0   :  { %v4620_v8 = vadd.f32 %v2120_v37, %v2063_v43  ;;  %v4622_v20 = vadd.f32 %v2121_v59, %v2064_v44  ;;  %v4651_v43 = vld [vmem:[%s5030_s3] sm:$0xff]  ;;  %v5476_v44 = vmov 11   ;;  %v1767_v37 = vrot.slane %v4552_v18, %v5469_v47 }
 0xff1   :  { %v1753_v59 = vmul.f32 %v4441_v63, %v1731_v39  ;;  %v1872_v39 = vrot.slane %v4578_v14, %v5469_v47 }
 0xff2   :  { %v1788_v32 = vmul.f32 %v4443_v7, %v1767_v37 }
 0xfff   :  { %v2162_v60 = vpop.permute.xlu1 %2161 }
0x1000   :  { %v2165_v54 = vmul.f32 %v2162_v60, %v4625_v34  ;;  %v2164_v33 = vmul.f32 %v2162_v60, %v4628_v46  ;;  %v2167_v35 = vmul.f32 %v2162_v60, %v4635_v36  ;;  %v2166_v10 = vmul.f32 %v2162_v60, %v4638_v58 }
0x1001   :  { %v2168_v52 = vmul.f32 %v2162_v60, %v4645_v5  ;;  %v1779_v60 = vrot.slane %v4552_v18, %v5470_v31  ;;  %v1893_v18 = vmul.f32 %v4447_v17, %v1872_v39  ;;  %v2119_v39 = vsel %vm249_vm0, %v4608_v15, %v4606_v6 }
0x1002   :  { %2176 = vrot.lane.b32.xlu1 %v2165_v54, %s2906_s22  ;;  %2174 = vrot.lane.b32.xlu0 %v2164_v33, %s2906_s22  ;;  %v1792_v54 = vadd.f32 %v1788_v32, %v1753_v59  ;;  %v1823_v33 = vmul.f32 %v4476_v61, %v1802_v62  ;;  %v1907_v62 = vrot.slane %v4588_v21, %v5469_v47 }
0x1004   :  { %v1827_v37 = vadd.f32 %v1823_v33, %v1792_v54  ;;  %v1884_v54 = vrot.slane %v4578_v14, %v5470_v31  ;;  %v1928_v51 = vmul.f32 %v4478_v26, %v1907_v62  ;;  %v2118_v14 = vpop.permute.xlu0 %2117 }
0x1006   :  { %2180 = vrot.lane.b32.xlu1 %v2167_v35, %s2906_s22  ;;  %2178 = vrot.lane.b32.xlu0 %v2166_v10, %s2906_s22  ;;  %v1837_v35 = vrot.slane %v4572_v4, %v5469_v47  ;;  %v1756_v10 = vmul.f32 %v4441_v63, %v1743_v57  ;;  %v1826_v63 = vmul.f32 %v4476_v61, %v1814_v56 }
0x1007   :  { %v2054_v61 = vsel %vm249_vm0, %v4517_v30, %v4519_v11  ;;  %v1992_v30 = vsel %vm249_vm0, %v4482_v0, %v4515_v3 }
0x100a   :  { %2226 = vperm.xlu1 %2876, %v4651_v43   ;;  %2182 = vrot.lane.b32.xlu0 %v2168_v52, %s2906_s22  ;;  %v1791_v52 = vmul.f32 %v4443_v7, %v1779_v60  ;;  %v1849_v7 = vrot.slane %v4572_v4, %v5470_v31 }
0x100c   :  { %v1795_v59 = vadd.f32 %v1791_v52, %v1756_v10  ;;  %v1861_v60 = vmul.f32 %v4445_v45, %v1849_v7  ;;  %v1896_v10 = vmul.f32 %v4447_v17, %v1884_v54 }
0x100e   :  { %2877 = vset.pattern.permute.xlu1 %v5476_v44  ;;  %v1858_v44 = vmul.f32 %v4445_v45, %v1837_v35  ;;  %v1830_v33 = vadd.f32 %v1826_v63, %v1795_v59  ;;  %v1989_v35 = vsel %vm249_vm0, %v4511_v24, %v4480_v42  ;;  %v1919_v45 = vrot.slane %v4588_v21, %v5470_v31 }
0x1010   :  { %v1862_v32 = vadd.f32 %v1858_v44, %v1827_v37  ;;  %v1865_v44 = vadd.f32 %v1861_v60, %v1830_v33  ;;  %v1931_v42 = vmul.f32 %v4478_v26, %v1919_v45  ;;  %v2122_v26 = vsel %vm249_vm0, %v4614_v23, %v2118_v14  ;;  %v2197_v33 = vld [vmem:[#allocation2 + $0x4] ss:$8 sm:$0x10] }
0x1012   :  { %v1897_v57 = vadd.f32 %v1893_v18, %v1862_v32  ;;  %v1900_v37 = vadd.f32 %v1896_v10, %v1865_v44  ;;  %v2057_v32 = vsel %vm249_vm0, %v4521_v16, %v4596_v25  ;;  %v2196_v25 = vld [vmem:[#allocation2 + $0x4] ss:$8 sm:$0xf] }
0x1014   :  { %v1932_v52 = vadd.f32 %v1928_v51, %v1897_v57  ;;  %v1935_v59 = vadd.f32 %v1931_v42, %v1900_v37  ;;  %v5477_v37 = vmov 12  }
0x1016   :  { %v1997_v4 = vadd.f32 %v1989_v35, %v1932_v52  ;;  %v2000_v6 = vadd.f32 %v1992_v30, %v1935_v59  ;;  %v2198_v35 = vor.u32 %v2197_v33, %v2196_v25 }
0x1018   :  { %v2062_v56 = vadd.f32 %v2054_v61, %v1997_v4  ;;  %v2065_v57 = vadd.f32 %v2057_v32, %v2000_v6  ;;  %v4716_v10 = vrot.slane %v2198_v35, %v5468_v13  ;;  %v4719_v23 = vrot.slane %v2198_v35, %v5469_v47 }
0x1019   :  { %v4729_v4 = vrot.slane %v2198_v35, %v5471_v38  ;;  %v4736_v14 = vrot.slane %v2198_v35, %v5472_v1 }
0x101a   :  { %v2127_v17 = vadd.f32 %v2119_v39, %v2062_v56  ;;  %v2130_v60 = vadd.f32 %v2122_v26, %v2065_v57 }
0x1074   :  { %v2177_v24 = vpop.permute.xlu1 %2176  ;;  %v2175_v18 = vpop.permute.xlu0 %2174 }
0x1075   :  { %v2184_v11 = vsel %vm249_vm0, %v2175_v18, %v2177_v24 }
0x1076   :  { %v2192_v21 = vadd.f32 %v2184_v11, %v2127_v17 }
0x1078   :  { %v2181_v15 = vpop.permute.xlu1 %2180  ;;  %v2179_v62 = vpop.permute.xlu0 %2178 }
0x1079   :  { %v2185_v63 = vsel %vm249_vm0, %v2177_v24, %v2179_v62  ;;  %v2186_v7 = vsel %vm249_vm0, %v2179_v62, %v2181_v15 }
0x107a   :  { %v2193_v0 = vadd.f32 %v2185_v63, %v4620_v8  ;;  %v2194_v3 = vadd.f32 %v2186_v7, %v4622_v20  ;;  %v4726_v20 = vrot.slane %v2198_v35, %v5470_v31  ;;  %v2261_v63 = vld [vmem:[#allocation2 + $0x5] ss:$8 sm:$0xf] }
0x107b   :  { %v2262_v7 = vld [vmem:[#allocation2 + $0x5] ss:$8 sm:$0x10] }
0x107c   :  { %v2183_v54 = vpop.permute.xlu0 %2182  ;;  %v2263_v57 = vor.u32 %v2262_v7, %v2261_v63 }
0x107d   :  { %v2187_v51 = vsel %vm249_vm0, %v2181_v15, %v2183_v54 }
0x107e   :  { %v2195_v16 = vadd.f32 %v2187_v51, %v2130_v60  ;;  %v4747_v60 = vrot.slane %v2263_v57, %v5468_v13 }
0x1089   :  { %v2227_v52 = vpop.permute.xlu1 %2226 }
0x108a   :  { %v2230_v61 = vmul.f32 %v2227_v52, %v4716_v10  ;;  %v2229_v8 = vmul.f32 %v2227_v52, %v4719_v23  ;;  %v2232_v44 = vmul.f32 %v2227_v52, %v4726_v20  ;;  %v2231_v45 = vmul.f32 %v2227_v52, %v4729_v4 }
0x108b   :  { %v2233_v39 = vmul.f32 %v2227_v52, %v4736_v14 }
0x108c   :  { %2241 = vrot.lane.b32.xlu1 %v2230_v61, %s2906_s22  ;;  %2239 = vrot.lane.b32.xlu0 %v2229_v8, %s2906_s22 }
0x1090   :  { %2245 = vrot.lane.b32.xlu1 %v2232_v44, %s2906_s22  ;;  %2243 = vrot.lane.b32.xlu0 %v2231_v45, %s2906_s22 }
0x1094   :  { %2291 = vperm.xlu1 %2877, %v4651_v43   ;;  %2247 = vrot.lane.b32.xlu0 %v2233_v39, %s2906_s22 }
0x1098   :  { %2878 = vset.pattern.permute.xlu1 %v5477_v37 }
0x10fe   :  { %v2242_v56 = vpop.permute.xlu1 %2241  ;;  %v2240_v42 = vpop.permute.xlu0 %2239 }
0x10ff   :  { %v2249_v17 = vsel %vm249_vm0, %v2240_v42, %v2242_v56 }
0x1100   :  { %v2257_v24 = vadd.f32 %v2249_v17, %v2192_v21  ;;  %v4750_v21 = vrot.slane %v2263_v57, %v5469_v47 }
0x1102   :  { %v2246_v18 = vpop.permute.xlu1 %2245  ;;  %v2244_v30 = vpop.permute.xlu0 %2243 }
0x1103   :  { %v2250_v11 = vsel %vm249_vm0, %v2242_v56, %v2244_v30  ;;  %v2251_v59 = vsel %vm249_vm0, %v2244_v30, %v2246_v18 }
0x1104   :  { %v2258_v32 = vadd.f32 %v2250_v11, %v2193_v0  ;;  %v2259_v6 = vadd.f32 %v2251_v59, %v2194_v3  ;;  %v4757_v0 = vrot.slane %v2263_v57, %v5470_v31  ;;  %v4760_v3 = vrot.slane %v2263_v57, %v5471_v38 }
0x1105   :  { %v5478_v31 = vmov 13  }
0x1106   :  { %v2248_v15 = vpop.permute.xlu0 %2247 }
0x1107   :  { %v2252_v62 = vsel %vm249_vm0, %v2246_v18, %v2248_v15 }
0x1108   :  { %v2260_v26 = vadd.f32 %v2252_v62, %v2195_v16  ;;  %v4767_v16 = vrot.slane %v2263_v57, %v5472_v1 }
0x1113   :  { %v2292_v54 = vpop.permute.xlu1 %2291 }
0x1114   :  { %v2295_v51 = vmul.f32 %v2292_v54, %v4747_v60  ;;  %v2294_v25 = vmul.f32 %v2292_v54, %v4750_v21  ;;  %v2297_v13 = vmul.f32 %v2292_v54, %v4757_v0  ;;  %v2296_v47 = vmul.f32 %v2292_v54, %v4760_v3 }
0x1115   :  { %v2298_v33 = vmul.f32 %v2292_v54, %v4767_v16 }
0x1116   :  { %2306 = vrot.lane.b32.xlu1 %v2295_v51, %s2906_s22  ;;  %2304 = vrot.lane.b32.xlu0 %v2294_v25, %s2906_s22 }
0x111a   :  { %2310 = vrot.lane.b32.xlu1 %v2297_v13, %s2906_s22  ;;  %2308 = vrot.lane.b32.xlu0 %v2296_v47, %s2906_s22 }
0x111e   :  { %2327 = vperm.xlu1 %2878, %v4651_v43   ;;  %2312 = vrot.lane.b32.xlu0 %v2298_v33, %s2906_s22 }
0x1122   :  { %2879 = vset.pattern.permute.xlu1 %v5478_v31 }
0x1188   :  { %v2307_v38 = vpop.permute.xlu1 %2306  ;;  %v2305_v35 = vpop.permute.xlu0 %2304 }
0x1189   :  { %v2314_v52 = vsel %vm249_vm0, %v2305_v35, %v2307_v38 }
0x118a   :  { %v2322_v61 = vadd.f32 %v2314_v52, %v2257_v24 }
0x118c   :  { %v2311_v8 = vpop.permute.xlu1 %2310  ;;  %v2309_v44 = vpop.permute.xlu0 %2308 }
0x118d   :  { %v2315_v45 = vsel %vm249_vm0, %v2307_v38, %v2309_v44  ;;  %v2316_v1 = vsel %vm249_vm0, %v2309_v44, %v2311_v8  ;;  %v5482_v44 = vmov 18  }
0x118e   :  { %v2323_v39 = vadd.f32 %v2315_v45, %v2258_v32  ;;  %v2324_v37 = vadd.f32 %v2316_v1, %v2259_v6  ;;  %v5479_v6 = vmov 15   ;;  %v5483_v45 = vmov 20  }
0x118f   :  { %v5484_v1 = vmov 19  }
0x1190   :  { %v2313_v56 = vpop.permute.xlu0 %2312 }
0x1191   :  { %v2317_v42 = vsel %vm249_vm0, %v2311_v8, %v2313_v56  ;;  %v5481_v8 = vmov 17   ;;  %v5486_v56 = vmov 21  }
0x1192   :  { %v2325_v17 = vadd.f32 %v2317_v42, %v2260_v26  ;;  %v5487_v42 = vmov 0  }
0x119d   :  { %v2328_v18 = vpop.permute.xlu1 %2327 }
0x119e   :  { %v2331_v30 = vmul.f32 %v2328_v18, %v4450_v2  ;;  %v2330_v11 = vmul.f32 %v2328_v18, %v4453_v22  ;;  %v2333_v24 = vmul.f32 %v2328_v18, %v4460_v28  ;;  %v2332_v59 = vmul.f32 %v2328_v18, %v4463_v19 }
0x119f   :  { %v2334_v32 = vmul.f32 %v2328_v18, %v4470_v48 }
0x11a0   :  { %2342 = vrot.lane.b32.xlu1 %v2331_v30, %s2909_s30  ;;  %2340 = vrot.lane.b32.xlu0 %v2330_v11, %s2909_s30 }
0x11a4   :  { %2346 = vrot.lane.b32.xlu1 %v2333_v24, %s2909_s30  ;;  %2344 = vrot.lane.b32.xlu0 %v2332_v59, %s2909_s30 }
0x11a8   :  { %2363 = vperm.xlu1 %2879, %v4651_v43   ;;  %2348 = vrot.lane.b32.xlu0 %v2334_v32, %s2909_s30 }
0x11ac   :  { %2881 = vset.pattern.permute.xlu1 %v5479_v6 }
0x1212   :  { %v2343_v15 = vpop.permute.xlu1 %2342  ;;  %v2341_v62 = vpop.permute.xlu0 %2340 }
0x1213   :  { %v2350_v26 = vsel %vm694_vm2, %v2341_v62, %v2343_v15 }
0x1214   :  { %v2358_v63 = vadd.f32 %v2350_v26, %v2322_v61  ;;  %v5480_v61 = vmov 16  }
0x1216   :  { %v2347_v7 = vpop.permute.xlu1 %2346  ;;  %v2345_v57 = vpop.permute.xlu0 %2344 }
0x1217   :  { %v2351_v54 = vsel %vm694_vm2, %v2343_v15, %v2345_v57  ;;  %v2352_v51 = vsel %vm694_vm2, %v2345_v57, %v2347_v7 }
0x1218   :  { %v4792_v25 = vadd.f32 %v2351_v54, %v2323_v39  ;;  %v4794_v13 = vadd.f32 %v2352_v51, %v2324_v37  ;;  %v5485_v39 = vmov 23  }
0x121a   :  { %v2349_v47 = vpop.permute.xlu0 %2348 }
0x121b   :  { %v2353_v33 = vsel %vm694_vm2, %v2347_v7, %v2349_v47 }
0x121c   :  { %v4797_v31 = vadd.f32 %v2353_v33, %v2325_v17  ;;  %v5488_v17 = vmov 22  }
0x1227   :  { %v2364_v38 = vpop.permute.xlu1 %2363 }
0x1228   :  { %v2367_v35 = vmul.f32 %v2364_v38, %v4498_v50  ;;  %v2366_v52 = vmul.f32 %v2364_v38, %v4488_v40  ;;  %v2370_v37 = vmul.f32 %v2364_v38, %v4495_v55  ;;  %v2368_v18 = vmul.f32 %v2364_v38, %v4485_v53 }
0x1229   :  { %v2369_v30 = vmul.f32 %v2364_v38, %v4505_v12 }
0x122a   :  { %2378 = vrot.lane.b32.xlu1 %v2367_v35, %s2909_s30  ;;  %2376 = vrot.lane.b32.xlu0 %v2366_v52, %s2909_s30 }
0x122e   :  { %2435 = vperm.xlu1 %2881, %v4651_v43   ;;  %2399 = vperm.xlu0 %2880, %v4651_v43  }
0x1232   :  { %2882 = vset.pattern.permute.xlu1 %v5480_v61  ;;  %2883 = vset.pattern.permute.xlu0 %v5481_v8 }
0x1233   :  { %2471 = vperm.xlu1 %2882, %v4651_v43   ;;  %2507 = vperm.xlu0 %2883, %v4651_v43  }
0x1237   :  { %2884 = vset.pattern.permute.xlu1 %v5482_v44  ;;  %2886 = vset.pattern.permute.xlu0 %v5483_v45 }
0x1238   :  { %2543 = vperm.xlu1 %2884, %v4651_v43   ;;  %2615 = vperm.xlu0 %2886, %v4651_v43  }
0x123c   :  { %2885 = vset.pattern.permute.xlu1 %v5484_v1  ;;  %2889 = vset.pattern.permute.xlu0 %v5485_v39 }
0x123d   :  { %2579 = vperm.xlu1 %2885, %v4651_v43   ;;  %2723 = vperm.xlu0 %2889, %v4651_v43  }
0x1241   :  { %2887 = vset.pattern.permute.xlu1 %v5486_v56  ;;  %2384 = vrot.lane.b32.xlu0 %v2370_v37, %s2909_s30 }
0x1242   :  { %2651 = vperm.xlu1 %2887, %v4651_v43   ;;  %2891 = vset.pattern.permute.xlu0 %v5487_v42 }
0x1246   :  { %2888 = vset.pattern.permute.xlu1 %v5488_v17 }
0x1247   :  { %2687 = vperm.xlu1 %2888, %v4651_v43  }
0x124b   :  { %2380 = vrot.lane.b32.xlu1 %v2368_v18, %s2909_s30 }
0x124c   :  { %2890 = vset.pattern.permute.xlu1 %v5487_v42 }
0x124f   :  { %2382 = vrot.lane.b32.xlu1 %v2369_v30, %s2909_s30 }
0x129c   :  { %v2379_v11 = vpop.permute.xlu1 %2378  ;;  %v2377_v24 = vpop.permute.xlu0 %2376 }
0x129d   :  { %v2386_v59 = vsel %vm694_vm2, %v2377_v24, %v2379_v11 }
0x129e   :  { %v4830_v32 = vadd.f32 %v2386_v59, %v2358_v63 }
0x12ad   :  { %v2436_v6 = vpop.permute.xlu1 %2435  ;;  %v2400_v15 = vpop.permute.xlu0 %2399 }
0x12ae   :  { %v2403_v43 = vmul.f32 %v2400_v15, %v4524_v49  ;;  %v2402_v62 = vmul.f32 %v2400_v15, %v4527_v9  ;;  %v2405_v7 = vmul.f32 %v2400_v15, %v4534_v27  ;;  %v2404_v57 = vmul.f32 %v2400_v15, %v4537_v41 }
0x12af   :  { %v2438_v63 = vmul.f32 %v2436_v6, %v4628_v46  ;;  %v2406_v54 = vmul.f32 %v2400_v15, %v4544_v29  ;;  %v2440_v47 = vmul.f32 %v2436_v6, %v4638_v58  ;;  %v2439_v33 = vmul.f32 %v2436_v6, %v4625_v34 }
0x12b0   :  { %2414 = vrot.lane.b32.xlu0 %v2403_v43, %s2909_s30  ;;  %2412 = vrot.lane.b32.xlu1 %v2402_v62, %s2909_s30  ;;  %v2442_v35 = vmul.f32 %v2436_v6, %v4645_v5  ;;  %v2441_v52 = vmul.f32 %v2436_v6, %v4635_v36 }
0x12b2   :  { %v2472_v26 = vpop.permute.xlu1 %2471  ;;  %v2508_v37 = vpop.permute.xlu0 %2507 }
0x12b3   :  { %v2475_v8 = vmul.f32 %v2472_v26, %v4716_v10  ;;  %v2474_v44 = vmul.f32 %v2472_v26, %v4719_v23  ;;  %v2477_v1 = vmul.f32 %v2472_v26, %v4726_v20  ;;  %v2476_v39 = vmul.f32 %v2472_v26, %v4729_v4 }
0x12b4   :  { %2418 = vrot.lane.b32.xlu0 %v2405_v7, %s2909_s30  ;;  %2416 = vrot.lane.b32.xlu1 %v2404_v57, %s2909_s30  ;;  %v2478_v42 = vmul.f32 %v2472_v26, %v4736_v14  ;;  %v2510_v17 = vmul.f32 %v2508_v37, %v4750_v21  ;;  %v2511_v59 = vmul.f32 %v2508_v37, %v4747_v60 }
0x12b5   :  { %v2512_v6 = vmul.f32 %v2508_v37, %v4760_v3 }
0x12b7   :  { %v2544_v51 = vpop.permute.xlu1 %2543 }
0x12b8   :  { %2448 = vrot.lane.b32.xlu0 %v2438_v63, %s2909_s30  ;;  %2420 = vrot.lane.b32.xlu1 %v2406_v54, %s2909_s30  ;;  %v2546_v62 = vmul.f32 %v2544_v51, %v4453_v22  ;;  %v2547_v26 = vmul.f32 %v2544_v51, %v4450_v2  ;;  %v2549_v7 = vmul.f32 %v2544_v51, %v4460_v28  ;;  %v2616_v54 = vpop.permute.xlu0 %2615 }
0x12b9   :  { %v2550_v57 = vmul.f32 %v2544_v51, %v4470_v48  ;;  %v2619_v48 = vmul.f32 %v2616_v54, %v4524_v49 }
0x12bc   :  { %v2580_v38 = vpop.permute.xlu1 %2579  ;;  %2452 = vrot.lane.b32.xlu0 %v2440_v47, %s2909_s30  ;;  %2450 = vrot.lane.b32.xlu1 %v2439_v33, %s2909_s30 }
0x12bd   :  { %v2582_v63 = vmul.f32 %v2580_v38, %v4488_v40  ;;  %v2583_v2 = vmul.f32 %v2580_v38, %v4498_v50  ;;  %v2584_v22 = vmul.f32 %v2580_v38, %v4485_v53  ;;  %v2585_v28 = vmul.f32 %v2580_v38, %v4505_v12 }
0x12be   :  { %v2618_v40 = vmul.f32 %v2616_v54, %v4527_v9  ;;  %v2621_v53 = vmul.f32 %v2616_v54, %v4534_v27  ;;  %v2620_v50 = vmul.f32 %v2616_v54, %v4537_v41  ;;  %v2622_v12 = vmul.f32 %v2616_v54, %v4544_v29  ;;  %v2758_v29 = vld [vmem:[%s5031_s4] sm:$0xff] }
0x12c0   :  { %2456 = vrot.lane.b32.xlu0 %v2442_v35, %s2909_s30  ;;  %2454 = vrot.lane.b32.xlu1 %v2441_v52, %s2909_s30 }
0x12c1   :  { %v4852_v61 = vpop.permute.xlu1 %2651 }
0x12c2   :  { %v2656_v49 = vmul.f32 %v4852_v61, %v4638_v58  ;;  %v2655_v9 = vmul.f32 %v4852_v61, %v4625_v34  ;;  %v2658_v27 = vmul.f32 %v4852_v61, %v4645_v5  ;;  %v2657_v41 = vmul.f32 %v4852_v61, %v4635_v36 }
0x12c4   :  { %2486 = vrot.lane.b32.xlu0 %v2475_v8, %s2909_s30  ;;  %2484 = vrot.lane.b32.xlu1 %v2474_v44, %s2909_s30 }
0x12c6   :  { %v4858_v45 = vpop.permute.xlu1 %2687 }
0x12c7   :  { %v2690_v34 = vmul.f32 %v4858_v45, %v4719_v23  ;;  %v2691_v36 = vmul.f32 %v4858_v45, %v4716_v10  ;;  %v2694_v58 = vmul.f32 %v4858_v45, %v4736_v14  ;;  %v2693_v5 = vmul.f32 %v4858_v45, %v4726_v20  ;;  %v2724_v23 = vpop.permute.xlu0 %2723 }
0x12c8   :  { %2490 = vrot.lane.b32.xlu0 %v2477_v1, %s2909_s30  ;;  %2488 = vrot.lane.b32.xlu1 %v2476_v39, %s2909_s30  ;;  %v2729_v10 = vmul.f32 %v2724_v23, %v4757_v0  ;;  %v2728_v14 = vmul.f32 %v2724_v23, %v4760_v3  ;;  %v2730_v20 = vmul.f32 %v2724_v23, %v4767_v16 }
0x12ca   :  { %v2381_v56 = vpop.permute.xlu1 %2380 }
0x12cb   :  { %v2387_v18 = vsel %vm694_vm2, %v2379_v11, %v2381_v56  ;;  %v2514_v11 = vmul.f32 %v2508_v37, %v4767_v16  ;;  %v2385_v47 = vpop.permute.xlu0 %2384 }
0x12cc   :  { %v4868_v30 = vadd.f32 %v2387_v18, %v4792_v25  ;;  %2492 = vrot.lane.b32.xlu1 %v2478_v42, %s2909_s30  ;;  %2520 = vrot.lane.b32.xlu0 %v2510_v17, %s2909_s30  ;;  %v2513_v25 = vmul.f32 %v2508_v37, %v4757_v0 }
0x12ce   :  { %v4872_v24 = vpop.permute.xlu1 %2382 }
0x12cf   :  { %v2388_v15 = vsel %vm694_vm2, %v2381_v56, %v4872_v24  ;;  %v2389_v0 = vsel %vm694_vm2, %v4872_v24, %v2385_v47 }
0x12d0   :  { %v4879_v43 = vadd.f32 %v2388_v15, %v4794_v13  ;;  %2522 = vrot.lane.b32.xlu1 %v2511_v59, %s2909_s30  ;;  %2524 = vrot.lane.b32.xlu0 %v2512_v6, %s2909_s30  ;;  %v2548_v13 = vmul.f32 %v2544_v51, %v4463_v19  ;;  %v2586_v19 = vmul.f32 %v2580_v38, %v4495_v55 }
0x12d1   :  { %v2654_v55 = vmul.f32 %v4852_v61, %v4628_v46  ;;  %v2692_v46 = vmul.f32 %v4858_v45, %v4729_v4  ;;  %v2727_v4 = vmul.f32 %v2724_v23, %v4747_v60  ;;  %v2726_v51 = vmul.f32 %v2724_v23, %v4750_v21 }
0x12d2   :  { %v2397_v44 = vadd.f32 %v2389_v0, %v4797_v31 }
0x12d4   :  { %2526 = vrot.lane.b32.xlu1 %v2513_v25, %s2909_s30  ;;  %2528 = vrot.lane.b32.xlu0 %v2514_v11, %s2909_s30 }
0x12d8   :  { %2556 = vrot.lane.b32.xlu1 %v2546_v62, %s2914_s6  ;;  %2558 = vrot.lane.b32.xlu0 %v2547_v26, %s2914_s6 }
0x12dc   :  { %2560 = vrot.lane.b32.xlu1 %v2548_v13, %s2914_s6  ;;  %2562 = vrot.lane.b32.xlu0 %v2549_v7, %s2914_s6 }
0x12e0   :  { %2564 = vrot.lane.b32.xlu1 %v2550_v57, %s2914_s6  ;;  %2592 = vrot.lane.b32.xlu0 %v2582_v63, %s2914_s6 }
0x12e4   :  { %2594 = vrot.lane.b32.xlu1 %v2583_v2, %s2914_s6  ;;  %2596 = vrot.lane.b32.xlu0 %v2584_v22, %s2914_s6 }
0x12e8   :  { %2598 = vrot.lane.b32.xlu1 %v2585_v28, %s2914_s6  ;;  %2600 = vrot.lane.b32.xlu0 %v2586_v19, %s2914_s6 }
0x12ec   :  { %2630 = vrot.lane.b32.xlu0 %v2619_v48, %s2914_s6  ;;  %2628 = vrot.lane.b32.xlu1 %v2618_v40, %s2914_s6 }
0x12f0   :  { %2634 = vrot.lane.b32.xlu0 %v2621_v53, %s2914_s6  ;;  %2632 = vrot.lane.b32.xlu1 %v2620_v50, %s2914_s6 }
0x12f4   :  { %2664 = vrot.lane.b32.xlu0 %v2654_v55, %s2914_s6  ;;  %2636 = vrot.lane.b32.xlu1 %v2622_v12, %s2914_s6 }
0x12f8   :  { %2668 = vrot.lane.b32.xlu0 %v2656_v49, %s2914_s6  ;;  %2666 = vrot.lane.b32.xlu1 %v2655_v9, %s2914_s6 }
0x12fc   :  { %2672 = vrot.lane.b32.xlu0 %v2658_v27, %s2914_s6  ;;  %2670 = vrot.lane.b32.xlu1 %v2657_v41, %s2914_s6 }
0x1300   :  { %2700 = vrot.lane.b32.xlu0 %v2690_v34, %s2914_s6  ;;  %2761 = vperm.xlu1 %2890, %v2758_v29  }
0x1304   :  { %2704 = vrot.lane.b32.xlu0 %v2692_v46, %s2914_s6  ;;  %2702 = vrot.lane.b32.xlu1 %v2691_v36, %s2914_s6 }
0x1308   :  { %2708 = vrot.lane.b32.xlu0 %v2694_v58, %s2914_s6  ;;  %2706 = vrot.lane.b32.xlu1 %v2693_v5, %s2914_s6 }
0x130c   :  { %2738 = vrot.lane.b32.xlu0 %v2727_v4, %s2914_s6  ;;  %2736 = vrot.lane.b32.xlu1 %v2726_v51, %s2914_s6 }
0x1310   :  { %2742 = vrot.lane.b32.xlu0 %v2729_v10, %s2914_s6  ;;  %2740 = vrot.lane.b32.xlu1 %v2728_v14, %s2914_s6 }
0x1314   :  { %2744 = vrot.lane.b32.xlu1 %v2730_v20, %s2914_s6 }
0x1322   :  { %v2413_v60 = vpop.permute.xlu1 %2412  ;;  %v2415_v33 = vpop.permute.xlu0 %2414 }
0x1323   :  { %v2422_v21 = vsel %vm694_vm2, %v2413_v60, %v2415_v33 }
0x1324   :  { %v2430_v38 = vadd.f32 %v2422_v21, %v4830_v32 }
0x1326   :  { %v2417_v35 = vpop.permute.xlu1 %2416  ;;  %v2419_v52 = vpop.permute.xlu0 %2418 }
0x1327   :  { %v2423_v3 = vsel %vm694_vm2, %v2415_v33, %v2417_v35  ;;  %v2424_v61 = vsel %vm694_vm2, %v2417_v35, %v2419_v52 }
0x1328   :  { %v2431_v16 = vadd.f32 %v2423_v3, %v4868_v30  ;;  %v2432_v8 = vadd.f32 %v2424_v61, %v4879_v43 }
0x132a   :  { %v2421_v45 = vpop.permute.xlu1 %2420  ;;  %v2449_v1 = vpop.permute.xlu0 %2448 }
0x132b   :  { %v2425_v39 = vsel %vm694_vm2, %v2419_v52, %v2421_v45 }
0x132c   :  { %v2433_v32 = vadd.f32 %v2425_v39, %v2397_v44 }
0x132e   :  { %v2451_v37 = vpop.permute.xlu1 %2450  ;;  %v2453_v56 = vpop.permute.xlu0 %2452 }
0x132f   :  { %v2458_v42 = vsel %vm694_vm2, %v2449_v1, %v2451_v37  ;;  %v2459_v17 = vsel %vm694_vm2, %v2451_v37, %v2453_v56 }
0x1330   :  { %v2466_v18 = vadd.f32 %v2458_v42, %v2430_v38  ;;  %v2467_v24 = vadd.f32 %v2459_v17, %v2431_v16 }
0x1332   :  { %v2455_v59 = vpop.permute.xlu1 %2454  ;;  %v2457_v6 = vpop.permute.xlu0 %2456 }
0x1333   :  { %v2460_v30 = vsel %vm694_vm2, %v2453_v56, %v2455_v59  ;;  %v2461_v15 = vsel %vm694_vm2, %v2455_v59, %v2457_v6 }
0x1334   :  { %v2468_v31 = vadd.f32 %v2460_v30, %v2432_v8  ;;  %v2469_v43 = vadd.f32 %v2461_v15, %v2433_v32 }
0x1336   :  { %v2485_v25 = vpop.permute.xlu1 %2484  ;;  %v2487_v11 = vpop.permute.xlu0 %2486 }
0x1337   :  { %v2494_v51 = vsel %vm694_vm2, %v2485_v25, %v2487_v11 }
0x1338   :  { %v2502_v20 = vadd.f32 %v2494_v51, %v2466_v18 }
0x133a   :  { %v2489_v62 = vpop.permute.xlu1 %2488  ;;  %v2491_v26 = vpop.permute.xlu0 %2490 }
0x133b   :  { %v2495_v60 = vsel %vm694_vm2, %v2487_v11, %v2489_v62  ;;  %v2496_v33 = vsel %vm694_vm2, %v2489_v62, %v2491_v26 }
0x133c   :  { %v2503_v3 = vadd.f32 %v2495_v60, %v2467_v24  ;;  %v2504_v61 = vadd.f32 %v2496_v33, %v2468_v31 }
0x133e   :  { %v2493_v13 = vpop.permute.xlu1 %2492  ;;  %v2521_v7 = vpop.permute.xlu0 %2520 }
0x133f   :  { %v2497_v45 = vsel %vm694_vm2, %v2491_v26, %v2493_v13 }
0x1340   :  { %v2505_v6 = vadd.f32 %v2497_v45, %v2469_v43 }
0x1342   :  { %v2523_v57 = vpop.permute.xlu1 %2522  ;;  %v2525_v63 = vpop.permute.xlu0 %2524 }
0x1343   :  { %v2530_v14 = vsel %vm694_vm2, %v2521_v7, %v2523_v57  ;;  %v2531_v35 = vsel %vm694_vm2, %v2523_v57, %v2525_v63 }
0x1344   :  { %v2538_v38 = vadd.f32 %v2530_v14, %v2502_v20  ;;  %v2539_v37 = vadd.f32 %v2531_v35, %v2503_v3 }
0x1346   :  { %v2527_v2 = vpop.permute.xlu1 %2526  ;;  %v2529_v22 = vpop.permute.xlu0 %2528 }
0x1347   :  { %v2532_v52 = vsel %vm694_vm2, %v2525_v63, %v2527_v2  ;;  %v2533_v17 = vsel %vm694_vm2, %v2527_v2, %v2529_v22 }
0x1348   :  { %v2540_v56 = vadd.f32 %v2532_v52, %v2504_v61  ;;  %v2541_v7 = vadd.f32 %v2533_v17, %v2505_v6 }
0x134a   :  { %v2557_v28 = vpop.permute.xlu1 %2556  ;;  %v2559_v19 = vpop.permute.xlu0 %2558 }
0x134b   :  { %v2566_v21 = vsel %vm867_vm3, %v2557_v28, %v2559_v19 }
0x134c   :  { %v2574_v16 = vadd.f32 %v2566_v21, %v2538_v38 }
0x134e   :  { %v2561_v54 = vpop.permute.xlu1 %2560  ;;  %v2563_v48 = vpop.permute.xlu0 %2562 }
0x134f   :  { %v2567_v1 = vsel %vm867_vm3, %v2559_v19, %v2561_v54  ;;  %v2568_v39 = vsel %vm867_vm3, %v2561_v54, %v2563_v48 }
0x1350   :  { %v2575_v30 = vadd.f32 %v2567_v1, %v2539_v37  ;;  %v2576_v15 = vadd.f32 %v2568_v39, %v2540_v56 }
0x1352   :  { %v2565_v40 = vpop.permute.xlu1 %2564  ;;  %v2593_v53 = vpop.permute.xlu0 %2592 }
0x1353   :  { %v2569_v11 = vsel %vm867_vm3, %v2563_v48, %v2565_v40 }
0x1354   :  { %v2577_v54 = vadd.f32 %v2569_v11, %v2541_v7 }
0x1356   :  { %v2597_v50 = vpop.permute.xlu0 %2596  ;;  %v2595_v55 = vpop.permute.xlu1 %2594 }
0x1357   :  { %v2602_v0 = vsel %vm867_vm3, %v2593_v53, %v2595_v55  ;;  %v2603_v18 = vsel %vm867_vm3, %v2595_v55, %v2597_v50 }
0x1358   :  { %v2610_v42 = vadd.f32 %v2602_v0, %v2574_v16  ;;  %v2611_v57 = vadd.f32 %v2603_v18, %v2575_v30 }
0x135a   :  { %v2601_v12 = vpop.permute.xlu0 %2600  ;;  %v2599_v49 = vpop.permute.xlu1 %2598 }
0x135b   :  { %v2604_v24 = vsel %vm867_vm3, %v2597_v50, %v2599_v49  ;;  %v2605_v28 = vsel %vm867_vm3, %v2599_v49, %v2601_v12 }
0x135c   :  { %v2612_v63 = vadd.f32 %v2604_v24, %v2576_v15 }
0x135e   :  { %v2631_v9 = vpop.permute.xlu0 %2630  ;;  %v2629_v41 = vpop.permute.xlu1 %2628 }
0x135f   :  { %v2638_v32 = vsel %vm867_vm3, %v2629_v41, %v2631_v9 }
0x1360   :  { %v2646_v31 = vadd.f32 %v2638_v32, %v2610_v42 }
0x1362   :  { %v2635_v27 = vpop.permute.xlu0 %2634  ;;  %v2633_v34 = vpop.permute.xlu1 %2632 }
0x1363   :  { %v2639_v62 = vsel %vm867_vm3, %v2631_v9, %v2633_v34  ;;  %v2640_v26 = vsel %vm867_vm3, %v2633_v34, %v2635_v27  ;;  %v2613_v34 = vadd.f32 %v2605_v28, %v2577_v54 }
0x1364   :  { %v2647_v53 = vadd.f32 %v2639_v62, %v2611_v57  ;;  %v2648_v48 = vadd.f32 %v2640_v26, %v2612_v63 }
0x1366   :  { %v2665_v29 = vpop.permute.xlu0 %2664  ;;  %v2637_v36 = vpop.permute.xlu1 %2636 }
0x1367   :  { %v2641_v55 = vsel %vm867_vm3, %v2635_v27, %v2637_v36 }
0x136a   :  { %v2669_v46 = vpop.permute.xlu0 %2668  ;;  %v2667_v5 = vpop.permute.xlu1 %2666 }
0x136b   :  { %v2674_v59 = vsel %vm867_vm3, %v2665_v29, %v2667_v5  ;;  %v2675_v43 = vsel %vm867_vm3, %v2667_v5, %v2669_v46  ;;  %v2649_v5 = vadd.f32 %v2641_v55, %v2613_v34 }
0x136c   :  { %v2682_v2 = vadd.f32 %v2674_v59, %v2646_v31 }
0x136e   :  { %v4974_v58 = vpop.permute.xlu0 %2672  ;;  %v2671_v4 = vpop.permute.xlu1 %2670 }
0x136f   :  { %v2676_v19 = vsel %vm867_vm3, %v2669_v46, %v2671_v4  ;;  %v2677_v46 = vsel %vm867_vm3, %v2671_v4, %v4974_v58 }
0x1370   :  { %v2684_v12 = vadd.f32 %v2676_v19, %v2648_v48  ;;  %v2685_v21 = vadd.f32 %v2677_v46, %v2649_v5 }
0x1372   :  { %v2701_v23 = vpop.permute.xlu0 %2700 }
0x1376   :  { %v2705_v10 = vpop.permute.xlu0 %2704 }
0x137a   :  { %v2709_v8 = vpop.permute.xlu0 %2708 }
0x137e   :  { %v2739_v22 = vpop.permute.xlu0 %2738 }
0x137f   :  { %v4978_v47 = vpop.permute.xlu1 %2761 }
0x1382   :  { %v2743_v51 = vpop.permute.xlu0 %2742 }
0x1383   :  { %v2703_v44 = vpop.permute.xlu1 %2702 }
0x1384   :  { %v2710_v13 = vsel %vm867_vm3, %v2701_v23, %v2703_v44  ;;  %v2711_v9 = vsel %vm867_vm3, %v2703_v44, %v2705_v10  ;;  %v2683_v23 = vadd.f32 %v2675_v43, %v2647_v53 }
0x1385   :  { %v2718_v40 = vadd.f32 %v2710_v13, %v2682_v2 }
0x1386   :  { %v2719_v14 = vadd.f32 %v2711_v9, %v2683_v23 }
0x1387   :  { %v2707_v25 = vpop.permute.xlu1 %2706 }
0x1388   :  { %v2712_v41 = vsel %vm867_vm3, %v2705_v10, %v2707_v25  ;;  %v2713_v36 = vsel %vm867_vm3, %v2707_v25, %v2709_v8 }
0x1389   :  { %v2720_v20 = vadd.f32 %v2712_v41, %v2684_v12  ;;  %v2721_v0 = vadd.f32 %v2713_v36, %v2685_v21 }
0x138b   :  { %v2737_v50 = vpop.permute.xlu1 %2736 }
0x138c   :  { %v2746_v29 = vsel %vm867_vm3, %v2737_v50, %v2739_v22 }
0x138d   :  { %v2754_v49 = vadd.f32 %v2746_v29, %v2718_v40 }
0x138f   :  { %v2764_v60 = vadd.f32 %v4978_v47, %v2754_v49  ;;  %v2741_v27 = vpop.permute.xlu1 %2740 }
0x1390   :  { %v2747_v10 = vsel %vm867_vm3, %v2739_v22, %v2741_v27  ;;  %v2748_v33 = vsel %vm867_vm3, %v2741_v27, %v2743_v51 }
0x1391   :  { %v2768_v38 = vmax.f32 %v2764_v60, 0.0  ;;  %v2755_v35 = vadd.f32 %v2747_v10, %v2719_v14  ;;  %v2756_v52 = vadd.f32 %v2748_v33, %v2720_v20 }
0x1393   :  { %2772 = vst [vmem:[%s5032_s5] sm:$0xff] %v2768_v38  ;;  %v2765_v58 = vadd.f32 %v4978_v47, %v2755_v35  ;;  %v2766_v4 = vadd.f32 %v4978_v47, %v2756_v52  ;;  %v2745_v3 = vpop.permute.xlu1 %2744 }
0x1394   :  { %v2749_v61 = vsel %vm867_vm3, %v2743_v51, %v2745_v3 }
0x1395   :  { %v2769_v16 = vmax.f32 %v2765_v58, 0.0  ;;  %v2770_v8 = vmax.f32 %v2766_v4, 0.0  ;;  %v2757_v44 = vadd.f32 %v2749_v61, %v2721_v0 }
0x1397   :  { %2773 = vst [vmem:[%s5032_s5 + $0x8] sm:$0xff] %v2769_v16  ;;  %2774 = vst [vmem:[%s5032_s5 + $0x10] sm:$0xff] %v2770_v8  ;;  %v2767_v45 = vadd.f32 %v4978_v47, %v2757_v44 }
0x1399   :  { %v2771_v1 = vmax.f32 %v2767_v45, 0.0 }
0x139b   :  { %2775 = vst [vmem:[%s5032_s5 + $0x18] sm:$0xff] %v2771_v1 }

</bundles_post_ra>
